<compile_context>
chip_gen: v6e
topology: v6e:2x2x1
jax: 0.10.0
libtpu: 0.0.40
codegen_flags: <defaults>
</compile_context>

<pallas_src>
import functools

import jax
import jax.numpy as jnp
import numpy as np
from jax.experimental import pallas as pl
from jax.experimental.pallas import tpu as pltpu

BN_EPS = 0.8          # nn.BatchNorm1d(out_feat, 0.8) -> second positional arg is eps
LEAK = 0.2            # LeakyReLU negative slope
LANE = 128            # lane width: keep output last dim a multiple of this
HEAD_TILE_MAX = 1024  # out_dim tile size for the streamed output head
VMEM_LIMIT = 32 * 1024 * 1024


def _round_up(x, m):
    return ((x + m - 1) // m) * m


def _leaky_relu(x):
    return jnp.where(x >= 0, x, LEAK * x)


def _bn_leaky(x, gamma, beta):
    """Training-mode BatchNorm1d (biased batch stats) as fused scale/shift, then LeakyReLU.

    One reduction pass (s1, s2) instead of two; applied as x*scale + shift
    (2 VPU ops per element instead of 4). eps=0.8 -> no cancellation risk in
    the s2/B - mean^2 variance form.
    """
    inv_b = 1.0 / x.shape[0]
    s1 = jnp.sum(x, axis=0, keepdims=True)
    s2 = jnp.sum(x * x, axis=0, keepdims=True)
    mean = s1 * inv_b
    var = s2 * inv_b - mean * mean
    scale = gamma * jax.lax.rsqrt(var + BN_EPS)
    shift = beta - mean * scale
    return _leaky_relu(x * scale + shift)


# ---------------------------------------------------------------------------
# Kernel 1: trunk (layers 1-4). Small weights -> fully resident, grid=().
# b2/b3/b4 are mathematically cancelled by the BatchNorm mean and not passed in.
# ---------------------------------------------------------------------------
def trunk_kernel(
    z_ref,
    w1_ref, b1_ref,
    w2_ref, g2_ref, be2_ref,
    w3_ref, g3_ref, be3_ref,
    w4_ref, g4_ref, be4_ref,
    h_ref,
):
    # Block 1: Linear + LeakyReLU (no norm)
    h = jnp.dot(z_ref[...], w1_ref[...], preferred_element_type=jnp.float32) + b1_ref[...]
    h = _leaky_relu(h)

    # Block 2: Linear + BN + LeakyReLU   (bias dropped: cancelled by BN mean)
    h = jnp.dot(h, w2_ref[...], preferred_element_type=jnp.float32)
    h = _bn_leaky(h, g2_ref[...], be2_ref[...])

    # Block 3
    h = jnp.dot(h, w3_ref[...], preferred_element_type=jnp.float32)
    h = _bn_leaky(h, g3_ref[...], be3_ref[...])

    # Block 4 (bf16 weights on the MXU, f32 accumulation)
    h = jnp.dot(h.astype(jnp.bfloat16), w4_ref[...], preferred_element_type=jnp.float32)
    h = _bn_leaky(h, g4_ref[...], be4_ref[...])

    h_ref[...] = h


# ---------------------------------------------------------------------------
# Kernel 2: output head. w5 dominates HBM bytes -> streamed along out_dim.
# ---------------------------------------------------------------------------
def head_kernel(h_ref, w5_ref, b5_ref, out_ref):
    acc = jnp.dot(h_ref[...].astype(jnp.bfloat16), w5_ref[...],
                  preferred_element_type=jnp.float32)
    out_ref[...] = jnp.tanh(acc + b5_ref[...])


def init_generator_params(key, latent_dim, img_shape):
    """Deterministic synthetic parameters (PyTorch-style uniform fan-in init)."""
    out_dim = int(np.prod(img_shape))
    dims = [latent_dim, 128, 256, 512, 1024, out_dim]
    params = {}
    keys = jax.random.split(key, len(dims) - 1)
    for i, (din, dout) in enumerate(zip(dims[:-1], dims[1:])):
        bound = 1.0 / np.sqrt(din)
        kw, kb = jax.random.split(keys[i])
        params[f"w{i+1}"] = jax.random.uniform(
            kw, (din, dout), jnp.float32, minval=-bound, maxval=bound)
        params[f"b{i+1}"] = jax.random.uniform(
            kb, (1, dout), jnp.float32, minval=-bound, maxval=bound)
    # BatchNorm affine params for layers 2, 3, 4 (standard init: gamma=1, beta=0)
    for i, dout in zip((2, 3, 4), (256, 512, 1024)):
        params[f"g{i}"] = jnp.ones((1, dout), jnp.float32)
        params[f"be{i}"] = jnp.zeros((1, dout), jnp.float32)
    return params


@functools.partial(jax.jit, static_argnames=("img_shape",))
def generator_forward(z, params, img_shape):
    B = z.shape[0]
    out_dim = int(np.prod(img_shape))

    # Lane-dense, tileable output padding (sliced off after the kernel).
    out_dim_128 = _round_up(out_dim, LANE)
    tn = min(HEAD_TILE_MAX, out_dim_128)
    out_dim_pad = _round_up(out_dim_128, tn)
    n_tiles = out_dim_pad // tn

    # Large weights stored / streamed as bf16 (kernel is HBM-bandwidth bound).
    w4 = params["w4"].astype(jnp.bfloat16)
    w5 = params["w5"].astype(jnp.bfloat16)
    b5 = params["b5"]
    if out_dim_pad != out_dim:
        w5 = jnp.pad(w5, ((0, 0), (0, out_dim_pad - out_dim)))
        b5 = jnp.pad(b5, ((0, 0), (0, out_dim_pad - out_dim)))

    trunk_args = (
        z,
        params["w1"], params["b1"],
        params["w2"], params["g2"], params["be2"],
        params["w3"], params["g3"], params["be3"],
        w4, params["g4"], params["be4"],
    )

    def full_spec(a):
        # Whole-array block, resident in VMEM (single grid point).
        return pl.BlockSpec(a.shape, lambda: tuple(0 for _ in a.shape))

    # --- Trunk: layers 1-4 fused, everything resident -----------------------
    h = pl.pallas_call(
        trunk_kernel,
        out_shape=jax.ShapeDtypeStruct((B, 1024), jnp.float32),
        grid_spec=pltpu.PrefetchScalarGridSpec(
            num_scalar_prefetch=0,
            grid=(),
            in_specs=[full_spec(a) for a in trunk_args],
            out_specs=pl.BlockSpec((B, 1024), lambda: (0, 0)),
        ),
        compiler_params=pltpu.CompilerParams(vmem_limit_bytes=VMEM_LIMIT),
    )(*trunk_args)

    # --- Head: stream w5 along out_dim, double-buffered, megacore-parallel ---
    flat = pl.pallas_call(
        head_kernel,
        out_shape=jax.ShapeDtypeStruct((B, out_dim_pad), jnp.float32),
        grid_spec=pltpu.PrefetchScalarGridSpec(
            num_scalar_prefetch=0,
            grid=(n_tiles,),
            in_specs=[
                pl.BlockSpec((B, 1024), lambda j: (0, 0)),    # h: same block every step
                pl.BlockSpec((1024, tn), lambda j: (0, j)),   # w5 tile streamed
                pl.BlockSpec((1, tn), lambda j: (0, j)),      # b5 tile streamed
            ],
            out_specs=pl.BlockSpec((B, tn), lambda j: (0, j)),
        ),
        compiler_params=pltpu.CompilerParams(
            dimension_semantics=("parallel",),   # v7x: split w5 stream across both TCs
            vmem_limit_bytes=VMEM_LIMIT,
        ),
    )(h, w5, b5)

    # Glue: img.view(B, *img_shape) -> NCHW image tensor (drop lane padding).
    return flat[:, :out_dim].reshape((B,) + tuple(img_shape))


def generator_reference(z, params, img_shape):
    """Pure-JAX f32 reference (full semantics, including the redundant biases)."""
    def bn(x, gamma, beta):
        mean = jnp.mean(x, axis=0, keepdims=True)
        var = jnp.mean((x - mean) ** 2, axis=0, keepdims=True)
        return (x - mean) * jax.lax.rsqrt(var + BN_EPS) * gamma + beta

    h = _leaky_relu(z @ params["w1"] + params["b1"])
    for i in (2, 3, 4):
        h = h @ params[f"w{i}"] + params[f"b{i}"]
        h = _leaky_relu(bn(h, params[f"g{i}"], params[f"be{i}"]))
    out = jnp.tanh(h @ params["w5"] + params["b5"])
    return out.reshape((z.shape[0],) + tuple(img_shape))


if __name__ == "__main__":
    key = jax.random.PRNGKey(0)
    latent_dim = 64
    batch = 8

    # Case 1: out_dim already a multiple of 128 (1x16x16 -> 256), single tile.
    # Case 2: out_dim = 784 (1x28x28), exercises the lane-padding path.
    for img_shape in ((1, 16, 16), (1, 28, 28)):
        k_param, k_z = jax.random.split(jax.random.fold_in(key, hash(img_shape) & 0xFFFF))
        params = init_generator_params(k_param, latent_dim, img_shape)
        z = jax.random.normal(k_z, (batch, latent_dim), jnp.float32)

        img = generator_forward(z, params, img_shape)
        img = jax.block_until_ready(img)

        ref = generator_reference(z, params, img_shape)
        # bf16-streamed w4/w5 vs f32 reference -> slightly loosened tolerance.
        np.testing.assert_allclose(np.asarray(img), np.asarray(ref),
                                   rtol=5e-2, atol=3e-2)
        assert img.shape == (batch,) + img_shape

    print("KERNEL_OK")
</pallas_src>

<mosaic_0001>
module attributes {stable_mosaic.version = 11 : i64} {
  func.func @trunk_kernel(%arg0: memref<8x64xf32, #tpu.memory_space<vmem>>, %arg1: memref<64x128xf32, #tpu.memory_space<vmem>>, %arg2: memref<1x128xf32, #tpu.memory_space<vmem>>, %arg3: memref<128x256xf32, #tpu.memory_space<vmem>>, %arg4: memref<1x256xf32, #tpu.memory_space<vmem>>, %arg5: memref<1x256xf32, #tpu.memory_space<vmem>>, %arg6: memref<256x512xf32, #tpu.memory_space<vmem>>, %arg7: memref<1x512xf32, #tpu.memory_space<vmem>>, %arg8: memref<1x512xf32, #tpu.memory_space<vmem>>, %arg9: memref<512x1024xbf16, #tpu.memory_space<vmem>>, %arg10: memref<1x1024xf32, #tpu.memory_space<vmem>>, %arg11: memref<1x1024xf32, #tpu.memory_space<vmem>>, %arg12: memref<8x1024xf32, #tpu.memory_space<vmem>>) attributes {dimension_semantics = [], scalar_prefetch = 0 : i64, scratch_operands = 0 : i64, tpu.core_type = #tpu.core_type<tc>} {
    %c0 = arith.constant 0 : index
    %c0_0 = arith.constant 0 : index
    %0 = vector.load %arg0[%c0, %c0_0] : memref<8x64xf32, #tpu.memory_space<vmem>>, vector<8x64xf32>
    %c0_1 = arith.constant 0 : index
    %c0_2 = arith.constant 0 : index
    %1 = vector.load %arg1[%c0_1, %c0_2] : memref<64x128xf32, #tpu.memory_space<vmem>>, vector<64x128xf32>
    %cst = arith.constant dense<0.000000e+00> : vector<8x128xf32>
    %2 = tpu.matmul %0, %1, %cst {dimension_numbers = #tpu.dot_dimension_numbers<[1], [0], [0], [1], [0, 0, 1, 1], [], []>} : vector<8x64xf32>, vector<64x128xf32>, vector<8x128xf32> -> vector<8x128xf32>
    %c0_3 = arith.constant 0 : index
    %c0_4 = arith.constant 0 : index
    %3 = vector.load %arg2[%c0_3, %c0_4] : memref<1x128xf32, #tpu.memory_space<vmem>>, vector<1x128xf32>
    %4 = vector.broadcast %3 : vector<1x128xf32> to vector<8x128xf32>
    %5 = arith.addf %2, %4 : vector<8x128xf32>
    %cst_5 = arith.constant 0.000000e+00 : f32
    %6 = vector.broadcast %cst_5 : f32 to vector<8x128xf32>
    %7 = arith.cmpf oge, %5, %6 : vector<8x128xf32>
    %cst_6 = arith.constant 2.000000e-01 : f32
    %8 = vector.broadcast %cst_6 : f32 to vector<8x128xf32>
    %9 = arith.mulf %8, %5 : vector<8x128xf32>
    %10 = arith.select %7, %5, %9 : vector<8x128xi1>, vector<8x128xf32>
    %c0_7 = arith.constant 0 : index
    %c0_8 = arith.constant 0 : index
    %11 = vector.load %arg3[%c0_7, %c0_8] : memref<128x256xf32, #tpu.memory_space<vmem>>, vector<128x256xf32>
    %cst_9 = arith.constant dense<0.000000e+00> : vector<8x256xf32>
    %12 = tpu.matmul %10, %11, %cst_9 {dimension_numbers = #tpu.dot_dimension_numbers<[1], [0], [0], [1], [0, 0, 1, 1], [], []>} : vector<8x128xf32>, vector<128x256xf32>, vector<8x256xf32> -> vector<8x256xf32>
    %c0_10 = arith.constant 0 : index
    %c0_11 = arith.constant 0 : index
    %13 = vector.load %arg4[%c0_10, %c0_11] : memref<1x256xf32, #tpu.memory_space<vmem>>, vector<1x256xf32>
    %c0_12 = arith.constant 0 : index
    %c0_13 = arith.constant 0 : index
    %14 = vector.load %arg5[%c0_12, %c0_13] : memref<1x256xf32, #tpu.memory_space<vmem>>, vector<1x256xf32>
    %cst_14 = arith.constant dense<0.000000e+00> : vector<256xf32>
    %15 = vector.multi_reduction <add>, %12, %cst_14 [0] : vector<8x256xf32> to vector<256xf32>
    %16 = vector.shape_cast %15 : vector<256xf32> to vector<1x256xf32>
    %17 = arith.mulf %12, %12 : vector<8x256xf32>
    %cst_15 = arith.constant dense<0.000000e+00> : vector<256xf32>
    %18 = vector.multi_reduction <add>, %17, %cst_15 [0] : vector<8x256xf32> to vector<256xf32>
    %19 = vector.shape_cast %18 : vector<256xf32> to vector<1x256xf32>
    %cst_16 = arith.constant 1.250000e-01 : f32
    %20 = vector.broadcast %cst_16 : f32 to vector<1x256xf32>
    %21 = arith.mulf %16, %20 : vector<1x256xf32>
    %cst_17 = arith.constant 1.250000e-01 : f32
    %22 = vector.broadcast %cst_17 : f32 to vector<1x256xf32>
    %23 = arith.mulf %19, %22 : vector<1x256xf32>
    %24 = arith.mulf %21, %21 : vector<1x256xf32>
    %25 = arith.subf %23, %24 : vector<1x256xf32>
    %cst_18 = arith.constant 8.000000e-01 : f32
    %26 = vector.broadcast %cst_18 : f32 to vector<1x256xf32>
    %27 = arith.addf %25, %26 : vector<1x256xf32>
    %28 = math.rsqrt %27 : vector<1x256xf32>
    %29 = arith.mulf %13, %28 : vector<1x256xf32>
    %30 = arith.mulf %21, %29 : vector<1x256xf32>
    %31 = arith.subf %14, %30 : vector<1x256xf32>
    %32 = vector.broadcast %29 : vector<1x256xf32> to vector<8x256xf32>
    %33 = arith.mulf %12, %32 : vector<8x256xf32>
    %34 = vector.broadcast %31 : vector<1x256xf32> to vector<8x256xf32>
    %35 = arith.addf %33, %34 : vector<8x256xf32>
    %cst_19 = arith.constant 0.000000e+00 : f32
    %36 = vector.broadcast %cst_19 : f32 to vector<8x256xf32>
    %37 = arith.cmpf oge, %35, %36 : vector<8x256xf32>
    %cst_20 = arith.constant 2.000000e-01 : f32
    %38 = vector.broadcast %cst_20 : f32 to vector<8x256xf32>
    %39 = arith.mulf %38, %35 : vector<8x256xf32>
    %40 = arith.select %37, %35, %39 : vector<8x256xi1>, vector<8x256xf32>
    %c0_21 = arith.constant 0 : index
    %c0_22 = arith.constant 0 : index
    %41 = vector.load %arg6[%c0_21, %c0_22] : memref<256x512xf32, #tpu.memory_space<vmem>>, vector<256x512xf32>
    %cst_23 = arith.constant dense<0.000000e+00> : vector<8x512xf32>
    %42 = tpu.matmul %40, %41, %cst_23 {dimension_numbers = #tpu.dot_dimension_numbers<[1], [0], [0], [1], [0, 0, 1, 1], [], []>} : vector<8x256xf32>, vector<256x512xf32>, vector<8x512xf32> -> vector<8x512xf32>
    %c0_24 = arith.constant 0 : index
    %c0_25 = arith.constant 0 : index
    %43 = vector.load %arg7[%c0_24, %c0_25] : memref<1x512xf32, #tpu.memory_space<vmem>>, vector<1x512xf32>
    %c0_26 = arith.constant 0 : index
    %c0_27 = arith.constant 0 : index
    %44 = vector.load %arg8[%c0_26, %c0_27] : memref<1x512xf32, #tpu.memory_space<vmem>>, vector<1x512xf32>
    %cst_28 = arith.constant dense<0.000000e+00> : vector<512xf32>
    %45 = vector.multi_reduction <add>, %42, %cst_28 [0] : vector<8x512xf32> to vector<512xf32>
    %46 = vector.shape_cast %45 : vector<512xf32> to vector<1x512xf32>
    %47 = arith.mulf %42, %42 : vector<8x512xf32>
    %cst_29 = arith.constant dense<0.000000e+00> : vector<512xf32>
    %48 = vector.multi_reduction <add>, %47, %cst_29 [0] : vector<8x512xf32> to vector<512xf32>
    %49 = vector.shape_cast %48 : vector<512xf32> to vector<1x512xf32>
    %cst_30 = arith.constant 1.250000e-01 : f32
    %50 = vector.broadcast %cst_30 : f32 to vector<1x512xf32>
    %51 = arith.mulf %46, %50 : vector<1x512xf32>
    %cst_31 = arith.constant 1.250000e-01 : f32
    %52 = vector.broadcast %cst_31 : f32 to vector<1x512xf32>
    %53 = arith.mulf %49, %52 : vector<1x512xf32>
    %54 = arith.mulf %51, %51 : vector<1x512xf32>
    %55 = arith.subf %53, %54 : vector<1x512xf32>
    %cst_32 = arith.constant 8.000000e-01 : f32
    %56 = vector.broadcast %cst_32 : f32 to vector<1x512xf32>
    %57 = arith.addf %55, %56 : vector<1x512xf32>
    %58 = math.rsqrt %57 : vector<1x512xf32>
    %59 = arith.mulf %43, %58 : vector<1x512xf32>
    %60 = arith.mulf %51, %59 : vector<1x512xf32>
    %61 = arith.subf %44, %60 : vector<1x512xf32>
    %62 = vector.broadcast %59 : vector<1x512xf32> to vector<8x512xf32>
    %63 = arith.mulf %42, %62 : vector<8x512xf32>
    %64 = vector.broadcast %61 : vector<1x512xf32> to vector<8x512xf32>
    %65 = arith.addf %63, %64 : vector<8x512xf32>
    %cst_33 = arith.constant 0.000000e+00 : f32
    %66 = vector.broadcast %cst_33 : f32 to vector<8x512xf32>
    %67 = arith.cmpf oge, %65, %66 : vector<8x512xf32>
    %cst_34 = arith.constant 2.000000e-01 : f32
    %68 = vector.broadcast %cst_34 : f32 to vector<8x512xf32>
    %69 = arith.mulf %68, %65 : vector<8x512xf32>
    %70 = arith.select %67, %65, %69 : vector<8x512xi1>, vector<8x512xf32>
    %71 = arith.truncf %70 : vector<8x512xf32> to vector<8x512xbf16>
    %c0_35 = arith.constant 0 : index
    %c0_36 = arith.constant 0 : index
    %72 = vector.load %arg9[%c0_35, %c0_36] : memref<512x1024xbf16, #tpu.memory_space<vmem>>, vector<512x1024xbf16>
    %cst_37 = arith.constant dense<0.000000e+00> : vector<8x1024xf32>
    %73 = tpu.matmul %71, %72, %cst_37 {dimension_numbers = #tpu.dot_dimension_numbers<[1], [0], [0], [1], [0, 0, 1, 1], [], []>} : vector<8x512xbf16>, vector<512x1024xbf16>, vector<8x1024xf32> -> vector<8x1024xf32>
    %c0_38 = arith.constant 0 : index
    %c0_39 = arith.constant 0 : index
    %74 = vector.load %arg10[%c0_38, %c0_39] : memref<1x1024xf32, #tpu.memory_space<vmem>>, vector<1x1024xf32>
    %c0_40 = arith.constant 0 : index
    %c0_41 = arith.constant 0 : index
    %75 = vector.load %arg11[%c0_40, %c0_41] : memref<1x1024xf32, #tpu.memory_space<vmem>>, vector<1x1024xf32>
    %cst_42 = arith.constant dense<0.000000e+00> : vector<1024xf32>
    %76 = vector.multi_reduction <add>, %73, %cst_42 [0] : vector<8x1024xf32> to vector<1024xf32>
    %77 = vector.shape_cast %76 : vector<1024xf32> to vector<1x1024xf32>
    %78 = arith.mulf %73, %73 : vector<8x1024xf32>
    %cst_43 = arith.constant dense<0.000000e+00> : vector<1024xf32>
    %79 = vector.multi_reduction <add>, %78, %cst_43 [0] : vector<8x1024xf32> to vector<1024xf32>
    %80 = vector.shape_cast %79 : vector<1024xf32> to vector<1x1024xf32>
    %cst_44 = arith.constant 1.250000e-01 : f32
    %81 = vector.broadcast %cst_44 : f32 to vector<1x1024xf32>
    %82 = arith.mulf %77, %81 : vector<1x1024xf32>
    %cst_45 = arith.constant 1.250000e-01 : f32
    %83 = vector.broadcast %cst_45 : f32 to vector<1x1024xf32>
    %84 = arith.mulf %80, %83 : vector<1x1024xf32>
    %85 = arith.mulf %82, %82 : vector<1x1024xf32>
    %86 = arith.subf %84, %85 : vector<1x1024xf32>
    %cst_46 = arith.constant 8.000000e-01 : f32
    %87 = vector.broadcast %cst_46 : f32 to vector<1x1024xf32>
    %88 = arith.addf %86, %87 : vector<1x1024xf32>
    %89 = math.rsqrt %88 : vector<1x1024xf32>
    %90 = arith.mulf %74, %89 : vector<1x1024xf32>
    %91 = arith.mulf %82, %90 : vector<1x1024xf32>
    %92 = arith.subf %75, %91 : vector<1x1024xf32>
    %93 = vector.broadcast %90 : vector<1x1024xf32> to vector<8x1024xf32>
    %94 = arith.mulf %73, %93 : vector<8x1024xf32>
    %95 = vector.broadcast %92 : vector<1x1024xf32> to vector<8x1024xf32>
    %96 = arith.addf %94, %95 : vector<8x1024xf32>
    %cst_47 = arith.constant 0.000000e+00 : f32
    %97 = vector.broadcast %cst_47 : f32 to vector<8x1024xf32>
    %98 = arith.cmpf oge, %96, %97 : vector<8x1024xf32>
    %cst_48 = arith.constant 2.000000e-01 : f32
    %99 = vector.broadcast %cst_48 : f32 to vector<8x1024xf32>
    %100 = arith.mulf %99, %96 : vector<8x1024xf32>
    %101 = arith.select %98, %96, %100 : vector<8x1024xi1>, vector<8x1024xf32>
    %c0_49 = arith.constant 0 : index
    %c0_50 = arith.constant 0 : index
    %102 = vector.load %arg12[%c0_49, %c0_50] : memref<8x1024xf32, #tpu.memory_space<vmem>>, vector<8x1024xf32>
    tpu.vector_store %arg12[%c0_49, %c0_50], %101 {strides = array<i32>} : memref<8x1024xf32, #tpu.memory_space<vmem>>, vector<8x1024xf32>,
    return
  }
}

module attributes {stable_mosaic.version = 11 : i64} {
  func.func @head_kernel(%arg0: i32, %arg1: memref<8x1024xf32, #tpu.memory_space<vmem>>, %arg2: memref<1024x256xbf16, #tpu.memory_space<vmem>>, %arg3: memref<1x256xf32, #tpu.memory_space<vmem>>, %arg4: memref<8x256xf32, #tpu.memory_space<vmem>>) attributes {dimension_semantics = [#tpu.dimension_semantics<parallel>], iteration_bounds = array<i64: 1>, scalar_prefetch = 0 : i64, scratch_operands = 0 : i64, tpu.core_type = #tpu.core_type<tc>, window_params = [{pipeline_mode = #tpu.pipeline_mode<synchronous>, transform_indices = @transform_0, window_bounds = array<i64: 8, 1024>}, {transform_indices = @transform_1, window_bounds = array<i64: 1024, 256>}, {transform_indices = @transform_2, window_bounds = array<i64: 1, 256>}, {transform_indices = @transform_3, window_bounds = array<i64: 8, 256>}]} {
    %c0 = arith.constant 0 : index
    %c0_0 = arith.constant 0 : index
    %0 = vector.load %arg1[%c0, %c0_0] : memref<8x1024xf32, #tpu.memory_space<vmem>>, vector<8x1024xf32>
    %1 = arith.truncf %0 : vector<8x1024xf32> to vector<8x1024xbf16>
    %c0_1 = arith.constant 0 : index
    %c0_2 = arith.constant 0 : index
    %2 = vector.load %arg2[%c0_1, %c0_2] : memref<1024x256xbf16, #tpu.memory_space<vmem>>, vector<1024x256xbf16>
    %cst = arith.constant dense<0.000000e+00> : vector<8x256xf32>
    %3 = tpu.matmul %1, %2, %cst {dimension_numbers = #tpu.dot_dimension_numbers<[1], [0], [0], [1], [0, 0, 1, 1], [], []>} : vector<8x1024xbf16>, vector<1024x256xbf16>, vector<8x256xf32> -> vector<8x256xf32>
    %c0_3 = arith.constant 0 : index
    %c0_4 = arith.constant 0 : index
    %4 = vector.load %arg3[%c0_3, %c0_4] : memref<1x256xf32, #tpu.memory_space<vmem>>, vector<1x256xf32>
    %5 = vector.broadcast %4 : vector<1x256xf32> to vector<8x256xf32>
    %6 = arith.addf %3, %5 : vector<8x256xf32>
    %7 = math.tanh %6 : vector<8x256xf32>
    %c0_5 = arith.constant 0 : index
    %c0_6 = arith.constant 0 : index
    %8 = vector.load %arg4[%c0_5, %c0_6] : memref<8x256xf32, #tpu.memory_space<vmem>>, vector<8x256xf32>
    tpu.vector_store %arg4[%c0_5, %c0_6], %7 {strides = array<i32>} : memref<8x256xf32, #tpu.memory_space<vmem>>, vector<8x256xf32>,
    return
  }
  func.func @transform_0(%arg0: i32) -> (i32, i32) {
    %c0_i32 = arith.constant 0 : i32
    %c0_i32_0 = arith.constant 0 : i32
    %c0_i32_1 = arith.constant 0 : i32
    return %c0_i32, %c0_i32_0 : i32, i32
  }
  func.func @transform_1(%arg0: i32) -> (i32, i32) {
    %c0_i32 = arith.constant 0 : i32
    %c0_i32_0 = arith.constant 0 : i32
    return %c0_i32, %arg0 : i32, i32
  }
  func.func @transform_2(%arg0: i32) -> (i32, i32) {
    %c0_i32 = arith.constant 0 : i32
    %c0_i32_0 = arith.constant 0 : i32
    return %c0_i32, %arg0 : i32, i32
  }
  func.func @transform_3(%arg0: i32) -> (i32, i32) {
    %c0_i32 = arith.constant 0 : i32
    %c0_i32_0 = arith.constant 0 : i32
    return %c0_i32, %arg0 : i32, i32
  }
}

</mosaic_0001>

<bundles_post_ra>
// kernel: generator_forward.3
= control target key start
LH: loop header
LB: loop body
LE: loop exit
PB: predicated region body
PF: predicated region fallthrough
CT: control target
= control target key end

     0   :  { %s1743_s1 = inlined_call_operand.vmem [shape: bf16[1024,256], index: 1, kind: input, shape index: {}]   ;;  %s1744_s0 = inlined_call_operand.vmem [shape: f32[8,1024], index: 0, kind: input, shape index: {}]   ;;  %s1745_s2 = inlined_call_operand.vmem [shape: f32[1,256], index: 2, kind: input, shape index: {}]   ;;  %s1746_s3 = inlined_call_operand.vmem [shape: f32[8,256], index: 3, kind: output, shape index: {}]  }
   0x1   :  { %v1110_v0 = vld [vmem:[%s1743_s1 + $0x74] ss:$8 sps:$4 sm:$0xff]   ;;  %v1114_v2 = vld [vmem:[%s1743_s1 + $0x70] ss:$8 sps:$4 sm:$0xff]   ;;  %v1116_v4 = vld [vmem:[%s1743_s1 + $0x64] ss:$8 sps:$4 sm:$0xff]  }
   0x2   :  { %v1112_v1 = vld [vmem:[%s1743_s1 + $0x174] ss:$8 sps:$4 sm:$0xff]   ;;  %810 = vmatprep.subr.bf16.mxu0 %v1110_v0  ;;  %v1115_v3 = vld [vmem:[%s1743_s1 + $0x170] ss:$8 sps:$4 sm:$0xff]   ;;  %v1118_v5 = vld [vmem:[%s1743_s1 + $0x164] ss:$8 sps:$4 sm:$0xff]  }
   0x3   :  { %851 = vmatprep.subr.bf16.mxu1 %v1112_v1  ;;  %811 = vmatpush1.bf16.msra.mxu0 %v1114_v2  ;;  %v1120_v6 = vld [vmem:[%s1743_s1 + $0x60] ss:$8 sps:$4 sm:$0xff]   ;;  %v1122_v8 = vld [vmem:[%s1743_s1 + $0x54] ss:$8 sps:$4 sm:$0xff]   ;;  %v1126_v10 = vld [vmem:[%s1743_s1 + $0x50] ss:$8 sps:$4 sm:$0xff]  }
   0x4   :  { %852 = vmatpush1.bf16.msra.mxu1 %v1115_v3  ;;  %812 = vmatprep.subr.bf16.mxu0 %v1116_v4  ;;  %v1121_v7 = vld [vmem:[%s1743_s1 + $0x160] ss:$8 sps:$4 sm:$0xff]   ;;  %v1124_v9 = vld [vmem:[%s1743_s1 + $0x154] ss:$8 sps:$4 sm:$0xff]   ;;  %v1127_v11 = vld [vmem:[%s1743_s1 + $0x150] ss:$8 sps:$4 sm:$0xff]  }
   0x5   :  { %853 = vmatprep.subr.bf16.mxu1 %v1118_v5  ;;  %v1128_v12 = vld [vmem:[%s1743_s1 + $0x44] ss:$8 sps:$4 sm:$0xff]   ;;  %v1132_v14 = vld [vmem:[%s1743_s1 + $0x40] ss:$8 sps:$4 sm:$0xff]   ;;  %v1134_v16 = vld [vmem:[%s1743_s1 + $0x34] ss:$8 sps:$4 sm:$0xff]  }
   0x6   :  { %v1130_v13 = vld [vmem:[%s1743_s1 + $0x144] ss:$8 sps:$4 sm:$0xff]   ;;  %v1133_v15 = vld [vmem:[%s1743_s1 + $0x140] ss:$8 sps:$4 sm:$0xff]   ;;  %v1136_v17 = vld [vmem:[%s1743_s1 + $0x134] ss:$8 sps:$4 sm:$0xff]  }
   0x7   :  { %813 = vmatpush1.bf16.msra.mxu0 %v1120_v6  ;;  %v1138_v18 = vld [vmem:[%s1743_s1 + $0x30] ss:$8 sps:$4 sm:$0xff]   ;;  %v1140_v20 = vld [vmem:[%s1743_s1 + $0x24] ss:$8 sps:$4 sm:$0xff]   ;;  %v1144_v22 = vld [vmem:[%s1743_s1 + $0x20] ss:$8 sps:$4 sm:$0xff]  }
   0x8   :  { %854 = vmatpush1.bf16.msra.mxu1 %v1121_v7  ;;  %814 = vmatprep.subr.bf16.mxu0 %v1122_v8  ;;  %v1139_v19 = vld [vmem:[%s1743_s1 + $0x130] ss:$8 sps:$4 sm:$0xff]   ;;  %v1142_v21 = vld [vmem:[%s1743_s1 + $0x124] ss:$8 sps:$4 sm:$0xff]   ;;  %v1145_v23 = vld [vmem:[%s1743_s1 + $0x120] ss:$8 sps:$4 sm:$0xff]  }
   0x9   :  { %855 = vmatprep.subr.bf16.mxu1 %v1124_v9  ;;  %v1146_v24 = vld [vmem:[%s1743_s1 + $0x14] ss:$8 sps:$4 sm:$0xff]   ;;  %v1150_v26 = vld [vmem:[%s1743_s1 + $0x10] ss:$8 sps:$4 sm:$0xff]   ;;  %v1152_v28 = vld [vmem:[%s1743_s1 + $0x4] ss:$8 sps:$4 sm:$0xff]  }
   0xa   :  { %v1148_v25 = vld [vmem:[%s1743_s1 + $0x114] ss:$8 sps:$4 sm:$0xff]   ;;  %v1151_v27 = vld [vmem:[%s1743_s1 + $0x110] ss:$8 sps:$4 sm:$0xff]   ;;  %v1154_v29 = vld [vmem:[%s1743_s1 + $0x104] ss:$8 sps:$4 sm:$0xff]  }
   0xb   :  { %815 = vmatpush1.bf16.msra.mxu0 %v1126_v10  ;;  %v1156_v30 = vld [vmem:[%s1743_s1] ss:$8 sps:$4 sm:$0xff]   ;;  %v1158_v32 = vld [vmem:[%s1743_s1 + $0xf4] ss:$8 sps:$4 sm:$0xff]   ;;  %v1162_v34 = vld [vmem:[%s1743_s1 + $0xf0] ss:$8 sps:$4 sm:$0xff]  }
   0xc   :  { %856 = vmatpush1.bf16.msra.mxu1 %v1127_v11  ;;  %816 = vmatprep.subr.bf16.mxu0 %v1128_v12  ;;  %v1157_v31 = vld [vmem:[%s1743_s1 + $0x100] ss:$8 sps:$4 sm:$0xff]   ;;  %v1160_v33 = vld [vmem:[%s1743_s1 + $0x1f4] ss:$8 sps:$4 sm:$0xff]   ;;  %v1163_v35 = vld [vmem:[%s1743_s1 + $0x1f0] ss:$8 sps:$4 sm:$0xff]  }
   0xd   :  { %857 = vmatprep.subr.bf16.mxu1 %v1130_v13  ;;  %v1164_v36 = vld [vmem:[%s1743_s1 + $0xe4] ss:$8 sps:$4 sm:$0xff]   ;;  %v1168_v38 = vld [vmem:[%s1743_s1 + $0xe0] ss:$8 sps:$4 sm:$0xff]   ;;  %v1170_v40 = vld [vmem:[%s1743_s1 + $0xd4] ss:$8 sps:$4 sm:$0xff]  }
   0xe   :  { %v1166_v37 = vld [vmem:[%s1743_s1 + $0x1e4] ss:$8 sps:$4 sm:$0xff]   ;;  %v1169_v39 = vld [vmem:[%s1743_s1 + $0x1e0] ss:$8 sps:$4 sm:$0xff]   ;;  %v1172_v41 = vld [vmem:[%s1743_s1 + $0x1d4] ss:$8 sps:$4 sm:$0xff]  }
   0xf   :  { %817 = vmatpush1.bf16.msra.mxu0 %v1132_v14  ;;  %v1174_v42 = vld [vmem:[%s1743_s1 + $0xd0] ss:$8 sps:$4 sm:$0xff]   ;;  %v1176_v44 = vld [vmem:[%s1743_s1 + $0xc4] ss:$8 sps:$4 sm:$0xff]   ;;  %v1180_v47 = vld [vmem:[%s1743_s1 + $0xc0] ss:$8 sps:$4 sm:$0xff]  }
  0x10   :  { %858 = vmatpush1.bf16.msra.mxu1 %v1133_v15  ;;  %818 = vmatprep.subr.bf16.mxu0 %v1134_v16  ;;  %v1175_v43 = vld [vmem:[%s1743_s1 + $0x1d0] ss:$8 sps:$4 sm:$0xff]   ;;  %v1178_v45 = vld [vmem:[%s1743_s1 + $0x1c4] ss:$8 sps:$4 sm:$0xff]   ;;  %v1181_v48 = vld [vmem:[%s1743_s1 + $0x1c0] ss:$8 sps:$4 sm:$0xff]  }
  0x11   :  { %859 = vmatprep.subr.bf16.mxu1 %v1136_v17  ;;  %v15_v46 = vld [vmem:[%s1744_s0 + $0x8] sm:$0xff]  ;;  %v17_v50 = vld [vmem:[%s1744_s0 + $0x18] sm:$0xff]  ;;  %v14_v4 = vld [vmem:[%s1744_s0] sm:$0xff] }
  0x12   :  { %v23_v49 = vpack.c.bf16 %v15_v46, %v15_v46  ;;  %v1182_v51 = vld [vmem:[%s1743_s1 + $0xb4] ss:$8 sps:$4 sm:$0xff]   ;;  %v25_v52 = vpack.c.bf16 %v17_v50, %v17_v50  ;;  %v1186_v54 = vld [vmem:[%s1743_s1 + $0xb0] ss:$8 sps:$4 sm:$0xff]   ;;  %v1188_v56 = vld [vmem:[%s1743_s1 + $0xa4] ss:$8 sps:$4 sm:$0xff]   ;;  %v22_v8 = vpack.c.bf16 %v14_v4, %v14_v4 }
  0x13   :  { %819 = vmatpush1.bf16.msra.mxu0 %v1138_v18  ;;  %v1184_v53 = vld [vmem:[%s1743_s1 + $0x1b4] ss:$8 sps:$4 sm:$0xff]   ;;  %v1187_v55 = vld [vmem:[%s1743_s1 + $0x1b0] ss:$8 sps:$4 sm:$0xff]   ;;  %v1190_v57 = vld [vmem:[%s1743_s1 + $0x1a4] ss:$8 sps:$4 sm:$0xff]  }
  0x14   :  { %860 = vmatpush1.bf16.msra.mxu1 %v1139_v19  ;;  %820 = vmatprep.subr.bf16.mxu0 %v1140_v20  ;;  %v1192_v58 = vld [vmem:[%s1743_s1 + $0xa0] ss:$8 sps:$4 sm:$0xff]   ;;  %v1194_v60 = vld [vmem:[%s1743_s1 + $0x94] ss:$8 sps:$4 sm:$0xff]   ;;  %v1198_v62 = vld [vmem:[%s1743_s1 + $0x90] ss:$8 sps:$4 sm:$0xff]  }
  0x15   :  { %861 = vmatprep.subr.bf16.mxu1 %v1142_v21  ;;  %842 = vmatprep.mubr.bf16.mxu0 %v23_v49  ;;  %v1193_v59 = vld [vmem:[%s1743_s1 + $0x1a0] ss:$8 sps:$4 sm:$0xff]   ;;  %v1196_v61 = vld [vmem:[%s1743_s1 + $0x194] ss:$8 sps:$4 sm:$0xff]   ;;  %v1199_v63 = vld [vmem:[%s1743_s1 + $0x190] ss:$8 sps:$4 sm:$0xff]  }
  0x16   :  { %883 = vmatprep.mubr.bf16.mxu1 %v25_v52  ;;  %v1200_v0 = vld [vmem:[%s1743_s1 + $0x84] ss:$8 sps:$4 sm:$0xff]   ;;  %v1204_v2 = vld [vmem:[%s1743_s1 + $0x80] ss:$8 sps:$4 sm:$0xff]   ;;  %v16_v5 = vld [vmem:[%s1744_s0 + $0x10] sm:$0xff] }
  0x17   :  { %821 = vmatpush1.bf16.msra.mxu0 %v1144_v22  ;;  %v1202_v1 = vld [vmem:[%s1743_s1 + $0x184] ss:$8 sps:$4 sm:$0xff]   ;;  %v1205_v3 = vld [vmem:[%s1743_s1 + $0x180] ss:$8 sps:$4 sm:$0xff]   ;;  %v1208_v6 = vld [vmem:[%s1743_s1 + $0x274] ss:$8 sps:$4 sm:$0xff]   ;;  %v24_v9 = vpack.c.bf16 %v16_v5, %v16_v5 }
  0x18   :  { %862 = vmatpush1.bf16.msra.mxu1 %v1145_v23  ;;  %822 = vmatprep.subr.bf16.mxu0 %v1146_v24  ;;  %v1211_v7 = vld [vmem:[%s1743_s1 + $0x374] ss:$8 sps:$4 sm:$0xff]   ;;  %v1206_v10 = vld [vmem:[%s1743_s1 + $0x270] ss:$8 sps:$4 sm:$0xff]   ;;  %v1214_v12 = vld [vmem:[%s1743_s1 + $0x264] ss:$8 sps:$4 sm:$0xff]  }
  0x19   :  { %863 = vmatprep.subr.bf16.mxu1 %v1148_v25  ;;  %v1209_v11 = vld [vmem:[%s1743_s1 + $0x370] ss:$8 sps:$4 sm:$0xff]   ;;  %v1217_v13 = vld [vmem:[%s1743_s1 + $0x364] ss:$8 sps:$4 sm:$0xff]   ;;  %v1212_v14 = vld [vmem:[%s1743_s1 + $0x260] ss:$8 sps:$4 sm:$0xff]  }
  0x1a   :  { %v1215_v15 = vld [vmem:[%s1743_s1 + $0x360] ss:$8 sps:$4 sm:$0xff]   ;;  %v1220_v16 = vld [vmem:[%s1743_s1 + $0x254] ss:$8 sps:$4 sm:$0xff]   ;;  %v1218_v18 = vld [vmem:[%s1743_s1 + $0x250] ss:$8 sps:$4 sm:$0xff]  }
  0x1b   :  { %823 = vmatpush1.bf16.msra.mxu0 %v1150_v26  ;;  %v1223_v17 = vld [vmem:[%s1743_s1 + $0x354] ss:$8 sps:$4 sm:$0xff]   ;;  %v1221_v19 = vld [vmem:[%s1743_s1 + $0x350] ss:$8 sps:$4 sm:$0xff]   ;;  %v1226_v20 = vld [vmem:[%s1743_s1 + $0x244] ss:$8 sps:$4 sm:$0xff]  }
  0x1c   :  { %864 = vmatpush1.bf16.msra.mxu1 %v1151_v27  ;;  %824 = vmatprep.subr.bf16.mxu0 %v1152_v28  ;;  %v1229_v21 = vld [vmem:[%s1743_s1 + $0x344] ss:$8 sps:$4 sm:$0xff]   ;;  %v1224_v22 = vld [vmem:[%s1743_s1 + $0x240] ss:$8 sps:$4 sm:$0xff]   ;;  %v1232_v24 = vld [vmem:[%s1743_s1 + $0x234] ss:$8 sps:$4 sm:$0xff]  }
  0x1d   :  { %865 = vmatprep.subr.bf16.mxu1 %v1154_v29  ;;  %v1227_v23 = vld [vmem:[%s1743_s1 + $0x340] ss:$8 sps:$4 sm:$0xff]   ;;  %v1235_v25 = vld [vmem:[%s1743_s1 + $0x334] ss:$8 sps:$4 sm:$0xff]   ;;  %v1230_v26 = vld [vmem:[%s1743_s1 + $0x230] ss:$8 sps:$4 sm:$0xff]  }
  0x1e   :  { %v1233_v27 = vld [vmem:[%s1743_s1 + $0x330] ss:$8 sps:$4 sm:$0xff]   ;;  %v1238_v28 = vld [vmem:[%s1743_s1 + $0x224] ss:$8 sps:$4 sm:$0xff]   ;;  %v1260_v50 = vld [vmem:[%s1743_s1 + $0x2e0] ss:$8 sps:$4 sm:$0xff]  }
  0x1f   :  { %825 = vmatpush1.bf16.msra.mxu0 %v1156_v30  ;;  %v1241_v29 = vld [vmem:[%s1743_s1 + $0x324] ss:$8 sps:$4 sm:$0xff]   ;;  %v1236_v30 = vld [vmem:[%s1743_s1 + $0x220] ss:$8 sps:$4 sm:$0xff]   ;;  %v1254_v46 = vld [vmem:[%s1743_s1 + $0x2f0] ss:$8 sps:$4 sm:$0xff]  }
  0x20   :  { %866 = vmatpush1.bf16.msra.mxu1 %v1157_v31  ;;  %826 = vmatprep.subr.bf16.mxu0 %v1158_v32  ;;  %v1239_v31 = vld [vmem:[%s1743_s1 + $0x320] ss:$8 sps:$4 sm:$0xff]   ;;  %v1244_v32 = vld [vmem:[%s1743_s1 + $0x214] ss:$8 sps:$4 sm:$0xff]   ;;  %v1265_v49 = vld [vmem:[%s1743_s1 + $0x3e4] ss:$8 sps:$4 sm:$0xff]  }
  0x21   :  { %867 = vmatprep.subr.bf16.mxu1 %v1160_v33  ;;  %v1247_v33 = vld [vmem:[%s1743_s1 + $0x314] ss:$8 sps:$4 sm:$0xff]  }
  0x22   :  { %v1268_v52 = vld [vmem:[%s1743_s1 + $0x2d4] ss:$8 sps:$4 sm:$0xff]  }
  0x23   :  { %827 = vmatpush2.bf16.msra.mxu0 %v1162_v34  ;;  %v19_v34 = vld [vmem:[%s1744_s0 + $0x28] sm:$0xff]  ;;  %v1292_v4 = vld [vmem:[%s1743_s1 + $0x294] ss:$8 sps:$4 sm:$0xff]  }
  0x24   :  { %868 = vmatpush2.bf16.msra.mxu1 %v1163_v35  ;;  %828 = vmatprep.subr.bf16.mxu0 %v1164_v36  ;;  %v27_v35 = vpack.c.bf16 %v19_v34, %v19_v34  ;;  %v21_v36 = vld [vmem:[%s1744_s0 + $0x38] sm:$0xff] }
  0x25   :  { %869 = vmatprep.subr.bf16.mxu1 %v1166_v37  ;;  %v1242_v37 = vld [vmem:[%s1743_s1 + $0x210] ss:$8 sps:$4 sm:$0xff]   ;;  %v1295_v5 = vld [vmem:[%s1743_s1 + $0x394] ss:$8 sps:$4 sm:$0xff]  }
  0x27   :  { %829 = vmatpush2.bf16.msra.mxu0 %v1168_v38  ;;  %v1245_v38 = vld [vmem:[%s1743_s1 + $0x310] ss:$8 sps:$4 sm:$0xff]  }
  0x28   :  { %870 = vmatpush2.bf16.msra.mxu1 %v1169_v39  ;;  %830 = vmatprep.subr.bf16.mxu0 %v1170_v40  ;;  %v29_v39 = vpack.c.bf16 %v21_v36, %v21_v36  ;;  %v1250_v40 = vld [vmem:[%s1743_s1 + $0x204] ss:$8 sps:$4 sm:$0xff]  }
  0x29   :  { %871 = vmatprep.subr.bf16.mxu1 %v1172_v41  ;;  %v1253_v41 = vld [vmem:[%s1743_s1 + $0x304] ss:$8 sps:$4 sm:$0xff]  }
  0x2b   :  { %831 = vmatpush2.bf16.msra.mxu0 %v1174_v42  ;;  %v1248_v42 = vld [vmem:[%s1743_s1 + $0x200] ss:$8 sps:$4 sm:$0xff]  }
  0x2c   :  { %872 = vmatpush2.bf16.msra.mxu1 %v1175_v43  ;;  %832 = vmatprep.subr.bf16.mxu0 %v1176_v44  ;;  %v1251_v43 = vld [vmem:[%s1743_s1 + $0x300] ss:$8 sps:$4 sm:$0xff]   ;;  %v1256_v44 = vld [vmem:[%s1743_s1 + $0x2f4] ss:$8 sps:$4 sm:$0xff]  }
  0x2d   :  { %873 = vmatprep.subr.bf16.mxu1 %v1178_v45  ;;  %v1259_v45 = vld [vmem:[%s1743_s1 + $0x3f4] ss:$8 sps:$4 sm:$0xff]  }
  0x2f   :  { %833 = vmatpush2.bf16.msra.mxu0 %v1180_v47  ;;  %v1257_v47 = vld [vmem:[%s1743_s1 + $0x3f0] ss:$8 sps:$4 sm:$0xff]  }
  0x30   :  { %874 = vmatpush2.bf16.msra.mxu1 %v1181_v48  ;;  %834 = vmatprep.subr.bf16.mxu0 %v1182_v51  ;;  %v1262_v48 = vld [vmem:[%s1743_s1 + $0x2e4] ss:$8 sps:$4 sm:$0xff]   ;;  %v1263_v51 = vld [vmem:[%s1743_s1 + $0x3e0] ss:$8 sps:$4 sm:$0xff]  }
  0x31   :  { %875 = vmatprep.subr.bf16.mxu1 %v1184_v53  ;;  %v1271_v53 = vld [vmem:[%s1743_s1 + $0x3d4] ss:$8 sps:$4 sm:$0xff]  }
  0x33   :  { %835 = vmatpush2.bf16.msra.mxu0 %v1186_v54  ;;  %v1266_v54 = vld [vmem:[%s1743_s1 + $0x2d0] ss:$8 sps:$4 sm:$0xff]  }
  0x34   :  { %876 = vmatpush2.bf16.msra.mxu1 %v1187_v55  ;;  %836 = vmatprep.subr.bf16.mxu0 %v1188_v56  ;;  %v1269_v55 = vld [vmem:[%s1743_s1 + $0x3d0] ss:$8 sps:$4 sm:$0xff]   ;;  %v1274_v56 = vld [vmem:[%s1743_s1 + $0x2c4] ss:$8 sps:$4 sm:$0xff]  }
  0x35   :  { %877 = vmatprep.subr.bf16.mxu1 %v1190_v57  ;;  %v1277_v57 = vld [vmem:[%s1743_s1 + $0x3c4] ss:$8 sps:$4 sm:$0xff]  }
  0x37   :  { %837 = vmatpush2.bf16.msra.mxu0 %v1192_v58  ;;  %v1272_v58 = vld [vmem:[%s1743_s1 + $0x2c0] ss:$8 sps:$4 sm:$0xff]  }
  0x38   :  { %878 = vmatpush2.bf16.msra.mxu1 %v1193_v59  ;;  %838 = vmatprep.subr.bf16.mxu0 %v1194_v60  ;;  %v1275_v59 = vld [vmem:[%s1743_s1 + $0x3c0] ss:$8 sps:$4 sm:$0xff]   ;;  %v1280_v60 = vld [vmem:[%s1743_s1 + $0x2b4] ss:$8 sps:$4 sm:$0xff]  }
  0x39   :  { %879 = vmatprep.subr.bf16.mxu1 %v1196_v61  ;;  %v1283_v61 = vld [vmem:[%s1743_s1 + $0x3b4] ss:$8 sps:$4 sm:$0xff]  }
  0x3b   :  { %839 = vmatpush2.bf16.msra.mxu0 %v1198_v62  ;;  %v1278_v62 = vld [vmem:[%s1743_s1 + $0x2b0] ss:$8 sps:$4 sm:$0xff]  }
  0x3c   :  { %880 = vmatpush2.bf16.msra.mxu1 %v1199_v63  ;;  %840 = vmatprep.subr.bf16.mxu0 %v1200_v0  ;;  %v1281_v63 = vld [vmem:[%s1743_s1 + $0x3b0] ss:$8 sps:$4 sm:$0xff]   ;;  %v1286_v0 = vld [vmem:[%s1743_s1 + $0x2a4] ss:$8 sps:$4 sm:$0xff]  }
  0x3d   :  { %881 = vmatprep.subr.bf16.mxu1 %v1202_v1  ;;  %v1289_v1 = vld [vmem:[%s1743_s1 + $0x3a4] ss:$8 sps:$4 sm:$0xff]  }
  0x3f   :  { %841 = vmatpush2.bf16.msra.mxu0 %v1204_v2  ;;  %v1284_v2 = vld [vmem:[%s1743_s1 + $0x2a0] ss:$8 sps:$4 sm:$0xff]  }
  0x40   :  { %882 = vmatpush2.bf16.msra.mxu1 %v1205_v3  ;;  %892 = vmatprep.subr.bf16.mxu0 %v1208_v6  ;;  %v1287_v3 = vld [vmem:[%s1743_s1 + $0x3a0] ss:$8 sps:$4 sm:$0xff]   ;;  %v1290_v6 = vld [vmem:[%s1743_s1 + $0x290] ss:$8 sps:$4 sm:$0xff]  }
  0x41   :  { %933 = vmatprep.subr.bf16.mxu1 %v1211_v7  ;;  %v1293_v7 = vld [vmem:[%s1743_s1 + $0x390] ss:$8 sps:$4 sm:$0xff]  }
  0x42   :  { %843 = vmatmul.mubr.bf16.vlgmr.msra.gmra.mxu0 %v22_v8  ;;  %v1298_v8 = vld [vmem:[%s1743_s1 + $0x284] ss:$8 sps:$4 sm:$0xff]  }
  0x43   :  { %884 = vmatmul.mubr.bf16.vlgmr.msra.gmra.mxu1 %v24_v9  ;;  %893 = vmatpush1.bf16.msra.mxu0 %v1206_v10  ;;  %v1301_v9 = vld [vmem:[%s1743_s1 + $0x384] ss:$8 sps:$4 sm:$0xff]   ;;  %v1296_v10 = vld [vmem:[%s1743_s1 + $0x280] ss:$8 sps:$4 sm:$0xff]  }
  0x44   :  { %934 = vmatpush1.bf16.msra.mxu1 %v1209_v11  ;;  %894 = vmatprep.subr.bf16.mxu0 %v1214_v12  ;;  %v1299_v11 = vld [vmem:[%s1743_s1 + $0x380] ss:$8 sps:$4 sm:$0xff]  }
  0x45   :  { %935 = vmatprep.subr.bf16.mxu1 %v1217_v13  ;;  %924 = vmatprep.mubr.bf16.mxu0 %v27_v35  ;;  %v18_v12 = vld [vmem:[%s1744_s0 + $0x20] sm:$0xff]  ;;  %v20_v13 = vld [vmem:[%s1744_s0 + $0x30] sm:$0xff] }
  0x46   :  { %965 = vmatprep.mubr.bf16.mxu1 %v29_v39 }
  0x47   :  { %895 = vmatpush1.bf16.msra.mxu0 %v1212_v14  ;;  %v26_v14 = vpack.c.bf16 %v18_v12, %v18_v12 }
  0x48   :  { %936 = vmatpush1.bf16.msra.mxu1 %v1215_v15  ;;  %896 = vmatprep.subr.bf16.mxu0 %v1220_v16  ;;  %v28_v15 = vpack.c.bf16 %v20_v13, %v20_v13 }
  0x49   :  { %937 = vmatprep.subr.bf16.mxu1 %v1223_v17 }
  0x4b   :  { %897 = vmatpush1.bf16.msra.mxu0 %v1218_v18 }
  0x4c   :  { %938 = vmatpush1.bf16.msra.mxu1 %v1221_v19  ;;  %898 = vmatprep.subr.bf16.mxu0 %v1226_v20 }
  0x4d   :  { %939 = vmatprep.subr.bf16.mxu1 %v1229_v21 }
  0x4f   :  { %899 = vmatpush1.bf16.msra.mxu0 %v1224_v22 }
  0x50   :  { %940 = vmatpush1.bf16.msra.mxu1 %v1227_v23  ;;  %900 = vmatprep.subr.bf16.mxu0 %v1232_v24  ;;  %v160_v24 = vlaneseq }
  0x51   :  { %941 = vmatprep.subr.bf16.mxu1 %v1235_v25 }
  0x52   :  { %v161_v25 = vshrl.u32 %v160_v24, 7 }
  0x53   :  { %901 = vmatpush1.bf16.msra.mxu0 %v1230_v26 }
  0x54   :  { %942 = vmatpush1.bf16.msra.mxu1 %v1233_v27  ;;  %902 = vmatprep.subr.bf16.mxu0 %v1238_v28  ;;  %v162_v26 = vsub.s32 0, %v161_v25  ;;  %v158_v27 = vld [vmem:[%s1745_s2] sm:$0x3]  ;;  %v166_v28 = vsub.s32 1, %v161_v25 }
  0x55   :  { %943 = vmatprep.subr.bf16.mxu1 %v1241_v29 }
  0x56   :  { %v163_v29 = vrot.slane %v158_v27, %v162_v26 }
  0x57   :  { %903 = vmatpush1.bf16.msra.mxu0 %v1236_v30  ;;  %v167_v30 = vrot.slane %v158_v27, %v166_v28 }
  0x58   :  { %944 = vmatpush1.bf16.msra.mxu1 %v1239_v31  ;;  %904 = vmatprep.subr.bf16.mxu0 %v1244_v32 }
  0x59   :  { %945 = vmatprep.subr.bf16.mxu1 %v1247_v33 }
  0x5b   :  { %905 = vmatpush1.bf16.msra.mxu0 %v1242_v37 }
  0x5c   :  { %946 = vmatpush1.bf16.msra.mxu1 %v1245_v38  ;;  %906 = vmatprep.subr.bf16.mxu0 %v1250_v40 }
  0x5d   :  { %947 = vmatprep.subr.bf16.mxu1 %v1253_v41 }
  0x5f   :  { %907 = vmatpush1.bf16.msra.mxu0 %v1248_v42 }
  0x60   :  { %948 = vmatpush1.bf16.msra.mxu1 %v1251_v43  ;;  %908 = vmatprep.subr.bf16.mxu0 %v1256_v44 }
  0x61   :  { %949 = vmatprep.subr.bf16.mxu1 %v1259_v45 }
  0x63   :  { %909 = vmatpush2.bf16.msra.mxu0 %v1254_v46 }
  0x64   :  { %950 = vmatpush2.bf16.msra.mxu1 %v1257_v47  ;;  %910 = vmatprep.subr.bf16.mxu0 %v1262_v48 }
  0x65   :  { %951 = vmatprep.subr.bf16.mxu1 %v1265_v49 }
  0x67   :  { %911 = vmatpush2.bf16.msra.mxu0 %v1260_v50 }
  0x68   :  { %952 = vmatpush2.bf16.msra.mxu1 %v1263_v51  ;;  %912 = vmatprep.subr.bf16.mxu0 %v1268_v52 }
  0x69   :  { %953 = vmatprep.subr.bf16.mxu1 %v1271_v53 }
  0x6b   :  { %913 = vmatpush2.bf16.msra.mxu0 %v1266_v54 }
  0x6c   :  { %954 = vmatpush2.bf16.msra.mxu1 %v1269_v55  ;;  %914 = vmatprep.subr.bf16.mxu0 %v1274_v56 }
  0x6d   :  { %955 = vmatprep.subr.bf16.mxu1 %v1277_v57 }
  0x6f   :  { %915 = vmatpush2.bf16.msra.mxu0 %v1272_v58 }
  0x70   :  { %956 = vmatpush2.bf16.msra.mxu1 %v1275_v59  ;;  %916 = vmatprep.subr.bf16.mxu0 %v1280_v60 }
  0x71   :  { %957 = vmatprep.subr.bf16.mxu1 %v1283_v61 }
  0x73   :  { %917 = vmatpush2.bf16.msra.mxu0 %v1278_v62 }
  0x74   :  { %958 = vmatpush2.bf16.msra.mxu1 %v1281_v63  ;;  %918 = vmatprep.subr.bf16.mxu0 %v1286_v0 }
  0x75   :  { %959 = vmatprep.subr.bf16.mxu1 %v1289_v1 }
  0x77   :  { %919 = vmatpush2.bf16.msra.mxu0 %v1284_v2 }
  0x78   :  { %960 = vmatpush2.bf16.msra.mxu1 %v1287_v3  ;;  %920 = vmatprep.subr.bf16.mxu0 %v1292_v4 }
  0x79   :  { %961 = vmatprep.subr.bf16.mxu1 %v1295_v5 }
  0x7b   :  { %921 = vmatpush2.bf16.msra.mxu0 %v1290_v6 }
  0x7c   :  { %962 = vmatpush2.bf16.msra.mxu1 %v1293_v7  ;;  %922 = vmatprep.subr.bf16.mxu0 %v1298_v8 }
  0x7d   :  { %963 = vmatprep.subr.bf16.mxu1 %v1301_v9 }
  0x7f   :  { %923 = vmatpush2.bf16.msra.mxu0 %v1296_v10 }
  0x80   :  { %964 = vmatpush2.bf16.msra.mxu1 %v1299_v11 }
  0x82   :  { %925 = vmatmul.mubr.bf16.vlgmr.msra.gmra.mxu0 %v26_v14 }
  0x83   :  { %966 = vmatmul.mubr.bf16.vlgmr.msra.gmra.mxu1 %v28_v15 }
 0x102   :  { %v844_v16 = vpop.f32.mrf.mxu0 }
 0x103   :  { %v885_v17 = vpop.f32.mrf.mxu1  ;;  %v845_v31 = vadd.f32 %v844_v16, %v163_v29 }
 0x104   :  { %v846_v18 = vpop.f32.mrf.mxu0 }
 0x105   :  { %v887_v19 = vpop.f32.mrf.mxu1  ;;  %v847_v32 = vadd.f32 %v846_v18, %v167_v30  ;;  %v886_v33 = vadd.f32 %v885_v17, %v845_v31 }
 0x106   :  { %v848_v20 = vpop.f32.mrf.mxu0 }
 0x107   :  { %v889_v21 = vpop.f32.mrf.mxu1  ;;  %v888_v36 = vadd.f32 %v887_v19, %v847_v32 }
 0x108   :  { %v849_v22 = vpop.f32.mrf.mxu0 }
 0x109   :  { %v890_v23 = vpop.f32.mrf.mxu1 }
 0x142   :  { %v926_v34 = vpop.f32.mrf.mxu0 }
 0x143   :  { %v967_v35 = vpop.f32.mrf.mxu1  ;;  %v927_v37 = vadd.f32 %v926_v34, %v886_v33 }
 0x144   :  { %v928_v38 = vpop.f32.mrf.mxu0 }
 0x145   :  { %v969_v39 = vpop.f32.mrf.mxu1  ;;  %v968_v40 = vadd.f32 %v967_v35, %v927_v37  ;;  %v929_v41 = vadd.f32 %v928_v38, %v888_v36 }
 0x146   :  { %v930_v42 = vpop.f32.mrf.mxu0 }
 0x147   :  { %v971_v43 = vpop.f32.mrf.mxu1  ;;  %1302 = vtanh.f32 %v968_v40  ;;  %v970_v44 = vadd.f32 %v969_v39, %v929_v41 }
 0x148   :  { %v931_v45 = vpop.f32.mrf.mxu0 }
 0x149   :  { %v972_v46 = vpop.f32.mrf.mxu1  ;;  %1304 = vtanh.f32 %v970_v44 }
 0x154   :  { %v1303_v47 = vpop.eup %1302 }
 0x155   :  { %976 = vst [vmem:[%s1746_s3] sm:$0xff] %v1303_v47 }
 0x156   :  { %v1305_v48 = vpop.eup %1304 }
 0x157   :  { %977 = vst [vmem:[%s1746_s3 + $0x8] sm:$0xff] %v1305_v48 }

// kernel: generator_forward.2
= control target key start
LH: loop header
LB: loop body
LE: loop exit
PB: predicated region body
PF: predicated region fallthrough
CT: control target
= control target key end

     0   :  { %v3422_v0 = vmov 0.0   ;;  %vm3423_vm0 = vmmov 0   ;;  %vm57_vm1 = vcmask 523264   ;;  %s5064_s1 = inlined_call_operand.vmem [shape: f32[64,128], index: 1, kind: input, shape index: {}]   ;;  %s5065_s3 = inlined_call_operand.vmem [shape: f32[128,256], index: 3, kind: input, shape index: {}]   ;;  %s5066_s0 = inlined_call_operand.vmem [shape: f32[8,64], index: 0, kind: input, shape index: {}]   ;;  %s5067_s2 = inlined_call_operand.vmem [shape: f32[1,128], index: 2, kind: input, shape index: {}]   ;;  %s5068_s6 = inlined_call_operand.vmem [shape: f32[256,512], index: 6, kind: input, shape index: {}]   ;;  %s5069_s4 = inlined_call_operand.vmem [shape: f32[1,256], index: 4, kind: input, shape index: {}]   ;;  %s5070_s5 = inlined_call_operand.vmem [shape: f32[1,256], index: 5, kind: input, shape index: {}]   ;;  %s5071_s9 = inlined_call_operand.vmem [shape: bf16[512,1024], index: 9, kind: input, shape index: {}]   ;;  %s5072_s7 = inlined_call_operand.vmem [shape: f32[1,512], index: 7, kind: input, shape index: {}]   ;;  %s5073_s8 = inlined_call_operand.vmem [shape: f32[1,512], index: 8, kind: input, shape index: {}]   ;;  %s5074_s10 = inlined_call_operand.vmem [shape: f32[1,1024], index: 10, kind: input, shape index: {}]   ;;  %s5075_s11 = inlined_call_operand.vmem [shape: f32[1,1024], index: 11, kind: input, shape index: {}]   ;;  %s5076_s12 = inlined_call_operand.vmem [shape: f32[8,1024], index: 12, kind: output, shape index: {}]  }
   0x1   :  { %3372 = vmatprep.subr.mxu0 %v3422_v0  ;;  %v49_v1 = vld [vmem:[%s5064_s1 + $0x38] sm:$0xff]  ;;  %v48_v2 = vld [vmem:[%s5064_s1 + $0x30] sm:$0xff]  ;;  %3388 = vmatprep.mubr.msk.f32.mxu0 %vm3423_vm0, %v3422_v0  ;;  %v47_v3 = vld [vmem:[%s5064_s1 + $0x28] sm:$0xff] }
   0x2   :  { %3373 = vmatpush3.msra.mxu0 %v49_v1  ;;  %230 = vmatprep.mubr.f32.mxu1 %v3422_v0  ;;  %v165_v4 = vld [vmem:[%s5065_s3 + $0xf8] sm:$0xff]  ;;  %v164_v5 = vld [vmem:[%s5065_s3 + $0xf0] sm:$0xff]  ;;  %v163_v6 = vld [vmem:[%s5065_s3 + $0xe8] sm:$0xff] }
   0x3   :  { %3374 = vmatprep.subr.mxu0 %v3422_v0  ;;  %v46_v7 = vld [vmem:[%s5064_s1 + $0x20] sm:$0xff]  ;;  %166 = vmatprep.subr.mxu1 %v165_v4  ;;  %v161_v9 = vld [vmem:[%s5065_s3 + $0xd8] sm:$0xff]  ;;  %v160_v11 = vld [vmem:[%s5065_s3 + $0xd0] sm:$0xff] }
   0x4   :  { %3375 = vmatpush3.msra.mxu0 %v48_v2  ;;  %v162_v8 = vld [vmem:[%s5065_s3 + $0xe0] sm:$0xff]  ;;  %167 = vmatpush1.msra.mxu1 %v164_v5  ;;  %v45_v10 = vld [vmem:[%s5064_s1 + $0x18] sm:$0xff]  ;;  %v159_v12 = vld [vmem:[%s5065_s3 + $0xc8] sm:$0xff] }
   0x5   :  { %3376 = vmatprep.subr.mxu0 %v3422_v0  ;;  %168 = vmatprep.subr.mxu1 %v163_v6  ;;  %v44_v13 = vld [vmem:[%s5064_s1 + $0x10] sm:$0xff]  ;;  %v158_v14 = vld [vmem:[%s5065_s3 + $0xc0] sm:$0xff]  ;;  %v157_v15 = vld [vmem:[%s5065_s3 + $0xb8] sm:$0xff] }
   0x6   :  { %3377 = vmatpush3.msra.mxu0 %v47_v3  ;;  %169 = vmatpush1.msra.mxu1 %v162_v8  ;;  %v43_v16 = vld [vmem:[%s5064_s1 + $0x8] sm:$0xff]  ;;  %v156_v17 = vld [vmem:[%s5065_s3 + $0xb0] sm:$0xff]  ;;  %v42_v19 = vld [vmem:[%s5064_s1] sm:$0xff] }
   0x7   :  { %3378 = vmatprep.subr.mxu0 %v3422_v0  ;;  %170 = vmatprep.subr.mxu1 %v161_v9  ;;  %v155_v18 = vld [vmem:[%s5065_s3 + $0xa8] sm:$0xff]  ;;  %v154_v20 = vld [vmem:[%s5065_s3 + $0xa0] sm:$0xff]  ;;  %v153_v22 = vld [vmem:[%s5065_s3 + $0x98] sm:$0xff] }
   0x8   :  { %3379 = vmatpush3.msra.mxu0 %v46_v7  ;;  %171 = vmatpush1.msra.mxu1 %v160_v11  ;;  %v41_v21 = vld [vmem:[%s5066_s0] sm:$0xff]  ;;  %v152_v23 = vld [vmem:[%s5065_s3 + $0x90] sm:$0xff]  ;;  %v151_v24 = vld [vmem:[%s5065_s3 + $0x88] sm:$0xff] }
   0x9   :  { %3380 = vmatprep.subr.mxu0 %v3422_v0  ;;  %172 = vmatprep.subr.mxu1 %v159_v12  ;;  %v150_v25 = vld [vmem:[%s5065_s3 + $0x80] sm:$0xff]  ;;  %v149_v26 = vld [vmem:[%s5065_s3 + $0x78] sm:$0xff]  ;;  %v148_v27 = vld [vmem:[%s5065_s3 + $0x70] sm:$0xff] }
   0xa   :  { %3381 = vmatpush3.msra.mxu0 %v45_v10  ;;  %173 = vmatpush1.msra.mxu1 %v158_v14  ;;  %v147_v28 = vld [vmem:[%s5065_s3 + $0x68] sm:$0xff]  ;;  %v146_v29 = vld [vmem:[%s5065_s3 + $0x60] sm:$0xff]  ;;  %v145_v30 = vld [vmem:[%s5065_s3 + $0x58] sm:$0xff] }
   0xb   :  { %3382 = vmatprep.subr.mxu0 %v3422_v0  ;;  %174 = vmatprep.subr.mxu1 %v157_v15  ;;  %v144_v31 = vld [vmem:[%s5065_s3 + $0x50] sm:$0xff]  ;;  %v143_v32 = vld [vmem:[%s5065_s3 + $0x48] sm:$0xff]  ;;  %v142_v33 = vld [vmem:[%s5065_s3 + $0x40] sm:$0xff] }
   0xc   :  { %3383 = vmatpush3.msra.mxu0 %v44_v13  ;;  %175 = vmatpush1.msra.mxu1 %v156_v17  ;;  %v141_v34 = vld [vmem:[%s5065_s3 + $0x38] sm:$0xff]  ;;  %v140_v35 = vld [vmem:[%s5065_s3 + $0x30] sm:$0xff]  ;;  %v139_v36 = vld [vmem:[%s5065_s3 + $0x28] sm:$0xff] }
   0xd   :  { %3384 = vmatprep.subr.mxu0 %v3422_v0  ;;  %176 = vmatprep.subr.mxu1 %v155_v18  ;;  %v138_v37 = vld [vmem:[%s5065_s3 + $0x20] sm:$0xff]  ;;  %v137_v38 = vld [vmem:[%s5065_s3 + $0x18] sm:$0xff]  ;;  %v136_v39 = vld [vmem:[%s5065_s3 + $0x10] sm:$0xff] }
   0xe   :  { %3385 = vmatpush3.msra.mxu0 %v43_v16  ;;  %177 = vmatpush1.msra.mxu1 %v154_v20  ;;  %v135_v40 = vld [vmem:[%s5065_s3 + $0x8] sm:$0xff]  ;;  %v134_v41 = vld [vmem:[%s5065_s3] sm:$0xff]  ;;  %v412_v49 = vld [vmem:[%s5068_s6 + $0x1f8] sm:$0xff] }
   0xf   :  { %3386 = vmatprep.subr.mxu0 %v3422_v0  ;;  %178 = vmatprep.subr.mxu1 %v153_v22  ;;  %v3105_v42 = vld [vmem:[%s5067_s2] ss:$0 sm:$0xff]  ;;  %v410_v48 = vld [vmem:[%s5068_s6 + $0x1e8] sm:$0xff]  ;;  %v411_v51 = vld [vmem:[%s5068_s6 + $0x1f0] sm:$0xff] }
  0x10   :  { %3387 = vmatpush3.msra.mxu0 %v42_v19  ;;  %179 = vmatpush1.msra.mxu1 %v152_v23  ;;  %v409_v50 = vld [vmem:[%s5068_s6 + $0x1e0] sm:$0xff]  ;;  %v406_v52 = vld [vmem:[%s5068_s6 + $0x1c8] sm:$0xff]  ;;  %v408_v53 = vld [vmem:[%s5068_s6 + $0x1d8] sm:$0xff] }
  0x11   :  { %3389 = vmatmul.mubr.msk.f32.vlgmr.msra.gmra.mxu0 %vm57_vm1, %v41_v21  ;;  %180 = vmatprep.subr.mxu1 %v151_v24  ;;  %v405_v54 = vld [vmem:[%s5068_s6 + $0x1c0] sm:$0xff]  ;;  %v407_v55 = vld [vmem:[%s5068_s6 + $0x1d0] sm:$0xff]  ;;  %v402_v56 = vld [vmem:[%s5068_s6 + $0x1a8] sm:$0xff] }
  0x12   :  { %181 = vmatpush1.msra.mxu1 %v150_v25  ;;  %477 = vmatprep.subr.mxu0 %v410_v48  ;;  %v404_v57 = vld [vmem:[%s5068_s6 + $0x1b8] sm:$0xff]  ;;  %v401_v58 = vld [vmem:[%s5068_s6 + $0x1a0] sm:$0xff]  ;;  %v403_v59 = vld [vmem:[%s5068_s6 + $0x1b0] sm:$0xff] }
  0x13   :  { %182 = vmatprep.subr.mxu1 %v149_v26  ;;  %478 = vmatpush1.msra.mxu0 %v409_v50  ;;  %v398_v60 = vld [vmem:[%s5068_s6 + $0x188] sm:$0xff]  ;;  %v400_v61 = vld [vmem:[%s5068_s6 + $0x198] sm:$0xff]  ;;  %v397_v62 = vld [vmem:[%s5068_s6 + $0x180] sm:$0xff] }
  0x14   :  { %183 = vmatpush1.msra.mxu1 %v148_v27  ;;  %479 = vmatprep.subr.mxu0 %v406_v52  ;;  %v399_v63 = vld [vmem:[%s5068_s6 + $0x190] sm:$0xff]  ;;  %v394_v0 = vld [vmem:[%s5068_s6 + $0x168] sm:$0xff]  ;;  %v396_v1 = vld [vmem:[%s5068_s6 + $0x178] sm:$0xff] }
  0x15   :  { %184 = vmatprep.subr.mxu1 %v147_v28  ;;  %480 = vmatpush1.msra.mxu0 %v405_v54  ;;  %v393_v2 = vld [vmem:[%s5068_s6 + $0x160] sm:$0xff]  ;;  %v395_v3 = vld [vmem:[%s5068_s6 + $0x170] sm:$0xff]  ;;  %v390_v4 = vld [vmem:[%s5068_s6 + $0x148] sm:$0xff] }
  0x16   :  { %185 = vmatpush1.msra.mxu1 %v146_v29  ;;  %481 = vmatprep.subr.mxu0 %v402_v56  ;;  %v392_v5 = vld [vmem:[%s5068_s6 + $0x158] sm:$0xff]  ;;  %v389_v6 = vld [vmem:[%s5068_s6 + $0x140] sm:$0xff]  ;;  %v391_v7 = vld [vmem:[%s5068_s6 + $0x150] sm:$0xff] }
  0x17   :  { %186 = vmatprep.subr.mxu1 %v145_v30  ;;  %482 = vmatpush1.msra.mxu0 %v401_v58  ;;  %v386_v8 = vld [vmem:[%s5068_s6 + $0x128] sm:$0xff]  ;;  %v388_v9 = vld [vmem:[%s5068_s6 + $0x138] sm:$0xff]  ;;  %v385_v10 = vld [vmem:[%s5068_s6 + $0x120] sm:$0xff] }
  0x18   :  { %187 = vmatpush1.msra.mxu1 %v144_v31  ;;  %483 = vmatprep.subr.mxu0 %v398_v60  ;;  %v387_v11 = vld [vmem:[%s5068_s6 + $0x130] sm:$0xff]  ;;  %v382_v12 = vld [vmem:[%s5068_s6 + $0x108] sm:$0xff]  ;;  %v384_v13 = vld [vmem:[%s5068_s6 + $0x118] sm:$0xff] }
  0x19   :  { %188 = vmatprep.subr.mxu1 %v143_v32  ;;  %484 = vmatpush1.msra.mxu0 %v397_v62  ;;  %v381_v14 = vld [vmem:[%s5068_s6 + $0x100] sm:$0xff]  ;;  %v383_v15 = vld [vmem:[%s5068_s6 + $0x110] sm:$0xff]  ;;  %v378_v16 = vld [vmem:[%s5068_s6 + $0xe8] sm:$0xff] }
  0x1a   :  { %189 = vmatpush1.msra.mxu1 %v142_v33  ;;  %485 = vmatprep.subr.mxu0 %v394_v0  ;;  %v380_v17 = vld [vmem:[%s5068_s6 + $0xf8] sm:$0xff]  ;;  %v377_v18 = vld [vmem:[%s5068_s6 + $0xe0] sm:$0xff]  ;;  %v379_v19 = vld [vmem:[%s5068_s6 + $0xf0] sm:$0xff] }
  0x1b   :  { %190 = vmatprep.subr.mxu1 %v141_v34  ;;  %486 = vmatpush1.msra.mxu0 %v393_v2  ;;  %v374_v20 = vld [vmem:[%s5068_s6 + $0xc8] sm:$0xff]  ;;  %v376_v21 = vld [vmem:[%s5068_s6 + $0xd8] sm:$0xff]  ;;  %v373_v22 = vld [vmem:[%s5068_s6 + $0xc0] sm:$0xff] }
  0x1c   :  { %191 = vmatpush1.msra.mxu1 %v140_v35  ;;  %487 = vmatprep.subr.mxu0 %v390_v4  ;;  %v375_v23 = vld [vmem:[%s5068_s6 + $0xd0] sm:$0xff]  ;;  %v370_v24 = vld [vmem:[%s5068_s6 + $0xa8] sm:$0xff]  ;;  %v372_v25 = vld [vmem:[%s5068_s6 + $0xb8] sm:$0xff] }
  0x1d   :  { %192 = vmatprep.subr.mxu1 %v139_v36  ;;  %488 = vmatpush1.msra.mxu0 %v389_v6  ;;  %v369_v26 = vld [vmem:[%s5068_s6 + $0xa0] sm:$0xff]  ;;  %v371_v27 = vld [vmem:[%s5068_s6 + $0xb0] sm:$0xff]  ;;  %v366_v28 = vld [vmem:[%s5068_s6 + $0x88] sm:$0xff] }
  0x1e   :  { %193 = vmatpush1.msra.mxu1 %v138_v37  ;;  %489 = vmatprep.subr.mxu0 %v386_v8  ;;  %v368_v29 = vld [vmem:[%s5068_s6 + $0x98] sm:$0xff]  ;;  %v365_v30 = vld [vmem:[%s5068_s6 + $0x80] sm:$0xff]  ;;  %v367_v31 = vld [vmem:[%s5068_s6 + $0x90] sm:$0xff] }
  0x1f   :  { %194 = vmatprep.subr.mxu1 %v137_v38  ;;  %490 = vmatpush1.msra.mxu0 %v385_v10  ;;  %v362_v32 = vld [vmem:[%s5068_s6 + $0x68] sm:$0xff]  ;;  %v364_v33 = vld [vmem:[%s5068_s6 + $0x78] sm:$0xff]  ;;  %v361_v34 = vld [vmem:[%s5068_s6 + $0x60] sm:$0xff] }
  0x20   :  { %195 = vmatpush1.msra.mxu1 %v136_v39  ;;  %491 = vmatprep.subr.mxu0 %v382_v12  ;;  %v363_v35 = vld [vmem:[%s5068_s6 + $0x70] sm:$0xff]  ;;  %v358_v36 = vld [vmem:[%s5068_s6 + $0x48] sm:$0xff]  ;;  %v360_v37 = vld [vmem:[%s5068_s6 + $0x58] sm:$0xff] }
  0x21   :  { %196 = vmatprep.subr.mxu1 %v135_v40  ;;  %492 = vmatpush1.msra.mxu0 %v381_v14  ;;  %v357_v38 = vld [vmem:[%s5068_s6 + $0x40] sm:$0xff]  ;;  %v359_v39 = vld [vmem:[%s5068_s6 + $0x50] sm:$0xff]  ;;  %v354_v40 = vld [vmem:[%s5068_s6 + $0x28] sm:$0xff] }
  0x22   :  { %197 = vmatpush1.msra.mxu1 %v134_v41  ;;  %493 = vmatprep.subr.mxu0 %v378_v16  ;;  %v356_v41 = vld [vmem:[%s5068_s6 + $0x38] sm:$0xff]  ;;  %v474_v48 = vld [vmem:[%s5068_s6 + $0x3e8] sm:$0xff]  ;;  %v473_v50 = vld [vmem:[%s5068_s6 + $0x3e0] sm:$0xff] }
  0x23   :  { %548 = vmatprep.subr.mxu1 %v412_v49  ;;  %494 = vmatpush1.msra.mxu0 %v377_v18  ;;  %v476_v49 = vld [vmem:[%s5068_s6 + $0x3f8] sm:$0xff]  ;;  %v470_v52 = vld [vmem:[%s5068_s6 + $0x3c8] sm:$0xff]  ;;  %v469_v54 = vld [vmem:[%s5068_s6 + $0x3c0] sm:$0xff] }
  0x24   :  { %495 = vmatprep.subr.mxu0 %v374_v20  ;;  %v466_v56 = vld [vmem:[%s5068_s6 + $0x3a8] sm:$0xff]  ;;  %v465_v58 = vld [vmem:[%s5068_s6 + $0x3a0] sm:$0xff] }
  0x25   :  { %496 = vmatpush1.msra.mxu0 %v373_v22  ;;  %v462_v60 = vld [vmem:[%s5068_s6 + $0x388] sm:$0xff]  ;;  %v461_v62 = vld [vmem:[%s5068_s6 + $0x380] sm:$0xff] }
  0x26   :  { %497 = vmatprep.subr.mxu0 %v370_v24  ;;  %v458_v0 = vld [vmem:[%s5068_s6 + $0x368] sm:$0xff]  ;;  %v457_v2 = vld [vmem:[%s5068_s6 + $0x360] sm:$0xff] }
  0x27   :  { %498 = vmatpush1.msra.mxu0 %v369_v26  ;;  %v454_v4 = vld [vmem:[%s5068_s6 + $0x348] sm:$0xff]  ;;  %v453_v6 = vld [vmem:[%s5068_s6 + $0x340] sm:$0xff] }
  0x28   :  { %499 = vmatprep.subr.mxu0 %v366_v28  ;;  %v450_v8 = vld [vmem:[%s5068_s6 + $0x328] sm:$0xff]  ;;  %v449_v10 = vld [vmem:[%s5068_s6 + $0x320] sm:$0xff] }
  0x29   :  { %500 = vmatpush1.msra.mxu0 %v365_v30  ;;  %v446_v12 = vld [vmem:[%s5068_s6 + $0x308] sm:$0xff]  ;;  %v445_v14 = vld [vmem:[%s5068_s6 + $0x300] sm:$0xff] }
  0x2a   :  { %501 = vmatprep.subr.mxu0 %v362_v32  ;;  %v442_v16 = vld [vmem:[%s5068_s6 + $0x2e8] sm:$0xff]  ;;  %v441_v18 = vld [vmem:[%s5068_s6 + $0x2e0] sm:$0xff] }
  0x2b   :  { %502 = vmatpush1.msra.mxu0 %v361_v34  ;;  %v438_v20 = vld [vmem:[%s5068_s6 + $0x2c8] sm:$0xff]  ;;  %v437_v22 = vld [vmem:[%s5068_s6 + $0x2c0] sm:$0xff] }
  0x2c   :  { %503 = vmatprep.subr.mxu0 %v358_v36  ;;  %v434_v24 = vld [vmem:[%s5068_s6 + $0x2a8] sm:$0xff]  ;;  %v433_v26 = vld [vmem:[%s5068_s6 + $0x2a0] sm:$0xff] }
  0x2d   :  { %504 = vmatpush1.msra.mxu0 %v357_v38  ;;  %v430_v28 = vld [vmem:[%s5068_s6 + $0x288] sm:$0xff]  ;;  %v429_v30 = vld [vmem:[%s5068_s6 + $0x280] sm:$0xff] }
  0x2e   :  { %505 = vmatprep.subr.mxu0 %v354_v40  ;;  %v426_v32 = vld [vmem:[%s5068_s6 + $0x268] sm:$0xff]  ;;  %v425_v34 = vld [vmem:[%s5068_s6 + $0x260] sm:$0xff] }
  0x2f   :  { %v422_v36 = vld [vmem:[%s5068_s6 + $0x248] sm:$0xff]  ;;  %v421_v38 = vld [vmem:[%s5068_s6 + $0x240] sm:$0xff] }
  0x30   :  { %v418_v40 = vld [vmem:[%s5068_s6 + $0x228] sm:$0xff] }
  0xd1   :  { %v127_v43 = vpop.f32.mrf.mxu0 }
  0xd2   :  { %v128_v44 = vadd.f32 %v3105_v42, %v127_v43  ;;  %v353_v42 = vld [vmem:[%s5068_s6 + $0x20] sm:$0xff]  ;;  %v355_v43 = vld [vmem:[%s5068_s6 + $0x30] sm:$0xff] }
  0xd3   :  { %v3390_v45 = vpop.f32.mrf.mxu0  ;;  %506 = vmatpush1.msra.mxu0 %v353_v42  ;;  %v417_v42 = vld [vmem:[%s5068_s6 + $0x220] sm:$0xff] }
  0xd4   :  { %v132_v46 = vmul.f32 0.2, %v128_v44  ;;  %vm131_vm2 = vcmp.ge.f32.partialorder %v128_v44, 0.0  ;;  %v352_v45 = vld [vmem:[%s5068_s6 + $0x18] sm:$0xff] }
  0xd6   :  { %v133_v47 = vsel %vm131_vm2, %v128_v44, %v132_v46  ;;  %v350_v44 = vld [vmem:[%s5068_s6 + $0x8] sm:$0xff]  ;;  %v349_v46 = vld [vmem:[%s5068_s6] sm:$0xff] }
  0xd7   :  { %231 = vmatmul.mubr.f32.vlgmr.msra.gmra.mxu1 %v133_v47  ;;  %507 = vmatprep.subr.mxu0 %v350_v44  ;;  %v351_v47 = vld [vmem:[%s5068_s6 + $0x10] sm:$0xff]  ;;  %v414_v44 = vld [vmem:[%s5068_s6 + $0x208] sm:$0xff] }
  0xd8   :  { %549 = vmatpush1.msra.mxu1 %v411_v51  ;;  %508 = vmatpush1.msra.mxu0 %v349_v46  ;;  %v475_v51 = vld [vmem:[%s5068_s6 + $0x3f0] sm:$0xff]  ;;  %v413_v46 = vld [vmem:[%s5068_s6 + $0x200] sm:$0xff] }
  0xd9   :  { %550 = vmatprep.subr.mxu1 %v408_v53  ;;  %509 = vmatprep.subr.mxu0 %v474_v48  ;;  %v472_v53 = vld [vmem:[%s5068_s6 + $0x3d8] sm:$0xff] }
  0xda   :  { %551 = vmatpush1.msra.mxu1 %v407_v55  ;;  %510 = vmatpush2.msra.mxu0 %v473_v50  ;;  %v471_v55 = vld [vmem:[%s5068_s6 + $0x3d0] sm:$0xff] }
  0xdb   :  { %552 = vmatprep.subr.mxu1 %v404_v57  ;;  %511 = vmatprep.subr.mxu0 %v470_v52  ;;  %v468_v57 = vld [vmem:[%s5068_s6 + $0x3b8] sm:$0xff] }
  0xdc   :  { %553 = vmatpush1.msra.mxu1 %v403_v59  ;;  %512 = vmatpush2.msra.mxu0 %v469_v54  ;;  %v467_v59 = vld [vmem:[%s5068_s6 + $0x3b0] sm:$0xff] }
  0xdd   :  { %554 = vmatprep.subr.mxu1 %v400_v61  ;;  %513 = vmatprep.subr.mxu0 %v466_v56  ;;  %v464_v61 = vld [vmem:[%s5068_s6 + $0x398] sm:$0xff] }
  0xde   :  { %555 = vmatpush1.msra.mxu1 %v399_v63  ;;  %514 = vmatpush2.msra.mxu0 %v465_v58  ;;  %v463_v63 = vld [vmem:[%s5068_s6 + $0x390] sm:$0xff] }
  0xdf   :  { %556 = vmatprep.subr.mxu1 %v396_v1  ;;  %515 = vmatprep.subr.mxu0 %v462_v60  ;;  %v460_v1 = vld [vmem:[%s5068_s6 + $0x378] sm:$0xff] }
  0xe0   :  { %557 = vmatpush1.msra.mxu1 %v395_v3  ;;  %516 = vmatpush2.msra.mxu0 %v461_v62  ;;  %v459_v3 = vld [vmem:[%s5068_s6 + $0x370] sm:$0xff] }
  0xe1   :  { %558 = vmatprep.subr.mxu1 %v392_v5  ;;  %517 = vmatprep.subr.mxu0 %v458_v0  ;;  %v456_v5 = vld [vmem:[%s5068_s6 + $0x358] sm:$0xff] }
  0xe2   :  { %559 = vmatpush1.msra.mxu1 %v391_v7  ;;  %518 = vmatpush2.msra.mxu0 %v457_v2  ;;  %v455_v7 = vld [vmem:[%s5068_s6 + $0x350] sm:$0xff] }
  0xe3   :  { %560 = vmatprep.subr.mxu1 %v388_v9  ;;  %519 = vmatprep.subr.mxu0 %v454_v4  ;;  %v452_v9 = vld [vmem:[%s5068_s6 + $0x338] sm:$0xff] }
  0xe4   :  { %561 = vmatpush1.msra.mxu1 %v387_v11  ;;  %520 = vmatpush2.msra.mxu0 %v453_v6  ;;  %v451_v11 = vld [vmem:[%s5068_s6 + $0x330] sm:$0xff] }
  0xe5   :  { %562 = vmatprep.subr.mxu1 %v384_v13  ;;  %521 = vmatprep.subr.mxu0 %v450_v8  ;;  %v448_v13 = vld [vmem:[%s5068_s6 + $0x318] sm:$0xff] }
  0xe6   :  { %563 = vmatpush1.msra.mxu1 %v383_v15  ;;  %522 = vmatpush2.msra.mxu0 %v449_v10  ;;  %v447_v15 = vld [vmem:[%s5068_s6 + $0x310] sm:$0xff] }
  0xe7   :  { %564 = vmatprep.subr.mxu1 %v380_v17  ;;  %523 = vmatprep.subr.mxu0 %v446_v12  ;;  %v444_v17 = vld [vmem:[%s5068_s6 + $0x2f8] sm:$0xff] }
  0xe8   :  { %565 = vmatpush1.msra.mxu1 %v379_v19  ;;  %524 = vmatpush2.msra.mxu0 %v445_v14  ;;  %v443_v19 = vld [vmem:[%s5068_s6 + $0x2f0] sm:$0xff] }
  0xe9   :  { %566 = vmatprep.subr.mxu1 %v376_v21  ;;  %525 = vmatprep.subr.mxu0 %v442_v16  ;;  %v440_v21 = vld [vmem:[%s5068_s6 + $0x2d8] sm:$0xff] }
  0xea   :  { %567 = vmatpush1.msra.mxu1 %v375_v23  ;;  %526 = vmatpush2.msra.mxu0 %v441_v18  ;;  %v439_v23 = vld [vmem:[%s5068_s6 + $0x2d0] sm:$0xff] }
  0xeb   :  { %568 = vmatprep.subr.mxu1 %v372_v25  ;;  %527 = vmatprep.subr.mxu0 %v438_v20  ;;  %v436_v25 = vld [vmem:[%s5068_s6 + $0x2b8] sm:$0xff] }
  0xec   :  { %569 = vmatpush1.msra.mxu1 %v371_v27  ;;  %528 = vmatpush2.msra.mxu0 %v437_v22  ;;  %v435_v27 = vld [vmem:[%s5068_s6 + $0x2b0] sm:$0xff]  ;;  %v3424_v22 = vmov 1966171168  }
  0xed   :  { %570 = vmatprep.subr.mxu1 %v368_v29  ;;  %529 = vmatprep.subr.mxu0 %v434_v24  ;;  %v432_v29 = vld [vmem:[%s5068_s6 + $0x298] sm:$0xff]  ;;  %v283_v24 = vlaneseq }
  0xee   :  { %571 = vmatpush1.msra.mxu1 %v367_v31  ;;  %530 = vmatpush2.msra.mxu0 %v433_v26  ;;  %v431_v31 = vld [vmem:[%s5068_s6 + $0x290] sm:$0xff] }
  0xef   :  { %572 = vmatprep.subr.mxu1 %v364_v33  ;;  %v428_v33 = vld [vmem:[%s5068_s6 + $0x278] sm:$0xff]  ;;  %531 = vmatprep.subr.mxu0 %v430_v28  ;;  %v4012_v26 = vshrl.u32 %v283_v24, 7  ;;  %v851_v24 = vld [vmem:[%s5071_s9 + $0xc0] sm:$0xff] }
  0xf0   :  { %573 = vmatpush1.msra.mxu1 %v363_v35  ;;  %v427_v35 = vld [vmem:[%s5068_s6 + $0x270] sm:$0xff]  ;;  %532 = vmatpush2.msra.mxu0 %v429_v30 }
  0xf1   :  { %574 = vmatprep.subr.mxu1 %v360_v37  ;;  %v424_v37 = vld [vmem:[%s5068_s6 + $0x258] sm:$0xff]  ;;  %533 = vmatprep.subr.mxu0 %v426_v32  ;;  %v237_v32 = vld [vmem:[%s5069_s4] sm:$0x3] }
  0xf2   :  { %575 = vmatpush1.msra.mxu1 %v359_v39  ;;  %v423_v39 = vld [vmem:[%s5068_s6 + $0x250] sm:$0xff]  ;;  %534 = vmatpush2.msra.mxu0 %v425_v34  ;;  %v4023_v34 = vsub.s32 0, %v4012_v26 }
  0xf3   :  { %576 = vmatprep.subr.mxu1 %v356_v41  ;;  %v420_v41 = vld [vmem:[%s5068_s6 + $0x238] sm:$0xff]  ;;  %535 = vmatprep.subr.mxu0 %v422_v36 }
  0xf4   :  { %577 = vmatpush1.msra.mxu1 %v355_v43  ;;  %v419_v43 = vld [vmem:[%s5068_s6 + $0x230] sm:$0xff]  ;;  %536 = vmatpush2.msra.mxu0 %v421_v38 }
  0xf5   :  { %578 = vmatprep.subr.mxu1 %v352_v45  ;;  %v416_v45 = vld [vmem:[%s5068_s6 + $0x218] sm:$0xff]  ;;  %537 = vmatprep.subr.mxu0 %v418_v40 }
  0xf6   :  { %579 = vmatpush1.msra.mxu1 %v351_v47  ;;  %538 = vmatpush2.msra.mxu0 %v417_v42  ;;  %v415_v47 = vld [vmem:[%s5068_s6 + $0x210] sm:$0xff] }
  0xf7   :  { %580 = vmatprep.subr.mxu1 %v476_v49  ;;  %539 = vmatprep.subr.mxu0 %v414_v44 }
  0xf8   :  { %581 = vmatpush2.msra.mxu1 %v475_v51  ;;  %540 = vmatpush2.msra.mxu0 %v413_v46 }
  0xf9   :  { %582 = vmatprep.subr.mxu1 %v472_v53 }
  0xfa   :  { %583 = vmatpush2.msra.mxu1 %v471_v55 }
  0xfb   :  { %584 = vmatprep.subr.mxu1 %v468_v57 }
  0xfc   :  { %585 = vmatpush2.msra.mxu1 %v467_v59 }
  0xfd   :  { %586 = vmatprep.subr.mxu1 %v464_v61 }
  0xfe   :  { %587 = vmatpush2.msra.mxu1 %v463_v63 }
  0xff   :  { %588 = vmatprep.subr.mxu1 %v460_v1 }
 0x100   :  { %589 = vmatpush2.msra.mxu1 %v459_v3 }
 0x101   :  { %590 = vmatprep.subr.mxu1 %v456_v5 }
 0x102   :  { %591 = vmatpush2.msra.mxu1 %v455_v7 }
 0x103   :  { %592 = vmatprep.subr.mxu1 %v452_v9 }
 0x104   :  { %593 = vmatpush2.msra.mxu1 %v451_v11 }
 0x105   :  { %594 = vmatprep.subr.mxu1 %v448_v13 }
 0x106   :  { %595 = vmatpush2.msra.mxu1 %v447_v15 }
 0x107   :  { %596 = vmatprep.subr.mxu1 %v444_v17 }
 0x108   :  { %597 = vmatpush2.msra.mxu1 %v443_v19 }
 0x109   :  { %598 = vmatprep.subr.mxu1 %v440_v21 }
 0x10a   :  { %599 = vmatpush2.msra.mxu1 %v439_v23  ;;  %v281_v23 = vunpack.c.l.s4 %v3424_v22 }
 0x10b   :  { %600 = vmatprep.subr.mxu1 %v436_v25 }
 0x10c   :  { %601 = vmatpush2.msra.mxu1 %v435_v27  ;;  %v282_v25 = vunpack.c.0.s8 %v281_v23 }
 0x10d   :  { %602 = vmatprep.subr.mxu1 %v432_v29 }
 0x10e   :  { %603 = vmatpush2.msra.mxu1 %v431_v31  ;;  %v4015_v28 = vsub.s32 %v282_v25, %v4012_v26  ;;  %v855_v25 = vld [vmem:[%s5071_s9 + $0xe0] sm:$0xff] }
 0x10f   :  { %604 = vmatprep.subr.mxu1 %v428_v33 }
 0x110   :  { %605 = vmatpush2.msra.mxu1 %v427_v35  ;;  %v4026_v35 = vsub.s32 1, %v4012_v26 }
 0x111   :  { %606 = vmatprep.subr.mxu1 %v424_v37 }
 0x112   :  { %607 = vmatpush2.msra.mxu1 %v423_v39 }
 0x113   :  { %608 = vmatprep.subr.mxu1 %v420_v41 }
 0x114   :  { %609 = vmatpush2.msra.mxu1 %v419_v43  ;;  %v238_v43 = vld [vmem:[%s5070_s5] sm:$0x3] }
 0x115   :  { %610 = vmatprep.subr.mxu1 %v416_v45 }
 0x116   :  { %611 = vmatpush2.msra.mxu1 %v415_v47 }
 0x197   :  { %v4000_v48 = vpop.f32.mrf.mxu1 }
 0x198   :  { %v239_v49 = vrot.slane %v4000_v48, 4  ;;  %v251_v50 = vmul.f32 %v4000_v48, %v4000_v48 }
 0x199   :  { %v4005_v51 = vpop.f32.mrf.mxu1 }
 0x19a   :  { %v240_v52 = vadd.f32 %v239_v49, %v4000_v48  ;;  %v253_v53 = vrot.slane %v251_v50, 4  ;;  %v245_v54 = vrot.slane %v4005_v51, 4  ;;  %v252_v55 = vmul.f32 %v4005_v51, %v4005_v51 }
 0x19c   :  { %v241_v56 = vrot.slane %v240_v52, 2  ;;  %v254_v57 = vadd.f32 %v253_v53, %v251_v50  ;;  %v246_v58 = vadd.f32 %v245_v54, %v4005_v51  ;;  %v259_v59 = vrot.slane %v252_v55, 4 }
 0x19e   :  { %v242_v60 = vadd.f32 %v241_v56, %v240_v52  ;;  %v255_v61 = vrot.slane %v254_v57, 2  ;;  %v247_v62 = vrot.slane %v246_v58, 2  ;;  %v260_v63 = vadd.f32 %v259_v59, %v252_v55 }
 0x1a0   :  { %v243_v0 = vrot.slane %v242_v60, 1  ;;  %v256_v1 = vadd.f32 %v255_v61, %v254_v57  ;;  %v248_v2 = vadd.f32 %v247_v62, %v246_v58  ;;  %v261_v3 = vrot.slane %v260_v63, 2  ;;  %v1011_v58 = vld [vmem:[%s5071_s9 + $0x5c0] sm:$0xff] }
 0x1a2   :  { %v244_v4 = vadd.f32 %v243_v0, %v242_v60  ;;  %v257_v5 = vrot.slane %v256_v1, 1  ;;  %v249_v6 = vrot.slane %v248_v2, 1  ;;  %v262_v7 = vadd.f32 %v261_v3, %v260_v63  ;;  %v1015_v60 = vld [vmem:[%s5071_s9 + $0x5e0] sm:$0xff] }
 0x1a3   :  { %v3291_v62 = vcombine.low %v1011_v58, %v1015_v60  ;;  %v3292_v63 = vcombine.high %v1011_v58, %v1015_v60  ;;  %v875_v0 = vld [vmem:[%s5071_s9 + $0x180] sm:$0xff] }
 0x1a4   :  { %v258_v8 = vadd.f32 %v257_v5, %v256_v1  ;;  %v265_v9 = vmul.f32 0.125, %v244_v4  ;;  %v250_v10 = vadd.f32 %v249_v6, %v248_v2  ;;  %v263_v11 = vrot.slane %v262_v7, 1  ;;  %v879_v1 = vld [vmem:[%s5071_s9 + $0x1a0] sm:$0xff] }
 0x1a5   :  { %2404 = vmatprep.subr.bf16.mxu1 %v3292_v63  ;;  %v1003_v2 = vld [vmem:[%s5071_s9 + $0x580] sm:$0xff]  ;;  %v3156_v3 = vcombine.high %v875_v0, %v879_v1  ;;  %v3155_v5 = vcombine.low %v875_v0, %v879_v1 }
 0x1a6   :  { %v267_v12 = vmul.f32 0.125, %v258_v8  ;;  %v269_v13 = vmul.f32 %v265_v9, %v265_v9  ;;  %v264_v14 = vadd.f32 %v263_v11, %v262_v7  ;;  %v266_v15 = vmul.f32 0.125, %v250_v10  ;;  %v1007_v4 = vld [vmem:[%s5071_s9 + $0x5a0] sm:$0xff] }
 0x1a7   :  { %v3283_v6 = vcombine.low %v1003_v2, %v1007_v4  ;;  %v3284_v7 = vcombine.high %v1003_v2, %v1007_v4  ;;  %v867_v8 = vld [vmem:[%s5071_s9 + $0x140] sm:$0xff] }
 0x1a8   :  { %v271_v16 = vsub.f32 %v267_v12, %v269_v13  ;;  %v268_v17 = vmul.f32 0.125, %v264_v14  ;;  %v270_v18 = vmul.f32 %v266_v15, %v266_v15  ;;  %v995_v10 = vld [vmem:[%s5071_s9 + $0x540] sm:$0xff] }
 0x1a9   :  { %v999_v12 = vld [vmem:[%s5071_s9 + $0x560] sm:$0xff] }
 0x1aa   :  { %v273_v19 = vadd.f32 0.8, %v271_v16  ;;  %v272_v20 = vsub.f32 %v268_v17, %v270_v18  ;;  %v3275_v14 = vcombine.low %v995_v10, %v999_v12  ;;  %v859_v16 = vld [vmem:[%s5071_s9 + $0x100] sm:$0xff] }
 0x1ab   :  { %v863_v17 = vld [vmem:[%s5071_s9 + $0x120] sm:$0xff] }
 0x1ac   :  { %v274_v21 = vadd.f32 0.8, %v272_v20  ;;  %3394 = vrsqrt.f32 %v273_v19  ;;  %v987_v18 = vld [vmem:[%s5071_s9 + $0x500] sm:$0xff]  ;;  %v3140_v19 = vcombine.high %v859_v16, %v863_v17 }
 0x1ad   :  { %v991_v20 = vld [vmem:[%s5071_s9 + $0x520] sm:$0xff] }
 0x1ae   :  { %3396 = vrsqrt.f32 %v274_v21  ;;  %v3139_v21 = vcombine.low %v859_v16, %v863_v17  ;;  %v3267_v22 = vcombine.low %v987_v18, %v991_v20  ;;  %v3268_v23 = vcombine.high %v987_v18, %v991_v20  ;;  %v947_v60 = vld [vmem:[%s5071_s9 + $0x3c0] sm:$0xff] }
 0x1af   :  { %v1079_v0 = vld [vmem:[%s5071_s9 + $0x7e0] sm:$0xff] }
 0x1b0   :  { %v939_v4 = vld [vmem:[%s5071_s9 + $0x380] sm:$0xff] }
 0x1b1   :  { %v1063_v16 = vld [vmem:[%s5071_s9 + $0x760] sm:$0xff] }
 0x1b2   :  { %v923_v20 = vld [vmem:[%s5071_s9 + $0x300] sm:$0xff] }
 0x1b9   :  { %v3395_v27 = vpop.eup %3394 }
 0x1bb   :  { %v3397_v29 = vpop.eup %3396 }
 0x1bc   :  { %v279_v30 = vcombine.low %v3395_v27, %v3397_v29  ;;  %v979_v27 = vld [vmem:[%s5071_s9 + $0x4c0] sm:$0xff]  ;;  %v3132_v29 = vcombine.high %v851_v24, %v855_v25 }
 0x1be   :  { %v286_v31 = vrot.slane %v279_v30, %v4015_v28  ;;  %v983_v30 = vld [vmem:[%s5071_s9 + $0x4e0] sm:$0xff] }
 0x1c0   :  { %v293_v33 = vrot.slane %v286_v31, %v4015_v28  ;;  %v3131_v31 = vcombine.low %v851_v24, %v855_v25  ;;  %v1055_v24 = vld [vmem:[%s5071_s9 + $0x720] sm:$0xff] }
 0x1c2   :  { %v295_v36 = vmul.f32 %v293_v33, %v237_v32  ;;  %v3259_v32 = vcombine.low %v979_v27, %v983_v30  ;;  %v3260_v33 = vcombine.high %v979_v27, %v983_v30  ;;  %v915_v30 = vld [vmem:[%s5071_s9 + $0x2c0] sm:$0xff] }
 0x1c4   :  { %v300_v37 = vrot.slane %v295_v36, %v4023_v34  ;;  %v304_v38 = vrot.slane %v295_v36, %v4026_v35  ;;  %v843_v36 = vld [vmem:[%s5071_s9 + $0x80] sm:$0xff] }
 0x1c6   :  { %v307_v39 = vmul.f32 %v300_v37, %v265_v9  ;;  %v308_v40 = vmul.f32 %v304_v38, %v266_v15  ;;  %v329_v46 = vmul.f32 %v304_v38, %v4005_v51  ;;  %v328_v49 = vmul.f32 %v300_v37, %v4000_v48  ;;  %v883_v51 = vld [vmem:[%s5071_s9 + $0x1c0] sm:$0xff] }
 0x1c7   :  { %v887_v48 = vld [vmem:[%s5071_s9 + $0x1e0] sm:$0xff]  ;;  %v3276_v15 = vcombine.high %v995_v10, %v999_v12 }
 0x1c8   :  { %v311_v41 = vcombine.low %v307_v39, %v308_v40  ;;  %v3164_v59 = vcombine.high %v883_v51, %v887_v48  ;;  %v3163_v61 = vcombine.low %v883_v51, %v887_v48  ;;  %v871_v9 = vld [vmem:[%s5071_s9 + $0x160] sm:$0xff] }
 0x1c9   :  { %v3148_v11 = vcombine.high %v867_v8, %v871_v9  ;;  %v3147_v13 = vcombine.low %v867_v8, %v871_v9  ;;  %v847_v37 = vld [vmem:[%s5071_s9 + $0xa0] sm:$0xff] }
 0x1ca   :  { %v318_v42 = vrot.slane %v311_v41, %v4015_v28  ;;  %2363 = vmatprep.subr.bf16.mxu0 %v3164_v59  ;;  %v971_v38 = vld [vmem:[%s5071_s9 + $0x480] sm:$0xff]  ;;  %v3124_v39 = vcombine.high %v843_v36, %v847_v37  ;;  %v3123_v41 = vcombine.low %v843_v36, %v847_v37 }
 0x1cb   :  { %v975_v40 = vld [vmem:[%s5071_s9 + $0x4a0] sm:$0xff] }
 0x1cc   :  { %v325_v44 = vrot.slane %v318_v42, %v4015_v28  ;;  %v3251_v42 = vcombine.low %v971_v38, %v975_v40  ;;  %v959_v51 = vld [vmem:[%s5071_s9 + $0x420] sm:$0xff] }
 0x1cd   :  { %v1071_v8 = vld [vmem:[%s5071_s9 + $0x7a0] sm:$0xff] }
 0x1ce   :  { %v327_v45 = vsub.f32 %v238_v43, %v325_v44  ;;  %v3252_v43 = vcombine.high %v971_v38, %v975_v40  ;;  %v835_v44 = vld [vmem:[%s5071_s9 + $0x40] sm:$0xff] }
 0x1cf   :  { %v931_v12 = vld [vmem:[%s5071_s9 + $0x340] sm:$0xff] }
 0x1d0   :  { %v338_v47 = vrot.slane %v327_v45, %v4026_v35  ;;  %v334_v50 = vrot.slane %v327_v45, %v4023_v34  ;;  %v839_v45 = vld [vmem:[%s5071_s9 + $0x60] sm:$0xff] }
 0x1d1   :  { %v1047_v36 = vld [vmem:[%s5071_s9 + $0x6e0] sm:$0xff] }
 0x1d2   :  { %v342_v52 = vadd.f32 %v338_v47, %v329_v46  ;;  %v341_v53 = vadd.f32 %v334_v50, %v328_v49  ;;  %v963_v46 = vld [vmem:[%s5071_s9 + $0x440] sm:$0xff]  ;;  %v3116_v47 = vcombine.high %v835_v44, %v839_v45  ;;  %v3115_v50 = vcombine.low %v835_v44, %v839_v45 }
 0x1d3   :  { %v967_v49 = vld [vmem:[%s5071_s9 + $0x460] sm:$0xff] }
 0x1d4   :  { %vm344_vm3 = vcmp.ge.f32.partialorder %v342_v52, 0.0  ;;  %v346_v54 = vmul.f32 0.2, %v342_v52  ;;  %vm343_vm4 = vcmp.ge.f32.partialorder %v341_v53, 0.0  ;;  %v345_v55 = vmul.f32 0.2, %v341_v53 }
 0x1d5   :  { %v907_v40 = vld [vmem:[%s5071_s9 + $0x280] sm:$0xff] }
 0x1d6   :  { %v348_v56 = vsel %vm344_vm3, %v342_v52, %v346_v54  ;;  %v347_v57 = vsel %vm343_vm4, %v341_v53, %v345_v55  ;;  %v3243_v52 = vcombine.low %v963_v46, %v967_v49  ;;  %v3244_v53 = vcombine.high %v963_v46, %v967_v49  ;;  %v827_v54 = vld [vmem:[%s5071_s9] sm:$0xff] }
 0x1d7   :  { %541 = vmatprep.mubr.f32.mxu0 %v348_v56  ;;  %612 = vmatprep.mubr.f32.mxu1 %v348_v56  ;;  %v831_v55 = vld [vmem:[%s5071_s9 + $0x20] sm:$0xff] }
 0x1d8   :  { %542 = vmatmul.mubr.f32.vlgmr.msra.gmra.mxu0 %v347_v57  ;;  %613 = vmatmul.mubr.f32.vlgmr.msra.gmra.mxu1 %v347_v57  ;;  %v955_v56 = vld [vmem:[%s5071_s9 + $0x400] sm:$0xff]  ;;  %v3108_v57 = vcombine.high %v827_v54, %v831_v55  ;;  %v3107_v48 = vcombine.low %v827_v54, %v831_v55 }
 0x1d9   :  { %2364 = vmatpush1.bf16.msra.mxu0 %v3163_v61  ;;  %2405 = vmatpush1.bf16.msra.mxu1 %v3291_v62  ;;  %v3235_v58 = vcombine.low %v955_v56, %v959_v51  ;;  %v3236_v59 = vcombine.high %v955_v56, %v959_v51  ;;  %v951_v61 = vld [vmem:[%s5071_s9 + $0x3e0] sm:$0xff] }
 0x1da   :  { %2365 = vmatprep.subr.bf16.mxu0 %v3156_v3  ;;  %2406 = vmatprep.subr.bf16.mxu1 %v3284_v7  ;;  %v1075_v62 = vld [vmem:[%s5071_s9 + $0x7c0] sm:$0xff]  ;;  %v3228_v63 = vcombine.high %v947_v60, %v951_v61  ;;  %v3227_v1 = vcombine.low %v947_v60, %v951_v61 }
 0x1db   :  { %v3355_v2 = vcombine.low %v1075_v62, %v1079_v0  ;;  %v3356_v3 = vcombine.high %v1075_v62, %v1079_v0  ;;  %v1039_v44 = vld [vmem:[%s5071_s9 + $0x6a0] sm:$0xff]  ;;  %v4234_v0 = vld [vmem:[%s5071_s9 + $0x1c8] sm:$0xff] }
 0x1dc   :  { %v899_v49 = vld [vmem:[%s5071_s9 + $0x240] sm:$0xff] }
 0x1dd   :  { %2366 = vmatpush1.bf16.msra.mxu0 %v3155_v5  ;;  %2407 = vmatpush1.bf16.msra.mxu1 %v3283_v6  ;;  %v943_v5 = vld [vmem:[%s5071_s9 + $0x3a0] sm:$0xff] }
 0x1de   :  { %2367 = vmatprep.subr.bf16.mxu0 %v3148_v11  ;;  %2408 = vmatprep.subr.bf16.mxu1 %v3276_v15  ;;  %v1067_v6 = vld [vmem:[%s5071_s9 + $0x780] sm:$0xff]  ;;  %v3220_v7 = vcombine.high %v939_v4, %v943_v5  ;;  %v3219_v9 = vcombine.low %v939_v4, %v943_v5  ;;  %v4251_v4 = vld [vmem:[%s5071_s9 + $0x5e8] sm:$0xff] }
 0x1df   :  { %v3347_v10 = vcombine.low %v1067_v6, %v1071_v8  ;;  %v3348_v11 = vcombine.high %v1067_v6, %v1071_v8  ;;  %v1031_v54 = vld [vmem:[%s5071_s9 + $0x660] sm:$0xff] }
 0x1e0   :  { %v891_v51 = vld [vmem:[%s5071_s9 + $0x200] sm:$0xff] }
 0x1e1   :  { %2368 = vmatpush1.bf16.msra.mxu0 %v3147_v13  ;;  %2409 = vmatpush1.bf16.msra.mxu1 %v3275_v14  ;;  %v935_v13 = vld [vmem:[%s5071_s9 + $0x360] sm:$0xff] }
 0x1e2   :  { %2369 = vmatprep.subr.bf16.mxu0 %v3140_v19  ;;  %2410 = vmatprep.subr.bf16.mxu1 %v3268_v23  ;;  %v1059_v14 = vld [vmem:[%s5071_s9 + $0x740] sm:$0xff]  ;;  %v3212_v15 = vcombine.high %v931_v12, %v935_v13  ;;  %v3211_v17 = vcombine.low %v931_v12, %v935_v13 }
 0x1e3   :  { %v3339_v18 = vcombine.low %v1059_v14, %v1063_v16  ;;  %v3340_v19 = vcombine.high %v1059_v14, %v1063_v16  ;;  %v1023_v61 = vld [vmem:[%s5071_s9 + $0x620] sm:$0xff] }
 0x1e5   :  { %2370 = vmatpush1.bf16.msra.mxu0 %v3139_v21  ;;  %2411 = vmatpush1.bf16.msra.mxu1 %v3267_v22  ;;  %v927_v21 = vld [vmem:[%s5071_s9 + $0x320] sm:$0xff] }
 0x1e6   :  { %2371 = vmatprep.subr.bf16.mxu0 %v3132_v29  ;;  %2412 = vmatprep.subr.bf16.mxu1 %v3260_v33  ;;  %v1051_v22 = vld [vmem:[%s5071_s9 + $0x700] sm:$0xff]  ;;  %v3204_v23 = vcombine.high %v923_v20, %v927_v21  ;;  %v3203_v25 = vcombine.low %v923_v20, %v927_v21 }
 0x1e7   :  { %v3331_v27 = vcombine.low %v1051_v22, %v1055_v24  ;;  %v3332_v29 = vcombine.high %v1051_v22, %v1055_v24 }
 0x1e9   :  { %2372 = vmatpush1.bf16.msra.mxu0 %v3131_v31  ;;  %2413 = vmatpush1.bf16.msra.mxu1 %v3259_v32  ;;  %v919_v31 = vld [vmem:[%s5071_s9 + $0x2e0] sm:$0xff] }
 0x1ea   :  { %2373 = vmatprep.subr.bf16.mxu0 %v3124_v39  ;;  %2414 = vmatprep.subr.bf16.mxu1 %v3252_v43  ;;  %v1043_v32 = vld [vmem:[%s5071_s9 + $0x6c0] sm:$0xff]  ;;  %v3196_v33 = vcombine.high %v915_v30, %v919_v31  ;;  %v3195_v37 = vcombine.low %v915_v30, %v919_v31 }
 0x1eb   :  { %v3323_v38 = vcombine.low %v1043_v32, %v1047_v36  ;;  %v3324_v39 = vcombine.high %v1043_v32, %v1047_v36 }
 0x1ed   :  { %2374 = vmatpush1.bf16.msra.mxu0 %v3123_v41  ;;  %2415 = vmatpush1.bf16.msra.mxu1 %v3251_v42  ;;  %v911_v41 = vld [vmem:[%s5071_s9 + $0x2a0] sm:$0xff] }
 0x1ee   :  { %2375 = vmatprep.subr.bf16.mxu0 %v3116_v47  ;;  %2416 = vmatprep.subr.bf16.mxu1 %v3244_v53  ;;  %v1035_v42 = vld [vmem:[%s5071_s9 + $0x680] sm:$0xff]  ;;  %v3188_v43 = vcombine.high %v907_v40, %v911_v41  ;;  %v3187_v45 = vcombine.low %v907_v40, %v911_v41 }
 0x1ef   :  { %v3315_v46 = vcombine.low %v1035_v42, %v1039_v44  ;;  %v3316_v47 = vcombine.high %v1035_v42, %v1039_v44 }
 0x1f1   :  { %2376 = vmatpush1.bf16.msra.mxu0 %v3115_v50  ;;  %2417 = vmatpush1.bf16.msra.mxu1 %v3243_v52  ;;  %v903_v50 = vld [vmem:[%s5071_s9 + $0x260] sm:$0xff] }
 0x1f2   :  { %2377 = vmatprep.subr.bf16.mxu0 %v3108_v57  ;;  %2418 = vmatprep.subr.bf16.mxu1 %v3236_v59  ;;  %v1027_v52 = vld [vmem:[%s5071_s9 + $0x640] sm:$0xff]  ;;  %v3180_v53 = vcombine.high %v899_v49, %v903_v50  ;;  %v3179_v55 = vcombine.low %v899_v49, %v903_v50 }
 0x1f3   :  { %v3307_v56 = vcombine.low %v1027_v52, %v1031_v54  ;;  %v3308_v57 = vcombine.high %v1027_v52, %v1031_v54 }
 0x1f5   :  { %2378 = vmatpush1.bf16.msra.mxu0 %v3107_v48  ;;  %2419 = vmatpush1.bf16.msra.mxu1 %v3235_v58  ;;  %v895_v48 = vld [vmem:[%s5071_s9 + $0x220] sm:$0xff] }
 0x1f6   :  { %2379 = vmatprep.subr.bf16.mxu0 %v3228_v63  ;;  %2420 = vmatprep.subr.bf16.mxu1 %v3356_v3  ;;  %v1019_v58 = vld [vmem:[%s5071_s9 + $0x600] sm:$0xff]  ;;  %v3171_v59 = vcombine.low %v891_v51, %v895_v48  ;;  %v3172_v60 = vcombine.high %v891_v51, %v895_v48 }
 0x1f7   :  { %v3299_v62 = vcombine.low %v1019_v58, %v1023_v61  ;;  %v3300_v63 = vcombine.high %v1019_v58, %v1023_v61 }
 0x1f9   :  { %2380 = vmatpush2.bf16.msra.mxu0 %v3227_v1  ;;  %2421 = vmatpush2.bf16.msra.mxu1 %v3355_v2  ;;  %v4239_v1 = vld [vmem:[%s5071_s9 + $0x1e8] sm:$0xff] }
 0x1fa   :  { %2381 = vmatprep.subr.bf16.mxu0 %v3220_v7  ;;  %2422 = vmatprep.subr.bf16.mxu1 %v3348_v11  ;;  %v4244_v2 = vld [vmem:[%s5071_s9 + $0x5c8] sm:$0xff]  ;;  %v3166_v3 = vcombine.high %v4234_v0, %v4239_v1  ;;  %v3165_v5 = vcombine.low %v4234_v0, %v4239_v1 }
 0x1fb   :  { %v3293_v6 = vcombine.low %v4244_v2, %v4251_v4  ;;  %v3294_v7 = vcombine.high %v4244_v2, %v4251_v4  ;;  %v864_v0 = vld [vmem:[%s5071_s9 + $0x128] sm:$0xff] }
 0x1fc   :  { %v988_v1 = vld [vmem:[%s5071_s9 + $0x508] sm:$0xff] }
 0x1fd   :  { %2382 = vmatpush2.bf16.msra.mxu0 %v3219_v9  ;;  %2423 = vmatpush2.bf16.msra.mxu1 %v3347_v10  ;;  %v992_v2 = vld [vmem:[%s5071_s9 + $0x528] sm:$0xff] }
 0x1fe   :  { %2383 = vmatprep.subr.bf16.mxu0 %v3212_v15  ;;  %2424 = vmatprep.subr.bf16.mxu1 %v3340_v19 }
 0x201   :  { %2384 = vmatpush2.bf16.msra.mxu0 %v3211_v17  ;;  %2425 = vmatpush2.bf16.msra.mxu1 %v3339_v18 }
 0x202   :  { %2385 = vmatprep.subr.bf16.mxu0 %v3204_v23  ;;  %2426 = vmatprep.subr.bf16.mxu1 %v3332_v29 }
 0x205   :  { %2386 = vmatpush2.bf16.msra.mxu0 %v3203_v25  ;;  %2427 = vmatpush2.bf16.msra.mxu1 %v3331_v27 }
 0x206   :  { %2387 = vmatprep.subr.bf16.mxu0 %v3196_v33  ;;  %2428 = vmatprep.subr.bf16.mxu1 %v3324_v39 }
 0x209   :  { %2388 = vmatpush2.bf16.msra.mxu0 %v3195_v37  ;;  %2429 = vmatpush2.bf16.msra.mxu1 %v3323_v38 }
 0x20a   :  { %2389 = vmatprep.subr.bf16.mxu0 %v3188_v43  ;;  %2430 = vmatprep.subr.bf16.mxu1 %v3316_v47 }
 0x20d   :  { %2390 = vmatpush2.bf16.msra.mxu0 %v3187_v45  ;;  %2431 = vmatpush2.bf16.msra.mxu1 %v3315_v46 }
 0x20e   :  { %2391 = vmatprep.subr.bf16.mxu0 %v3180_v53  ;;  %2432 = vmatprep.subr.bf16.mxu1 %v3308_v57 }
 0x211   :  { %2392 = vmatpush2.bf16.msra.mxu0 %v3179_v55  ;;  %2433 = vmatpush2.bf16.msra.mxu1 %v3307_v56 }
 0x212   :  { %2393 = vmatprep.subr.bf16.mxu0 %v3172_v60  ;;  %2434 = vmatprep.subr.bf16.mxu1 %v3300_v63 }
 0x215   :  { %2394 = vmatpush2.bf16.msra.mxu0 %v3171_v59  ;;  %2435 = vmatpush2.bf16.msra.mxu1 %v3299_v62 }
 0x216   :  { %2445 = vmatprep.subr.bf16.mxu0 %v3166_v3  ;;  %2486 = vmatprep.subr.bf16.mxu1 %v3294_v7 }
 0x298   :  { %v4259_v8 = vpop.f32.mrf.mxu0  ;;  %v4261_v9 = vpop.f32.mrf.mxu1 }
 0x299   :  { %v621_v10 = vrot.slane %v4259_v8, 4  ;;  %v645_v11 = vmul.f32 %v4259_v8, %v4259_v8  ;;  %v633_v12 = vrot.slane %v4261_v9, 4  ;;  %v647_v13 = vmul.f32 %v4261_v9, %v4261_v9 }
 0x29a   :  { %v4269_v14 = vpop.f32.mrf.mxu0  ;;  %v4271_v15 = vpop.f32.mrf.mxu1 }
 0x29b   :  { %v622_v16 = vadd.f32 %v621_v10, %v4259_v8  ;;  %v649_v17 = vrot.slane %v645_v11, 4  ;;  %v634_v18 = vadd.f32 %v633_v12, %v4261_v9  ;;  %v661_v19 = vrot.slane %v647_v13, 4 }
 0x29c   :  { %v627_v20 = vrot.slane %v4269_v14, 4  ;;  %v646_v21 = vmul.f32 %v4269_v14, %v4269_v14  ;;  %v639_v22 = vrot.slane %v4271_v15, 4  ;;  %v648_v23 = vmul.f32 %v4271_v15, %v4271_v15 }
 0x29d   :  { %v623_v24 = vrot.slane %v622_v16, 2  ;;  %v650_v25 = vadd.f32 %v649_v17, %v645_v11  ;;  %v635_v27 = vrot.slane %v634_v18, 2  ;;  %v662_v29 = vadd.f32 %v661_v19, %v647_v13 }
 0x29e   :  { %v628_v30 = vadd.f32 %v627_v20, %v4269_v14  ;;  %v655_v31 = vrot.slane %v646_v21, 4  ;;  %v640_v32 = vadd.f32 %v639_v22, %v4271_v15  ;;  %v667_v33 = vrot.slane %v648_v23, 4 }
 0x29f   :  { %v624_v36 = vadd.f32 %v623_v24, %v622_v16  ;;  %v651_v37 = vrot.slane %v650_v25, 2  ;;  %v636_v38 = vadd.f32 %v635_v27, %v634_v18  ;;  %v663_v39 = vrot.slane %v662_v29, 2 }
 0x2a0   :  { %v629_v40 = vrot.slane %v628_v30, 2  ;;  %v656_v41 = vadd.f32 %v655_v31, %v646_v21  ;;  %v641_v42 = vrot.slane %v640_v32, 2  ;;  %v668_v43 = vadd.f32 %v667_v33, %v648_v23 }
 0x2a1   :  { %v625_v44 = vrot.slane %v624_v36, 1  ;;  %v652_v45 = vadd.f32 %v651_v37, %v650_v25  ;;  %v637_v46 = vrot.slane %v636_v38, 1  ;;  %v664_v47 = vadd.f32 %v663_v39, %v662_v29 }
 0x2a2   :  { %v630_v49 = vadd.f32 %v629_v40, %v628_v30  ;;  %v657_v50 = vrot.slane %v656_v41, 2  ;;  %v642_v52 = vadd.f32 %v641_v42, %v640_v32  ;;  %v669_v53 = vrot.slane %v668_v43, 2 }
 0x2a3   :  { %v626_v54 = vadd.f32 %v625_v44, %v624_v36  ;;  %v653_v55 = vrot.slane %v652_v45, 1  ;;  %v638_v56 = vadd.f32 %v637_v46, %v636_v38  ;;  %v665_v57 = vrot.slane %v664_v47, 1 }
 0x2a4   :  { %v631_v51 = vrot.slane %v630_v49, 1  ;;  %v658_v48 = vadd.f32 %v657_v50, %v656_v41  ;;  %v643_v58 = vrot.slane %v642_v52, 1  ;;  %v670_v59 = vadd.f32 %v669_v53, %v668_v43 }
 0x2a5   :  { %v654_v60 = vadd.f32 %v653_v55, %v652_v45  ;;  %v673_v61 = vmul.f32 0.125, %v626_v54  ;;  %v666_v62 = vadd.f32 %v665_v57, %v664_v47  ;;  %v675_v63 = vmul.f32 0.125, %v638_v56  ;;  %v619_v47 = vld [vmem:[%s5072_s7] sm:$0xf] }
 0x2a6   :  { %v632_v3 = vadd.f32 %v631_v51, %v630_v49  ;;  %v659_v7 = vrot.slane %v658_v48, 1  ;;  %v644_v10 = vadd.f32 %v643_v58, %v642_v52  ;;  %v671_v11 = vrot.slane %v670_v59, 1 }
 0x2a7   :  { %v677_v12 = vmul.f32 0.125, %v654_v60  ;;  %v681_v13 = vmul.f32 %v673_v61, %v673_v61  ;;  %v679_v16 = vmul.f32 0.125, %v666_v62  ;;  %v683_v17 = vmul.f32 %v675_v63, %v675_v63 }
 0x2a8   :  { %v660_v18 = vadd.f32 %v659_v7, %v658_v48  ;;  %v674_v19 = vmul.f32 0.125, %v632_v3  ;;  %v672_v20 = vadd.f32 %v671_v11, %v670_v59  ;;  %v676_v21 = vmul.f32 0.125, %v644_v10  ;;  %v620_v11 = vld [vmem:[%s5073_s8] sm:$0xf] }
 0x2a9   :  { %v685_v22 = vsub.f32 %v677_v12, %v681_v13  ;;  %v687_v23 = vsub.f32 %v679_v16, %v683_v17  ;;  %v4290_v50 = vsub.s32 2, %v4012_v26  ;;  %v4293_v52 = vsub.s32 3, %v4012_v26 }
 0x2aa   :  { %v678_v24 = vmul.f32 0.125, %v660_v18  ;;  %v682_v25 = vmul.f32 %v674_v19, %v674_v19  ;;  %v680_v27 = vmul.f32 0.125, %v672_v20  ;;  %v684_v29 = vmul.f32 %v676_v21, %v676_v21 }
 0x2ab   :  { %v689_v30 = vadd.f32 0.8, %v685_v22  ;;  %v691_v31 = vadd.f32 0.8, %v687_v23 }
 0x2ac   :  { %v686_v32 = vsub.f32 %v678_v24, %v682_v25  ;;  %v688_v33 = vsub.f32 %v680_v27, %v684_v29 }
 0x2ad   :  { %3398 = vrsqrt.f32 %v689_v30 }
 0x2ae   :  { %v690_v36 = vadd.f32 0.8, %v686_v32  ;;  %v692_v37 = vadd.f32 0.8, %v688_v33  ;;  %3400 = vrsqrt.f32 %v691_v31  ;;  %v880_v31 = vld [vmem:[%s5071_s9 + $0x1a8] sm:$0xff] }
 0x2af   :  { %v1004_v32 = vld [vmem:[%s5071_s9 + $0x588] sm:$0xff] }
 0x2b0   :  { %3402 = vrsqrt.f32 %v690_v36  ;;  %v1008_v33 = vld [vmem:[%s5071_s9 + $0x5a8] sm:$0xff] }
 0x2b1   :  { %3404 = vrsqrt.f32 %v692_v37 }
 0x2ba   :  { %v3399_v38 = vpop.eup %3398 }
 0x2bb   :  { %v3401_v39 = vpop.eup %3400 }
 0x2bd   :  { %v3403_v40 = vpop.eup %3402 }
 0x2be   :  { %v3405_v41 = vpop.eup %3404  ;;  %v701_v42 = vcombine.low %v3399_v38, %v3403_v40 }
 0x2bf   :  { %v702_v43 = vcombine.low %v3401_v39, %v3405_v41 }
 0x2c0   :  { %v709_v44 = vrot.slane %v701_v42, %v4015_v28  ;;  %v868_v42 = vld [vmem:[%s5071_s9 + $0x148] sm:$0xff] }
 0x2c1   :  { %v716_v45 = vrot.slane %v702_v43, %v4015_v28 }
 0x2c3   :  { %v717_v46 = vcombine.low %v709_v44, %v716_v45  ;;  %v3286_v44 = vcombine.high %v1004_v32, %v1008_v33  ;;  %v872_v45 = vld [vmem:[%s5071_s9 + $0x168] sm:$0xff] }
 0x2c4   :  { %v3149_v4 = vcombine.low %v868_v42, %v872_v45 }
 0x2c5   :  { %v724_v49 = vrot.slane %v717_v46, %v4015_v28  ;;  %v996_v46 = vld [vmem:[%s5071_s9 + $0x548] sm:$0xff] }
 0x2c7   :  { %v726_v53 = vmul.f32 %v724_v49, %v619_v47  ;;  %v1000_v47 = vld [vmem:[%s5071_s9 + $0x568] sm:$0xff] }
 0x2c9   :  { %v731_v54 = vrot.slane %v726_v53, %v4023_v34  ;;  %v735_v55 = vrot.slane %v726_v53, %v4026_v35  ;;  %v739_v56 = vrot.slane %v726_v53, %v4290_v50  ;;  %v743_v57 = vrot.slane %v726_v53, %v4293_v52 }
 0x2ca   :  { %v3285_v53 = vcombine.low %v1004_v32, %v1008_v33  ;;  %v948_v32 = vld [vmem:[%s5071_s9 + $0x3c8] sm:$0xff] }
 0x2cb   :  { %v748_v51 = vmul.f32 %v731_v54, %v673_v61  ;;  %v749_v48 = vmul.f32 %v735_v55, %v674_v19  ;;  %v750_v58 = vmul.f32 %v739_v56, %v675_v63  ;;  %v751_v59 = vmul.f32 %v743_v57, %v676_v21  ;;  %v952_v33 = vld [vmem:[%s5071_s9 + $0x3e8] sm:$0xff] }
 0x2cc   :  { %v785_v16 = vmul.f32 %v743_v57, %v4271_v15  ;;  %v783_v61 = vmul.f32 %v735_v55, %v4269_v14  ;;  %v782_v63 = vmul.f32 %v731_v54, %v4259_v8  ;;  %v784_v17 = vmul.f32 %v739_v56, %v4261_v9  ;;  %v876_v8 = vld [vmem:[%s5071_s9 + $0x188] sm:$0xff] }
 0x2cd   :  { %v756_v60 = vcombine.low %v748_v51, %v749_v48  ;;  %v757_v62 = vcombine.low %v750_v58, %v751_v59  ;;  %v3158_v43 = vcombine.high %v876_v8, %v880_v31  ;;  %v3157_v49 = vcombine.low %v876_v8, %v880_v31  ;;  %v860_v56 = vld [vmem:[%s5071_s9 + $0x108] sm:$0xff] }
 0x2ce   :  { %v3150_v54 = vcombine.high %v868_v42, %v872_v45  ;;  %v3278_v55 = vcombine.high %v996_v46, %v1000_v47  ;;  %v3270_v57 = vcombine.high %v988_v1, %v992_v2  ;;  %v852_v51 = vld [vmem:[%s5071_s9 + $0xc8] sm:$0xff] }
 0x2cf   :  { %v764_v3 = vrot.slane %v756_v60, %v4015_v28  ;;  %v771_v7 = vrot.slane %v757_v62, %v4015_v28  ;;  %v856_v48 = vld [vmem:[%s5071_s9 + $0xe8] sm:$0xff]  ;;  %v3141_v60 = vcombine.low %v860_v56, %v864_v0  ;;  %v3269_v62 = vcombine.low %v988_v1, %v992_v2 }
 0x2d0   :  { %v980_v58 = vld [vmem:[%s5071_s9 + $0x4c8] sm:$0xff] }
 0x2d1   :  { %v772_v10 = vcombine.low %v764_v3, %v771_v7  ;;  %v984_v59 = vld [vmem:[%s5071_s9 + $0x4e8] sm:$0xff]  ;;  %v3134_v3 = vcombine.high %v852_v51, %v856_v48 }
 0x2d2   :  { %v3262_v7 = vcombine.high %v980_v58, %v984_v59  ;;  %v956_v8 = vld [vmem:[%s5071_s9 + $0x408] sm:$0xff] }
 0x2d3   :  { %v779_v12 = vrot.slane %v772_v10, %v4015_v28  ;;  %v844_v10 = vld [vmem:[%s5071_s9 + $0x88] sm:$0xff] }
 0x2d4   :  { %v932_v1 = vld [vmem:[%s5071_s9 + $0x348] sm:$0xff] }
 0x2d5   :  { %v781_v13 = vsub.f32 %v620_v11, %v779_v12  ;;  %v848_v11 = vld [vmem:[%s5071_s9 + $0xa8] sm:$0xff] }
 0x2d6   :  { %v972_v12 = vld [vmem:[%s5071_s9 + $0x488] sm:$0xff] }
 0x2d7   :  { %v802_v18 = vrot.slane %v781_v13, %v4293_v52  ;;  %v794_v19 = vrot.slane %v781_v13, %v4026_v35  ;;  %v790_v20 = vrot.slane %v781_v13, %v4023_v34  ;;  %v798_v21 = vrot.slane %v781_v13, %v4290_v50  ;;  %v976_v13 = vld [vmem:[%s5071_s9 + $0x4a8] sm:$0xff] }
 0x2d8   :  { %v936_v2 = vld [vmem:[%s5071_s9 + $0x368] sm:$0xff] }
 0x2d9   :  { %v810_v22 = vadd.f32 %v802_v18, %v785_v16  ;;  %v808_v23 = vadd.f32 %v794_v19, %v783_v61  ;;  %v807_v24 = vadd.f32 %v790_v20, %v782_v63  ;;  %v809_v25 = vadd.f32 %v798_v21, %v784_v17  ;;  %v836_v18 = vld [vmem:[%s5071_s9 + $0x48] sm:$0xff] }
 0x2da   :  { %v3133_v16 = vcombine.low %v852_v51, %v856_v48  ;;  %v3261_v61 = vcombine.low %v980_v58, %v984_v59  ;;  %v3126_v63 = vcombine.high %v844_v10, %v848_v11  ;;  %v3254_v17 = vcombine.high %v972_v12, %v976_v13  ;;  %v840_v19 = vld [vmem:[%s5071_s9 + $0x68] sm:$0xff] }
 0x2db   :  { %vm812_vm5 = vcmp.ge.f32.partialorder %v808_v23, 0.0  ;;  %v816_v15 = vmul.f32 0.2, %v808_v23  ;;  %vm814_vm6 = vcmp.ge.f32.partialorder %v810_v22, 0.0  ;;  %v818_v14 = vmul.f32 0.2, %v810_v22 }
 0x2dc   :  { %vm811_vm7 = vcmp.ge.f32.partialorder %v807_v24, 0.0  ;;  %v815_v9 = vmul.f32 0.2, %v807_v24  ;;  %vm813_vm8 = vcmp.ge.f32.partialorder %v809_v25, 0.0  ;;  %v817_v27 = vmul.f32 0.2, %v809_v25 }
 0x2dd   :  { %v820_v29 = vsel %vm812_vm5, %v808_v23, %v816_v15  ;;  %v822_v30 = vsel %vm814_vm6, %v810_v22, %v818_v14  ;;  %v964_v20 = vld [vmem:[%s5071_s9 + $0x448] sm:$0xff]  ;;  %v3125_v22 = vcombine.low %v844_v10, %v848_v11  ;;  %v3253_v23 = vcombine.low %v972_v12, %v976_v13 }
 0x2de   :  { %v4325_v36 = vpack.c.bf16 %v820_v29, %v820_v29  ;;  %v4327_v37 = vpack.c.bf16 %v822_v30, %v822_v30  ;;  %v819_v38 = vsel %vm811_vm7, %v807_v24, %v815_v9  ;;  %v821_v39 = vsel %vm813_vm8, %v809_v25, %v817_v27  ;;  %v968_v21 = vld [vmem:[%s5071_s9 + $0x468] sm:$0xff] }
 0x2df   :  { %v4329_v40 = vpack.c.bf16 %v819_v38, %v819_v38  ;;  %v4331_v41 = vpack.c.bf16 %v821_v39, %v821_v39  ;;  %v3118_v24 = vcombine.high %v836_v18, %v840_v19  ;;  %v3246_v25 = vcombine.high %v964_v20, %v968_v21  ;;  %v828_v15 = vld [vmem:[%s5071_s9 + $0x8] sm:$0xff] }
 0x2e0   :  { %2395 = vmatprep.mubr.bf16.mxu0 %v4325_v36  ;;  %2436 = vmatprep.mubr.bf16.mxu1 %v4327_v37  ;;  %v832_v14 = vld [vmem:[%s5071_s9 + $0x28] sm:$0xff]  ;;  %v3117_v27 = vcombine.low %v836_v18, %v840_v19  ;;  %v3245_v29 = vcombine.low %v964_v20, %v968_v21  ;;  %v3214_v51 = vcombine.high %v932_v1, %v936_v2 }
 0x2e1   :  { %2396 = vmatmul.mubr.bf16.vlgmr.msra.gmra.mxu0 %v4329_v40  ;;  %2437 = vmatmul.mubr.bf16.vlgmr.msra.gmra.mxu1 %v4331_v41  ;;  %v960_v9 = vld [vmem:[%s5071_s9 + $0x428] sm:$0xff]  ;;  %v3110_v30 = vcombine.high %v828_v15, %v832_v14  ;;  %v3109_v42 = vcombine.low %v828_v15, %v832_v14 }
 0x2e2   :  { %2446 = vmatpush1.bf16.msra.mxu0 %v3165_v5  ;;  %2487 = vmatpush1.bf16.msra.mxu1 %v3293_v6  ;;  %v3277_v5 = vcombine.low %v996_v46, %v1000_v47  ;;  %v3142_v6 = vcombine.high %v860_v56, %v864_v0  ;;  %v3238_v31 = vcombine.high %v956_v8, %v960_v9  ;;  %v1076_v38 = vld [vmem:[%s5071_s9 + $0x7c8] sm:$0xff] }
 0x2e3   :  { %2477 = vmatprep.mubr.bf16.mxu0 %v4325_v36  ;;  %2518 = vmatprep.mubr.bf16.mxu1 %v4327_v37  ;;  %v1080_v39 = vld [vmem:[%s5071_s9 + $0x7e8] sm:$0xff] }
 0x2e4   :  { %2447 = vmatprep.subr.bf16.mxu0 %v3158_v43  ;;  %2488 = vmatprep.subr.bf16.mxu1 %v3286_v44  ;;  %v3237_v43 = vcombine.low %v956_v8, %v960_v9  ;;  %v3230_v44 = vcombine.high %v948_v32, %v952_v33  ;;  %v3358_v45 = vcombine.high %v1076_v38, %v1080_v39  ;;  %v940_v46 = vld [vmem:[%s5071_s9 + $0x388] sm:$0xff] }
 0x2e5   :  { %v944_v47 = vld [vmem:[%s5071_s9 + $0x3a8] sm:$0xff] }
 0x2e6   :  { %2448 = vmatpush1.bf16.msra.mxu0 %v3157_v49  ;;  %2489 = vmatpush1.bf16.msra.mxu1 %v3285_v53  ;;  %v1068_v49 = vld [vmem:[%s5071_s9 + $0x788] sm:$0xff]  ;;  %v3222_v56 = vcombine.high %v940_v46, %v944_v47 }
 0x2e7   :  { %2449 = vmatprep.subr.bf16.mxu0 %v3150_v54  ;;  %2490 = vmatprep.subr.bf16.mxu1 %v3278_v55  ;;  %v1072_v53 = vld [vmem:[%s5071_s9 + $0x7a8] sm:$0xff]  ;;  %v3229_v54 = vcombine.low %v948_v32, %v952_v33  ;;  %v3357_v55 = vcombine.low %v1076_v38, %v1080_v39 }
 0x2e8   :  { %v3350_v0 = vcombine.high %v1068_v49, %v1072_v53  ;;  %v924_v58 = vld [vmem:[%s5071_s9 + $0x308] sm:$0xff] }
 0x2e9   :  { %v928_v59 = vld [vmem:[%s5071_s9 + $0x328] sm:$0xff] }
 0x2ea   :  { %2450 = vmatpush1.bf16.msra.mxu0 %v3149_v4  ;;  %2491 = vmatpush1.bf16.msra.mxu1 %v3277_v5  ;;  %v1060_v4 = vld [vmem:[%s5071_s9 + $0x748] sm:$0xff]  ;;  %v3206_v10 = vcombine.high %v924_v58, %v928_v59 }
 0x2eb   :  { %2451 = vmatprep.subr.bf16.mxu0 %v3142_v6  ;;  %2492 = vmatprep.subr.bf16.mxu1 %v3270_v57  ;;  %v1064_v5 = vld [vmem:[%s5071_s9 + $0x768] sm:$0xff]  ;;  %v3221_v6 = vcombine.low %v940_v46, %v944_v47  ;;  %v3349_v57 = vcombine.low %v1068_v49, %v1072_v53  ;;  %v885_v49 = vld [vmem:[%s5071_s9 + $0x1d0] sm:$0xff] }
 0x2ec   :  { %v3342_v48 = vcombine.high %v1060_v4, %v1064_v5  ;;  %v916_v12 = vld [vmem:[%s5071_s9 + $0x2c8] sm:$0xff]  ;;  %v889_v53 = vld [vmem:[%s5071_s9 + $0x1f0] sm:$0xff] }
 0x2ed   :  { %v920_v13 = vld [vmem:[%s5071_s9 + $0x2e8] sm:$0xff] }
 0x2ee   :  { %2452 = vmatpush1.bf16.msra.mxu0 %v3141_v60  ;;  %2493 = vmatpush1.bf16.msra.mxu1 %v3269_v62  ;;  %v1052_v60 = vld [vmem:[%s5071_s9 + $0x708] sm:$0xff]  ;;  %v3198_v18 = vcombine.high %v916_v12, %v920_v13 }
 0x2ef   :  { %2453 = vmatprep.subr.bf16.mxu0 %v3134_v3  ;;  %2494 = vmatprep.subr.bf16.mxu1 %v3262_v7  ;;  %v1056_v62 = vld [vmem:[%s5071_s9 + $0x728] sm:$0xff]  ;;  %v3213_v3 = vcombine.low %v932_v1, %v936_v2  ;;  %v3341_v7 = vcombine.low %v1060_v4, %v1064_v5  ;;  %v3168_v1 = vcombine.high %v885_v49, %v889_v53  ;;  %v877_v4 = vld [vmem:[%s5071_s9 + $0x190] sm:$0xff] }
 0x2f0   :  { %v3334_v11 = vcombine.high %v1052_v60, %v1056_v62  ;;  %v908_v20 = vld [vmem:[%s5071_s9 + $0x288] sm:$0xff]  ;;  %v881_v5 = vld [vmem:[%s5071_s9 + $0x1b0] sm:$0xff] }
 0x2f1   :  { %v912_v21 = vld [vmem:[%s5071_s9 + $0x2a8] sm:$0xff] }
 0x2f2   :  { %2454 = vmatpush1.bf16.msra.mxu0 %v3133_v16  ;;  %2495 = vmatpush1.bf16.msra.mxu1 %v3261_v61  ;;  %v1044_v16 = vld [vmem:[%s5071_s9 + $0x6c8] sm:$0xff]  ;;  %v3190_v15 = vcombine.high %v908_v20, %v912_v21 }
 0x2f3   :  { %2455 = vmatprep.subr.bf16.mxu0 %v3126_v63  ;;  %2496 = vmatprep.subr.bf16.mxu1 %v3254_v17  ;;  %v1048_v61 = vld [vmem:[%s5071_s9 + $0x6e8] sm:$0xff]  ;;  %v3205_v63 = vcombine.low %v924_v58, %v928_v59  ;;  %v3333_v17 = vcombine.low %v1052_v60, %v1056_v62  ;;  %v3160_v58 = vcombine.high %v877_v4, %v881_v5  ;;  %v869_v60 = vld [vmem:[%s5071_s9 + $0x150] sm:$0xff] }
 0x2f4   :  { %v3326_v19 = vcombine.high %v1044_v16, %v1048_v61  ;;  %v900_v8 = vld [vmem:[%s5071_s9 + $0x248] sm:$0xff]  ;;  %v873_v62 = vld [vmem:[%s5071_s9 + $0x170] sm:$0xff] }
 0x2f5   :  { %v904_v9 = vld [vmem:[%s5071_s9 + $0x268] sm:$0xff] }
 0x2f6   :  { %2456 = vmatpush1.bf16.msra.mxu0 %v3125_v22  ;;  %2497 = vmatpush1.bf16.msra.mxu1 %v3253_v23  ;;  %v1036_v22 = vld [vmem:[%s5071_s9 + $0x688] sm:$0xff]  ;;  %v3182_v32 = vcombine.high %v900_v8, %v904_v9 }
 0x2f7   :  { %2457 = vmatprep.subr.bf16.mxu0 %v3118_v24  ;;  %2498 = vmatprep.subr.bf16.mxu1 %v3246_v25  ;;  %v1040_v23 = vld [vmem:[%s5071_s9 + $0x6a8] sm:$0xff]  ;;  %v3197_v24 = vcombine.low %v916_v12, %v920_v13  ;;  %v3325_v25 = vcombine.low %v1044_v16, %v1048_v61  ;;  %v3152_v12 = vcombine.high %v869_v60, %v873_v62  ;;  %v861_v16 = vld [vmem:[%s5071_s9 + $0x110] sm:$0xff] }
 0x2f8   :  { %v3318_v14 = vcombine.high %v1036_v22, %v1040_v23  ;;  %v892_v38 = vld [vmem:[%s5071_s9 + $0x208] sm:$0xff]  ;;  %v865_v61 = vld [vmem:[%s5071_s9 + $0x130] sm:$0xff] }
 0x2f9   :  { %v896_v39 = vld [vmem:[%s5071_s9 + $0x228] sm:$0xff] }
 0x2fa   :  { %2458 = vmatpush1.bf16.msra.mxu0 %v3117_v27  ;;  %2499 = vmatpush1.bf16.msra.mxu1 %v3245_v29  ;;  %v1028_v27 = vld [vmem:[%s5071_s9 + $0x648] sm:$0xff]  ;;  %v3174_v46 = vcombine.high %v892_v38, %v896_v39 }
 0x2fb   :  { %2459 = vmatprep.subr.bf16.mxu0 %v3110_v30  ;;  %2500 = vmatprep.subr.bf16.mxu1 %v3238_v31  ;;  %v1032_v29 = vld [vmem:[%s5071_s9 + $0x668] sm:$0xff]  ;;  %v3189_v30 = vcombine.low %v908_v20, %v912_v21  ;;  %v3317_v31 = vcombine.low %v1036_v22, %v1040_v23  ;;  %v3144_v20 = vcombine.high %v861_v16, %v865_v61  ;;  %v853_v22 = vld [vmem:[%s5071_s9 + $0xd0] sm:$0xff] }
 0x2fc   :  { %v3310_v33 = vcombine.high %v1028_v27, %v1032_v29  ;;  %v857_v23 = vld [vmem:[%s5071_s9 + $0xf0] sm:$0xff] }
 0x2fe   :  { %2460 = vmatpush1.bf16.msra.mxu0 %v3109_v42  ;;  %2501 = vmatpush1.bf16.msra.mxu1 %v3237_v43  ;;  %v1020_v42 = vld [vmem:[%s5071_s9 + $0x608] sm:$0xff] }
 0x2ff   :  { %2461 = vmatprep.subr.bf16.mxu0 %v3230_v44  ;;  %2502 = vmatprep.subr.bf16.mxu1 %v3358_v45  ;;  %v1024_v43 = vld [vmem:[%s5071_s9 + $0x628] sm:$0xff]  ;;  %v3181_v44 = vcombine.low %v900_v8, %v904_v9  ;;  %v3309_v45 = vcombine.low %v1028_v27, %v1032_v29  ;;  %v3136_v8 = vcombine.high %v853_v22, %v857_v23  ;;  %v845_v27 = vld [vmem:[%s5071_s9 + $0x90] sm:$0xff] }
 0x300   :  { %v3302_v47 = vcombine.high %v1020_v42, %v1024_v43  ;;  %v849_v29 = vld [vmem:[%s5071_s9 + $0xb0] sm:$0xff] }
 0x302   :  { %2462 = vmatpush2.bf16.msra.mxu0 %v3229_v54  ;;  %2503 = vmatpush2.bf16.msra.mxu1 %v3357_v55  ;;  %v1013_v54 = vld [vmem:[%s5071_s9 + $0x5d0] sm:$0xff] }
 0x303   :  { %2463 = vmatprep.subr.bf16.mxu0 %v3222_v56  ;;  %2504 = vmatprep.subr.bf16.mxu1 %v3350_v0  ;;  %v1017_v55 = vld [vmem:[%s5071_s9 + $0x5f0] sm:$0xff]  ;;  %v3173_v56 = vcombine.low %v892_v38, %v896_v39  ;;  %v3301_v0 = vcombine.low %v1020_v42, %v1024_v43  ;;  %v3128_v38 = vcombine.high %v845_v27, %v849_v29 }
 0x304   :  { %v3296_v2 = vcombine.high %v1013_v54, %v1017_v55  ;;  %v837_v42 = vld [vmem:[%s5071_s9 + $0x50] sm:$0xff] }
 0x305   :  { %v841_v43 = vld [vmem:[%s5071_s9 + $0x70] sm:$0xff] }
 0x306   :  { %2464 = vmatpush2.bf16.msra.mxu0 %v3221_v6  ;;  %2505 = vmatpush2.bf16.msra.mxu1 %v3349_v57  ;;  %v1005_v6 = vld [vmem:[%s5071_s9 + $0x590] sm:$0xff] }
 0x307   :  { %2465 = vmatprep.subr.bf16.mxu0 %v3214_v51  ;;  %2506 = vmatprep.subr.bf16.mxu1 %v3342_v48  ;;  %v1009_v57 = vld [vmem:[%s5071_s9 + $0x5b0] sm:$0xff]  ;;  %v3167_v51 = vcombine.low %v885_v49, %v889_v53  ;;  %v3295_v48 = vcombine.low %v1013_v54, %v1017_v55  ;;  %v3120_v49 = vcombine.high %v837_v42, %v841_v43 }
 0x308   :  { %v3288_v59 = vcombine.high %v1005_v6, %v1009_v57  ;;  %v829_v54 = vld [vmem:[%s5071_s9 + $0x10] sm:$0xff] }
 0x309   :  { %v833_v55 = vld [vmem:[%s5071_s9 + $0x30] sm:$0xff] }
 0x30a   :  { %2466 = vmatpush2.bf16.msra.mxu0 %v3213_v3  ;;  %2507 = vmatpush2.bf16.msra.mxu1 %v3341_v7  ;;  %v997_v3 = vld [vmem:[%s5071_s9 + $0x550] sm:$0xff] }
 0x30b   :  { %2467 = vmatprep.subr.bf16.mxu0 %v3206_v10  ;;  %2508 = vmatprep.subr.bf16.mxu1 %v3334_v11  ;;  %v1001_v7 = vld [vmem:[%s5071_s9 + $0x570] sm:$0xff]  ;;  %v3159_v10 = vcombine.low %v877_v4, %v881_v5  ;;  %v3287_v11 = vcombine.low %v1005_v6, %v1009_v57  ;;  %v3112_v4 = vcombine.high %v829_v54, %v833_v55 }
 0x30c   :  { %v3280_v13 = vcombine.high %v997_v3, %v1001_v7  ;;  %v949_v6 = vld [vmem:[%s5071_s9 + $0x3d0] sm:$0xff] }
 0x30d   :  { %v953_v57 = vld [vmem:[%s5071_s9 + $0x3f0] sm:$0xff] }
 0x30e   :  { %2468 = vmatpush2.bf16.msra.mxu0 %v3205_v63  ;;  %2509 = vmatpush2.bf16.msra.mxu1 %v3333_v17  ;;  %v989_v63 = vld [vmem:[%s5071_s9 + $0x510] sm:$0xff] }
 0x30f   :  { %2469 = vmatprep.subr.bf16.mxu0 %v3198_v18  ;;  %2510 = vmatprep.subr.bf16.mxu1 %v3326_v19  ;;  %v993_v17 = vld [vmem:[%s5071_s9 + $0x530] sm:$0xff]  ;;  %v3151_v18 = vcombine.low %v869_v60, %v873_v62  ;;  %v3279_v19 = vcombine.low %v997_v3, %v1001_v7  ;;  %v3232_v60 = vcombine.high %v949_v6, %v953_v57 }
 0x310   :  { %v3272_v21 = vcombine.high %v989_v63, %v993_v17  ;;  %v941_v3 = vld [vmem:[%s5071_s9 + $0x390] sm:$0xff] }
 0x311   :  { %v945_v7 = vld [vmem:[%s5071_s9 + $0x3b0] sm:$0xff] }
 0x312   :  { %2470 = vmatpush2.bf16.msra.mxu0 %v3197_v24  ;;  %2511 = vmatpush2.bf16.msra.mxu1 %v3325_v25  ;;  %v981_v24 = vld [vmem:[%s5071_s9 + $0x4d0] sm:$0xff] }
 0x313   :  { %2471 = vmatprep.subr.bf16.mxu0 %v3190_v15  ;;  %2512 = vmatprep.subr.bf16.mxu1 %v3318_v14  ;;  %v985_v25 = vld [vmem:[%s5071_s9 + $0x4f0] sm:$0xff]  ;;  %v3143_v15 = vcombine.low %v861_v16, %v865_v61  ;;  %v3271_v14 = vcombine.low %v989_v63, %v993_v17  ;;  %v3224_v16 = vcombine.high %v941_v3, %v945_v7 }
 0x314   :  { %v3264_v9 = vcombine.high %v981_v24, %v985_v25  ;;  %v933_v63 = vld [vmem:[%s5071_s9 + $0x350] sm:$0xff] }
 0x315   :  { %v937_v17 = vld [vmem:[%s5071_s9 + $0x370] sm:$0xff] }
 0x316   :  { %2472 = vmatpush2.bf16.msra.mxu0 %v3189_v30  ;;  %2513 = vmatpush2.bf16.msra.mxu1 %v3317_v31  ;;  %v973_v30 = vld [vmem:[%s5071_s9 + $0x490] sm:$0xff] }
 0x317   :  { %2473 = vmatprep.subr.bf16.mxu0 %v3182_v32  ;;  %2514 = vmatprep.subr.bf16.mxu1 %v3310_v33  ;;  %v977_v31 = vld [vmem:[%s5071_s9 + $0x4b0] sm:$0xff]  ;;  %v3135_v32 = vcombine.low %v853_v22, %v857_v23  ;;  %v3263_v33 = vcombine.low %v981_v24, %v985_v25  ;;  %v3216_v22 = vcombine.high %v933_v63, %v937_v17 }
 0x318   :  { %v3256_v39 = vcombine.high %v973_v30, %v977_v31  ;;  %v925_v24 = vld [vmem:[%s5071_s9 + $0x310] sm:$0xff] }
 0x319   :  { %v929_v25 = vld [vmem:[%s5071_s9 + $0x330] sm:$0xff] }
 0x31a   :  { %2474 = vmatpush2.bf16.msra.mxu0 %v3181_v44  ;;  %2515 = vmatpush2.bf16.msra.mxu1 %v3309_v45  ;;  %v965_v44 = vld [vmem:[%s5071_s9 + $0x450] sm:$0xff] }
 0x31b   :  { %2475 = vmatprep.subr.bf16.mxu0 %v3174_v46  ;;  %2516 = vmatprep.subr.bf16.mxu1 %v3302_v47  ;;  %v969_v45 = vld [vmem:[%s5071_s9 + $0x470] sm:$0xff]  ;;  %v3127_v46 = vcombine.low %v845_v27, %v849_v29  ;;  %v3255_v47 = vcombine.low %v973_v30, %v977_v31  ;;  %v3208_v27 = vcombine.high %v925_v24, %v929_v25 }
 0x31c   :  { %v3248_v53 = vcombine.high %v965_v44, %v969_v45  ;;  %v917_v30 = vld [vmem:[%s5071_s9 + $0x2d0] sm:$0xff] }
 0x31d   :  { %v921_v31 = vld [vmem:[%s5071_s9 + $0x2f0] sm:$0xff] }
 0x31e   :  { %2476 = vmatpush2.bf16.msra.mxu0 %v3173_v56  ;;  %2517 = vmatpush2.bf16.msra.mxu1 %v3301_v0  ;;  %v957_v56 = vld [vmem:[%s5071_s9 + $0x410] sm:$0xff] }
 0x31f   :  { %2527 = vmatprep.subr.bf16.mxu0 %v3168_v1  ;;  %2568 = vmatprep.subr.bf16.mxu1 %v3296_v2  ;;  %v961_v0 = vld [vmem:[%s5071_s9 + $0x430] sm:$0xff]  ;;  %v3119_v1 = vcombine.low %v837_v42, %v841_v43  ;;  %v3247_v2 = vcombine.low %v965_v44, %v969_v45  ;;  %v3200_v42 = vcombine.high %v917_v30, %v921_v31 }
 0x320   :  { %v3240_v5 = vcombine.high %v957_v56, %v961_v0  ;;  %v909_v44 = vld [vmem:[%s5071_s9 + $0x290] sm:$0xff] }
 0x321   :  { %2478 = vmatmul.mubr.bf16.vlgmr.msra.gmra.mxu0 %v4329_v40  ;;  %2519 = vmatmul.mubr.bf16.vlgmr.msra.gmra.mxu1 %v4331_v41  ;;  %v913_v45 = vld [vmem:[%s5071_s9 + $0x2b0] sm:$0xff] }
 0x322   :  { %2528 = vmatpush1.bf16.msra.mxu0 %v3167_v51  ;;  %2559 = vmatprep.mubr.bf16.mxu0 %v4325_v36  ;;  %v1077_v51 = vld [vmem:[%s5071_s9 + $0x7d0] sm:$0xff] }
 0x323   :  { %2569 = vmatpush1.bf16.msra.mxu1 %v3295_v48  ;;  %2600 = vmatprep.mubr.bf16.mxu1 %v4327_v37  ;;  %v1081_v48 = vld [vmem:[%s5071_s9 + $0x7f0] sm:$0xff] }
 0x324   :  { %2529 = vmatprep.subr.bf16.mxu0 %v3160_v58  ;;  %2570 = vmatprep.subr.bf16.mxu1 %v3288_v59  ;;  %v3111_v58 = vcombine.low %v829_v54, %v833_v55  ;;  %v3239_v59 = vcombine.low %v957_v56, %v961_v0  ;;  %v3360_v62 = vcombine.high %v1077_v51, %v1081_v48  ;;  %v901_v56 = vld [vmem:[%s5071_s9 + $0x250] sm:$0xff] }
 0x325   :  { %v3192_v54 = vcombine.high %v909_v44, %v913_v45  ;;  %v905_v0 = vld [vmem:[%s5071_s9 + $0x270] sm:$0xff] }
 0x326   :  { %2530 = vmatpush1.bf16.msra.mxu0 %v3159_v10  ;;  %v1069_v10 = vld [vmem:[%s5071_s9 + $0x790] sm:$0xff] }
 0x327   :  { %2571 = vmatpush1.bf16.msra.mxu1 %v3287_v11  ;;  %2531 = vmatprep.subr.bf16.mxu0 %v3152_v12  ;;  %v1073_v11 = vld [vmem:[%s5071_s9 + $0x7b0] sm:$0xff]  ;;  %v3231_v12 = vcombine.low %v949_v6, %v953_v57  ;;  %v3184_v6 = vcombine.high %v901_v56, %v905_v0 }
 0x328   :  { %2572 = vmatprep.subr.bf16.mxu1 %v3280_v13  ;;  %v3359_v13 = vcombine.low %v1077_v51, %v1081_v48  ;;  %v3352_v61 = vcombine.high %v1069_v10, %v1073_v11  ;;  %v893_v51 = vld [vmem:[%s5071_s9 + $0x210] sm:$0xff] }
 0x329   :  { %v897_v48 = vld [vmem:[%s5071_s9 + $0x230] sm:$0xff] }
 0x32a   :  { %2532 = vmatpush1.bf16.msra.mxu0 %v3151_v18  ;;  %v1061_v18 = vld [vmem:[%s5071_s9 + $0x750] sm:$0xff] }
 0x32b   :  { %2573 = vmatpush1.bf16.msra.mxu1 %v3279_v19  ;;  %2533 = vmatprep.subr.bf16.mxu0 %v3144_v20  ;;  %v1065_v19 = vld [vmem:[%s5071_s9 + $0x770] sm:$0xff]  ;;  %v3223_v20 = vcombine.low %v941_v3, %v945_v7  ;;  %v3176_v3 = vcombine.high %v893_v51, %v897_v48 }
 0x32c   :  { %2574 = vmatprep.subr.bf16.mxu1 %v3272_v21  ;;  %v3351_v21 = vcombine.low %v1069_v10, %v1073_v11  ;;  %v3344_v23 = vcombine.high %v1061_v18, %v1065_v19  ;;  %v886_v10 = vld [vmem:[%s5071_s9 + $0x1d8] sm:$0xff] }
 0x32d   :  { %v890_v11 = vld [vmem:[%s5071_s9 + $0x1f8] sm:$0xff] }
 0x32e   :  { %2534 = vmatpush1.bf16.msra.mxu0 %v3143_v15  ;;  %v1053_v15 = vld [vmem:[%s5071_s9 + $0x710] sm:$0xff] }
 0x32f   :  { %2575 = vmatpush1.bf16.msra.mxu1 %v3271_v14  ;;  %2535 = vmatprep.subr.bf16.mxu0 %v3136_v8  ;;  %v1057_v14 = vld [vmem:[%s5071_s9 + $0x730] sm:$0xff]  ;;  %v3215_v8 = vcombine.low %v933_v63, %v937_v17  ;;  %v3170_v63 = vcombine.high %v886_v10, %v890_v11 }
 0x330   :  { %2576 = vmatprep.subr.bf16.mxu1 %v3264_v9  ;;  %v3343_v9 = vcombine.low %v1061_v18, %v1065_v19  ;;  %v3336_v29 = vcombine.high %v1053_v15, %v1057_v14  ;;  %v878_v18 = vld [vmem:[%s5071_s9 + $0x198] sm:$0xff] }
 0x331   :  { %v882_v19 = vld [vmem:[%s5071_s9 + $0x1b8] sm:$0xff] }
 0x332   :  { %2536 = vmatpush1.bf16.msra.mxu0 %v3135_v32  ;;  %v1045_v32 = vld [vmem:[%s5071_s9 + $0x6d0] sm:$0xff] }
 0x333   :  { %2577 = vmatpush1.bf16.msra.mxu1 %v3263_v33  ;;  %2537 = vmatprep.subr.bf16.mxu0 %v3128_v38  ;;  %v1049_v33 = vld [vmem:[%s5071_s9 + $0x6f0] sm:$0xff]  ;;  %v3207_v38 = vcombine.low %v925_v24, %v929_v25  ;;  %v3162_v24 = vcombine.high %v878_v18, %v882_v19  ;;  %v870_v25 = vld [vmem:[%s5071_s9 + $0x158] sm:$0xff] }
 0x334   :  { %2578 = vmatprep.subr.bf16.mxu1 %v3256_v39  ;;  %v3335_v39 = vcombine.low %v1053_v15, %v1057_v14  ;;  %v3328_v43 = vcombine.high %v1045_v32, %v1049_v33  ;;  %v874_v15 = vld [vmem:[%s5071_s9 + $0x178] sm:$0xff] }
 0x336   :  { %2538 = vmatpush1.bf16.msra.mxu0 %v3127_v46  ;;  %v1037_v46 = vld [vmem:[%s5071_s9 + $0x690] sm:$0xff] }
 0x337   :  { %2579 = vmatpush1.bf16.msra.mxu1 %v3255_v47  ;;  %2539 = vmatprep.subr.bf16.mxu0 %v3120_v49  ;;  %v1041_v47 = vld [vmem:[%s5071_s9 + $0x6b0] sm:$0xff]  ;;  %v3199_v49 = vcombine.low %v917_v30, %v921_v31  ;;  %v3154_v30 = vcombine.high %v870_v25, %v874_v15 }
 0x338   :  { %2580 = vmatprep.subr.bf16.mxu1 %v3248_v53  ;;  %v3327_v53 = vcombine.low %v1045_v32, %v1049_v33  ;;  %v3320_v55 = vcombine.high %v1037_v46, %v1041_v47  ;;  %v862_v32 = vld [vmem:[%s5071_s9 + $0x118] sm:$0xff] }
 0x339   :  { %v866_v33 = vld [vmem:[%s5071_s9 + $0x138] sm:$0xff] }
 0x33a   :  { %2540 = vmatpush1.bf16.msra.mxu0 %v3119_v1  ;;  %v1029_v1 = vld [vmem:[%s5071_s9 + $0x650] sm:$0xff] }
 0x33b   :  { %2581 = vmatpush1.bf16.msra.mxu1 %v3247_v2  ;;  %2541 = vmatprep.subr.bf16.mxu0 %v3112_v4  ;;  %v1033_v2 = vld [vmem:[%s5071_s9 + $0x670] sm:$0xff]  ;;  %v3191_v4 = vcombine.low %v909_v44, %v913_v45  ;;  %v854_v44 = vld [vmem:[%s5071_s9 + $0xd8] sm:$0xff] }
 0x33c   :  { %2582 = vmatprep.subr.bf16.mxu1 %v3240_v5  ;;  %v3319_v5 = vcombine.low %v1037_v46, %v1041_v47  ;;  %v3312_v57 = vcombine.high %v1029_v1, %v1033_v2  ;;  %v858_v45 = vld [vmem:[%s5071_s9 + $0xf8] sm:$0xff] }
 0x33d   :  { %v982_v46 = vld [vmem:[%s5071_s9 + $0x4d8] sm:$0xff] }
 0x33e   :  { %2542 = vmatpush1.bf16.msra.mxu0 %v3111_v58  ;;  %v1021_v58 = vld [vmem:[%s5071_s9 + $0x610] sm:$0xff]  ;;  %v986_v47 = vld [vmem:[%s5071_s9 + $0x4f8] sm:$0xff] }
 0x33f   :  { %2583 = vmatpush1.bf16.msra.mxu1 %v3239_v59  ;;  %2543 = vmatprep.subr.bf16.mxu0 %v3232_v60  ;;  %v1025_v59 = vld [vmem:[%s5071_s9 + $0x630] sm:$0xff]  ;;  %v3183_v60 = vcombine.low %v901_v56, %v905_v0  ;;  %v846_v56 = vld [vmem:[%s5071_s9 + $0x98] sm:$0xff] }
 0x340   :  { %2584 = vmatprep.subr.bf16.mxu1 %v3360_v62  ;;  %v3311_v62 = vcombine.low %v1029_v1, %v1033_v2  ;;  %v3304_v7 = vcombine.high %v1021_v58, %v1025_v59  ;;  %v850_v0 = vld [vmem:[%s5071_s9 + $0xb8] sm:$0xff] }
 0x341   :  { %v974_v1 = vld [vmem:[%s5071_s9 + $0x498] sm:$0xff] }
 0x342   :  { %2544 = vmatpush2.bf16.msra.mxu0 %v3231_v12  ;;  %v1014_v12 = vld [vmem:[%s5071_s9 + $0x5d8] sm:$0xff] }
 0x343   :  { %2585 = vmatpush2.bf16.msra.mxu1 %v3359_v13  ;;  %2545 = vmatprep.subr.bf16.mxu0 %v3224_v16  ;;  %v1018_v13 = vld [vmem:[%s5071_s9 + $0x5f8] sm:$0xff]  ;;  %v3175_v16 = vcombine.low %v893_v51, %v897_v48 }
 0x344   :  { %2586 = vmatprep.subr.bf16.mxu1 %v3352_v61  ;;  %v3303_v61 = vcombine.low %v1021_v58, %v1025_v59  ;;  %v3298_v17 = vcombine.high %v1014_v12, %v1018_v13  ;;  %v978_v2 = vld [vmem:[%s5071_s9 + $0x4b8] sm:$0xff] }
 0x345   :  { %v838_v51 = vld [vmem:[%s5071_s9 + $0x58] sm:$0xff] }
 0x346   :  { %2546 = vmatpush2.bf16.msra.mxu0 %v3223_v20  ;;  %v3169_v20 = vcombine.low %v886_v10, %v890_v11  ;;  %v842_v48 = vld [vmem:[%s5071_s9 + $0x78] sm:$0xff] }
 0x347   :  { %2587 = vmatpush2.bf16.msra.mxu1 %v3351_v21  ;;  %2547 = vmatprep.subr.bf16.mxu0 %v3216_v22  ;;  %v1006_v21 = vld [vmem:[%s5071_s9 + $0x598] sm:$0xff] }
 0x348   :  { %2588 = vmatprep.subr.bf16.mxu1 %v3344_v23  ;;  %v1010_v22 = vld [vmem:[%s5071_s9 + $0x5b8] sm:$0xff]  ;;  %v3297_v23 = vcombine.low %v1014_v12, %v1018_v13 }
 0x349   :  { %v3290_v14 = vcombine.high %v1006_v21, %v1010_v22  ;;  %v966_v58 = vld [vmem:[%s5071_s9 + $0x458] sm:$0xff] }
 0x34a   :  { %2548 = vmatpush2.bf16.msra.mxu0 %v3215_v8  ;;  %v998_v8 = vld [vmem:[%s5071_s9 + $0x558] sm:$0xff] }
 0x34b   :  { %2589 = vmatpush2.bf16.msra.mxu1 %v3343_v9  ;;  %2549 = vmatprep.subr.bf16.mxu0 %v3208_v27  ;;  %v1002_v9 = vld [vmem:[%s5071_s9 + $0x578] sm:$0xff]  ;;  %v3161_v27 = vcombine.low %v878_v18, %v882_v19 }
 0x34c   :  { %2590 = vmatprep.subr.bf16.mxu1 %v3336_v29  ;;  %v3289_v29 = vcombine.low %v1006_v21, %v1010_v22  ;;  %v3282_v31 = vcombine.high %v998_v8, %v1002_v9  ;;  %v970_v59 = vld [vmem:[%s5071_s9 + $0x478] sm:$0xff] }
 0x34d   :  { %v830_v10 = vld [vmem:[%s5071_s9 + $0x18] sm:$0xff] }
 0x34e   :  { %2550 = vmatpush2.bf16.msra.mxu0 %v3207_v38  ;;  %v994_v38 = vld [vmem:[%s5071_s9 + $0x538] sm:$0xff] }
 0x34f   :  { %2591 = vmatpush2.bf16.msra.mxu1 %v3335_v39  ;;  %2551 = vmatprep.subr.bf16.mxu0 %v3200_v42  ;;  %v3281_v39 = vcombine.low %v998_v8, %v1002_v9  ;;  %v3146_v42 = vcombine.high %v862_v32, %v866_v33  ;;  %v834_v11 = vld [vmem:[%s5071_s9 + $0x38] sm:$0xff] }
 0x350   :  { %2592 = vmatprep.subr.bf16.mxu1 %v3328_v43  ;;  %v958_v12 = vld [vmem:[%s5071_s9 + $0x418] sm:$0xff]  ;;  %v3113_v22 = vcombine.low %v830_v10, %v834_v11 }
 0x351   :  { %v962_v13 = vld [vmem:[%s5071_s9 + $0x438] sm:$0xff] }
 0x352   :  { %2552 = vmatpush2.bf16.msra.mxu0 %v3199_v49  ;;  %v3145_v49 = vcombine.low %v862_v32, %v866_v33  ;;  %v950_v18 = vld [vmem:[%s5071_s9 + $0x3d8] sm:$0xff] }
 0x353   :  { %2593 = vmatpush2.bf16.msra.mxu1 %v3327_v53  ;;  %2553 = vmatprep.subr.bf16.mxu0 %v3192_v54  ;;  %v3138_v54 = vcombine.high %v854_v44, %v858_v45  ;;  %v954_v19 = vld [vmem:[%s5071_s9 + $0x3f8] sm:$0xff] }
 0x354   :  { %2594 = vmatprep.subr.bf16.mxu1 %v3320_v55  ;;  %v3266_v55 = vcombine.high %v982_v46, %v986_v47  ;;  %v1082_v21 = vld [vmem:[%s5071_s9 + $0x7f8] sm:$0xff] }
 0x355   :  { %v1070_v8 = vld [vmem:[%s5071_s9 + $0x798] sm:$0xff] }
 0x356   :  { %2554 = vmatpush2.bf16.msra.mxu0 %v3191_v4  ;;  %v3137_v4 = vcombine.low %v854_v44, %v858_v45  ;;  %v1074_v9 = vld [vmem:[%s5071_s9 + $0x7b8] sm:$0xff] }
 0x357   :  { %2595 = vmatpush2.bf16.msra.mxu1 %v3319_v5  ;;  %2555 = vmatprep.subr.bf16.mxu0 %v3184_v6  ;;  %v3265_v5 = vcombine.low %v982_v46, %v986_v47  ;;  %v3130_v6 = vcombine.high %v846_v56, %v850_v0  ;;  %v934_v32 = vld [vmem:[%s5071_s9 + $0x358] sm:$0xff] }
 0x358   :  { %2596 = vmatprep.subr.bf16.mxu1 %v3312_v57  ;;  %v3258_v57 = vcombine.high %v974_v1, %v978_v2  ;;  %v938_v33 = vld [vmem:[%s5071_s9 + $0x378] sm:$0xff] }
 0x359   :  { %v926_v44 = vld [vmem:[%s5071_s9 + $0x318] sm:$0xff] }
 0x35a   :  { %2556 = vmatpush2.bf16.msra.mxu0 %v3183_v60  ;;  %v3129_v60 = vcombine.low %v846_v56, %v850_v0  ;;  %v930_v45 = vld [vmem:[%s5071_s9 + $0x338] sm:$0xff] }
 0x35b   :  { %2597 = vmatpush2.bf16.msra.mxu1 %v3311_v62  ;;  %2557 = vmatprep.subr.bf16.mxu0 %v3176_v3  ;;  %v3257_v62 = vcombine.low %v974_v1, %v978_v2  ;;  %v3122_v3 = vcombine.high %v838_v51, %v842_v48  ;;  %v1054_v46 = vld [vmem:[%s5071_s9 + $0x718] sm:$0xff] }
 0x35c   :  { %2598 = vmatprep.subr.bf16.mxu1 %v3304_v7  ;;  %v3250_v7 = vcombine.high %v966_v58, %v970_v59  ;;  %v1058_v47 = vld [vmem:[%s5071_s9 + $0x738] sm:$0xff] }
 0x35d   :  { %v918_v56 = vld [vmem:[%s5071_s9 + $0x2d8] sm:$0xff] }
 0x35e   :  { %2558 = vmatpush2.bf16.msra.mxu0 %v3175_v16  ;;  %v3121_v16 = vcombine.low %v838_v51, %v842_v48  ;;  %v922_v0 = vld [vmem:[%s5071_s9 + $0x2f8] sm:$0xff] }
 0x35f   :  { %2599 = vmatpush2.bf16.msra.mxu1 %v3303_v61  ;;  %2609 = vmatprep.subr.bf16.mxu0 %v3170_v63  ;;  %v3249_v61 = vcombine.low %v966_v58, %v970_v59  ;;  %v3114_v63 = vcombine.high %v830_v10, %v834_v11  ;;  %v1046_v1 = vld [vmem:[%s5071_s9 + $0x6d8] sm:$0xff] }
 0x360   :  { %2650 = vmatprep.subr.bf16.mxu1 %v3298_v17  ;;  %v3242_v17 = vcombine.high %v958_v12, %v962_v13  ;;  %v1050_v2 = vld [vmem:[%s5071_s9 + $0x6f8] sm:$0xff] }
 0x361   :  { %2560 = vmatmul.mubr.bf16.vlgmr.msra.gmra.mxu0 %v4329_v40  ;;  %v910_v51 = vld [vmem:[%s5071_s9 + $0x298] sm:$0xff] }
 0x362   :  { %2601 = vmatmul.mubr.bf16.vlgmr.msra.gmra.mxu1 %v4331_v41  ;;  %2610 = vmatpush1.bf16.msra.mxu0 %v3169_v20  ;;  %v1078_v20 = vld [vmem:[%s5071_s9 + $0x7d8] sm:$0xff] }
 0x363   :  { %2641 = vmatprep.mubr.bf16.mxu0 %v4325_v36  ;;  %2651 = vmatpush1.bf16.msra.mxu1 %v3297_v23  ;;  %v990_v36 = vld [vmem:[%s5071_s9 + $0x518] sm:$0xff]  ;;  %v3241_v23 = vcombine.low %v958_v12, %v962_v13 }
 0x364   :  { %2682 = vmatprep.mubr.bf16.mxu1 %v4327_v37  ;;  %2611 = vmatprep.subr.bf16.mxu0 %v3162_v24  ;;  %v3153_v37 = vcombine.low %v870_v25, %v874_v15  ;;  %v3274_v43 = vcombine.high %v990_v36, %v994_v38  ;;  %v3273_v53 = vcombine.low %v990_v36, %v994_v38  ;;  %v942_v15 = vld [vmem:[%s5071_s9 + $0x398] sm:$0xff] }
 0x365   :  { %2652 = vmatprep.subr.bf16.mxu1 %v3290_v14  ;;  %v3234_v24 = vcombine.high %v950_v18, %v954_v19  ;;  %v3362_v25 = vcombine.high %v1078_v20, %v1082_v21  ;;  %v946_v14 = vld [vmem:[%s5071_s9 + $0x3b8] sm:$0xff] }
 0x366   :  { %2612 = vmatpush1.bf16.msra.mxu0 %v3161_v27  ;;  %v3233_v27 = vcombine.low %v950_v18, %v954_v19  ;;  %v1062_v36 = vld [vmem:[%s5071_s9 + $0x758] sm:$0xff] }
 0x367   :  { %2653 = vmatpush1.bf16.msra.mxu1 %v3289_v29  ;;  %2613 = vmatprep.subr.bf16.mxu0 %v3154_v30  ;;  %v3361_v29 = vcombine.low %v1078_v20, %v1082_v21  ;;  %v3226_v30 = vcombine.high %v942_v15, %v946_v14  ;;  %v1066_v38 = vld [vmem:[%s5071_s9 + $0x778] sm:$0xff] }
 0x368   :  { %2654 = vmatprep.subr.bf16.mxu1 %v3282_v31  ;;  %v3354_v31 = vcombine.high %v1070_v8, %v1074_v9  ;;  %v914_v48 = vld [vmem:[%s5071_s9 + $0x2b8] sm:$0xff] }
 0x369   :  { %v1038_v58 = vld [vmem:[%s5071_s9 + $0x698] sm:$0xff] }
 0x36a   :  { %2614 = vmatpush1.bf16.msra.mxu0 %v3153_v37  ;;  %v3225_v37 = vcombine.low %v942_v15, %v946_v14  ;;  %v1042_v59 = vld [vmem:[%s5071_s9 + $0x6b8] sm:$0xff] }
 0x36b   :  { %2655 = vmatpush1.bf16.msra.mxu1 %v3281_v39  ;;  %2615 = vmatprep.subr.bf16.mxu0 %v3146_v42  ;;  %v3353_v39 = vcombine.low %v1070_v8, %v1074_v9  ;;  %v3218_v42 = vcombine.high %v934_v32, %v938_v33  ;;  %v902_v10 = vld [vmem:[%s5071_s9 + $0x258] sm:$0xff] }
 0x36c   :  { %2656 = vmatprep.subr.bf16.mxu1 %v3274_v43  ;;  %v3346_v43 = vcombine.high %v1062_v36, %v1066_v38  ;;  %v906_v11 = vld [vmem:[%s5071_s9 + $0x278] sm:$0xff] }
 0x36d   :  { %v1030_v12 = vld [vmem:[%s5071_s9 + $0x658] sm:$0xff] }
 0x36e   :  { %2616 = vmatpush1.bf16.msra.mxu0 %v3145_v49  ;;  %v3217_v49 = vcombine.low %v934_v32, %v938_v33  ;;  %v1034_v13 = vld [vmem:[%s5071_s9 + $0x678] sm:$0xff] }
 0x36f   :  { %2657 = vmatpush1.bf16.msra.mxu1 %v3273_v53  ;;  %2617 = vmatprep.subr.bf16.mxu0 %v3138_v54  ;;  %v3345_v53 = vcombine.low %v1062_v36, %v1066_v38  ;;  %v3210_v54 = vcombine.high %v926_v44, %v930_v45  ;;  %v894_v18 = vld [vmem:[%s5071_s9 + $0x218] sm:$0xff] }
 0x370   :  { %2658 = vmatprep.subr.bf16.mxu1 %v3266_v55  ;;  %v3338_v55 = vcombine.high %v1054_v46, %v1058_v47  ;;  %v898_v19 = vld [vmem:[%s5071_s9 + $0x238] sm:$0xff] }
 0x371   :  { %v1022_v20 = vld [vmem:[%s5071_s9 + $0x618] sm:$0xff]  ;;  %v3177_v15 = vcombine.low %v894_v18, %v898_v19 }
 0x372   :  { %2618 = vmatpush1.bf16.msra.mxu0 %v3137_v4  ;;  %v3209_v4 = vcombine.low %v926_v44, %v930_v45  ;;  %v1026_v21 = vld [vmem:[%s5071_s9 + $0x638] sm:$0xff] }
 0x373   :  { %2659 = vmatpush1.bf16.msra.mxu1 %v3265_v5  ;;  %2619 = vmatprep.subr.bf16.mxu0 %v3130_v6  ;;  %v3337_v5 = vcombine.low %v1054_v46, %v1058_v47  ;;  %v3202_v6 = vcombine.high %v918_v56, %v922_v0  ;;  %v3305_v14 = vcombine.low %v1022_v20, %v1026_v21 }
 0x374   :  { %2660 = vmatprep.subr.bf16.mxu1 %v3258_v57  ;;  %v3330_v57 = vcombine.high %v1046_v1, %v1050_v2 }
 0x376   :  { %2620 = vmatpush1.bf16.msra.mxu0 %v3129_v60  ;;  %v3201_v60 = vcombine.low %v918_v56, %v922_v0 }
 0x377   :  { %2661 = vmatpush1.bf16.msra.mxu1 %v3257_v62  ;;  %2621 = vmatprep.subr.bf16.mxu0 %v3122_v3  ;;  %v3329_v62 = vcombine.low %v1046_v1, %v1050_v2  ;;  %v3194_v3 = vcombine.high %v910_v51, %v914_v48 }
 0x378   :  { %2662 = vmatprep.subr.bf16.mxu1 %v3250_v7  ;;  %v3322_v7 = vcombine.high %v1038_v58, %v1042_v59 }
 0x37a   :  { %2622 = vmatpush1.bf16.msra.mxu0 %v3121_v16  ;;  %v3193_v16 = vcombine.low %v910_v51, %v914_v48 }
 0x37b   :  { %2663 = vmatpush1.bf16.msra.mxu1 %v3249_v61  ;;  %2623 = vmatprep.subr.bf16.mxu0 %v3114_v63  ;;  %v3321_v61 = vcombine.low %v1038_v58, %v1042_v59  ;;  %v3186_v63 = vcombine.high %v902_v10, %v906_v11 }
 0x37c   :  { %2664 = vmatprep.subr.bf16.mxu1 %v3242_v17  ;;  %v3314_v17 = vcombine.high %v1030_v12, %v1034_v13 }
 0x37e   :  { %2624 = vmatpush1.bf16.msra.mxu0 %v3113_v22  ;;  %v3185_v22 = vcombine.low %v902_v10, %v906_v11 }
 0x37f   :  { %2665 = vmatpush1.bf16.msra.mxu1 %v3241_v23  ;;  %2625 = vmatprep.subr.bf16.mxu0 %v3234_v24  ;;  %v3313_v23 = vcombine.low %v1030_v12, %v1034_v13  ;;  %v3178_v24 = vcombine.high %v894_v18, %v898_v19 }
 0x380   :  { %2666 = vmatprep.subr.bf16.mxu1 %v3362_v25  ;;  %v3306_v25 = vcombine.high %v1022_v20, %v1026_v21 }
 0x382   :  { %2626 = vmatpush2.bf16.msra.mxu0 %v3233_v27 }
 0x383   :  { %2667 = vmatpush2.bf16.msra.mxu1 %v3361_v29  ;;  %2627 = vmatprep.subr.bf16.mxu0 %v3226_v30 }
 0x384   :  { %2668 = vmatprep.subr.bf16.mxu1 %v3354_v31 }
 0x386   :  { %2628 = vmatpush2.bf16.msra.mxu0 %v3225_v37 }
 0x387   :  { %2669 = vmatpush2.bf16.msra.mxu1 %v3353_v39  ;;  %2629 = vmatprep.subr.bf16.mxu0 %v3218_v42 }
 0x388   :  { %2670 = vmatprep.subr.bf16.mxu1 %v3346_v43 }
 0x38a   :  { %2630 = vmatpush2.bf16.msra.mxu0 %v3217_v49 }
 0x38b   :  { %2671 = vmatpush2.bf16.msra.mxu1 %v3345_v53  ;;  %2631 = vmatprep.subr.bf16.mxu0 %v3210_v54 }
 0x38c   :  { %2672 = vmatprep.subr.bf16.mxu1 %v3338_v55 }
 0x38e   :  { %2632 = vmatpush2.bf16.msra.mxu0 %v3209_v4 }
 0x38f   :  { %2673 = vmatpush2.bf16.msra.mxu1 %v3337_v5  ;;  %2633 = vmatprep.subr.bf16.mxu0 %v3202_v6 }
 0x390   :  { %2674 = vmatprep.subr.bf16.mxu1 %v3330_v57 }
 0x392   :  { %2634 = vmatpush2.bf16.msra.mxu0 %v3201_v60 }
 0x393   :  { %2675 = vmatpush2.bf16.msra.mxu1 %v3329_v62  ;;  %2635 = vmatprep.subr.bf16.mxu0 %v3194_v3 }
 0x394   :  { %2676 = vmatprep.subr.bf16.mxu1 %v3322_v7 }
 0x396   :  { %2636 = vmatpush2.bf16.msra.mxu0 %v3193_v16 }
 0x397   :  { %2677 = vmatpush2.bf16.msra.mxu1 %v3321_v61  ;;  %2637 = vmatprep.subr.bf16.mxu0 %v3186_v63 }
 0x398   :  { %2678 = vmatprep.subr.bf16.mxu1 %v3314_v17 }
 0x39a   :  { %2638 = vmatpush2.bf16.msra.mxu0 %v3185_v22 }
 0x39b   :  { %2679 = vmatpush2.bf16.msra.mxu1 %v3313_v23  ;;  %2639 = vmatprep.subr.bf16.mxu0 %v3178_v24 }
 0x39c   :  { %2680 = vmatprep.subr.bf16.mxu1 %v3306_v25 }
 0x39e   :  { %2640 = vmatpush2.bf16.msra.mxu0 %v3177_v15 }
 0x39f   :  { %2681 = vmatpush2.bf16.msra.mxu1 %v3305_v14 }
 0x3a1   :  { %2642 = vmatmul.mubr.bf16.vlgmr.msra.gmra.mxu0 %v4329_v40  ;;  %v2397_v8 = vpop.f32.mrf.mxu0  ;;  %v2438_v9 = vpop.f32.mrf.mxu1 }
 0x3a2   :  { %2683 = vmatmul.mubr.bf16.vlgmr.msra.gmra.mxu1 %v4331_v41  ;;  %v4907_v27 = vadd.f32 %v2438_v9, %v2397_v8 }
 0x3a3   :  { %v2399_v29 = vpop.f32.mrf.mxu0  ;;  %v2440_v30 = vpop.f32.mrf.mxu1 }
 0x3a4   :  { %v2693_v31 = vrot.slane %v4907_v27, 4  ;;  %v2741_v32 = vmul.f32 %v4907_v27, %v4907_v27  ;;  %v4912_v33 = vadd.f32 %v2440_v30, %v2399_v29 }
 0x3a5   :  { %v2401_v36 = vpop.f32.mrf.mxu0  ;;  %v2442_v38 = vpop.f32.mrf.mxu1 }
 0x3a6   :  { %v2694_v37 = vadd.f32 %v2693_v31, %v4907_v27  ;;  %v2749_v40 = vrot.slane %v2741_v32, 4  ;;  %v2699_v39 = vrot.slane %v4912_v33, 4  ;;  %v2742_v41 = vmul.f32 %v4912_v33, %v4912_v33 }
 0x3a7   :  { %v2402_v42 = vpop.f32.mrf.mxu0  ;;  %v2443_v43 = vpop.f32.mrf.mxu1 }
 0x3a8   :  { %v2695_v44 = vrot.slane %v2694_v37, 2  ;;  %v2750_v45 = vadd.f32 %v2749_v40, %v2741_v32  ;;  %v2700_v46 = vadd.f32 %v2699_v39, %v4912_v33  ;;  %v2755_v47 = vrot.slane %v2742_v41, 4 }
 0x3aa   :  { %v2696_v49 = vadd.f32 %v2695_v44, %v2694_v37  ;;  %v2751_v53 = vrot.slane %v2750_v45, 2  ;;  %v2701_v54 = vrot.slane %v2700_v46, 2  ;;  %v2756_v55 = vadd.f32 %v2755_v47, %v2742_v41 }
 0x3ac   :  { %v2697_v56 = vrot.slane %v2696_v49, 1  ;;  %v2752_v0 = vadd.f32 %v2751_v53, %v2750_v45  ;;  %v2702_v1 = vadd.f32 %v2701_v54, %v2700_v46  ;;  %v2757_v2 = vrot.slane %v2756_v55, 2 }
 0x3ae   :  { %v2698_v4 = vadd.f32 %v2697_v56, %v2696_v49  ;;  %v2753_v5 = vrot.slane %v2752_v0, 1  ;;  %v2703_v6 = vrot.slane %v2702_v1, 1  ;;  %v2758_v57 = vadd.f32 %v2757_v2, %v2756_v55 }
 0x3b0   :  { %v2754_v51 = vadd.f32 %v2753_v5, %v2752_v0  ;;  %v4919_v48 = vmul.f32 0.125, %v2698_v4  ;;  %v2704_v58 = vadd.f32 %v2703_v6, %v2702_v1  ;;  %v2759_v59 = vrot.slane %v2758_v57, 1 }
 0x3b2   :  { %v2805_v60 = vmul.f32 0.125, %v2754_v51  ;;  %v2813_v62 = vmul.f32 %v4919_v48, %v4919_v48  ;;  %v2760_v3 = vadd.f32 %v2759_v59, %v2758_v57  ;;  %v4923_v7 = vmul.f32 0.125, %v2704_v58 }
 0x3b4   :  { %v2821_v10 = vsub.f32 %v2805_v60, %v2813_v62  ;;  %v2806_v11 = vmul.f32 0.125, %v2760_v3  ;;  %v2814_v12 = vmul.f32 %v4923_v7, %v4923_v7 }
 0x3b6   :  { %v2829_v13 = vadd.f32 0.8, %v2821_v10  ;;  %v2822_v16 = vsub.f32 %v2806_v11, %v2814_v12 }
 0x3b8   :  { %v2830_v61 = vadd.f32 0.8, %v2822_v16  ;;  %3406 = vrsqrt.f32 %v2829_v13 }
 0x3ba   :  { %3408 = vrsqrt.f32 %v2830_v61 }
 0x3c5   :  { %v3407_v63 = vpop.eup %3406 }
 0x3c7   :  { %v3409_v17 = vpop.eup %3408 }
 0x3c8   :  { %v2853_v18 = vcombine.low %v3407_v63, %v3409_v17 }
 0x3ca   :  { %v4948_v16 = vrot.slane %v2853_v18, %v4015_v28 }
 0x3e1   :  { %v2479_v19 = vpop.f32.mrf.mxu0  ;;  %v2520_v20 = vpop.f32.mrf.mxu1 }
 0x3e2   :  { %v4927_v21 = vadd.f32 %v2520_v20, %v2479_v19 }
 0x3e3   :  { %v2481_v22 = vpop.f32.mrf.mxu0  ;;  %v2522_v23 = vpop.f32.mrf.mxu1 }
 0x3e4   :  { %v2705_v24 = vrot.slane %v4927_v21, 4  ;;  %v2743_v25 = vmul.f32 %v4927_v21, %v4927_v21  ;;  %v4932_v15 = vadd.f32 %v2522_v23, %v2481_v22 }
 0x3e5   :  { %v2483_v14 = vpop.f32.mrf.mxu0  ;;  %v2524_v8 = vpop.f32.mrf.mxu1 }
 0x3e6   :  { %v2706_v9 = vadd.f32 %v2705_v24, %v4927_v21  ;;  %v2761_v29 = vrot.slane %v2743_v25, 4  ;;  %v2711_v30 = vrot.slane %v4932_v15, 4  ;;  %v2744_v31 = vmul.f32 %v4932_v15, %v4932_v15 }
 0x3e7   :  { %v2484_v32 = vpop.f32.mrf.mxu0  ;;  %v2525_v36 = vpop.f32.mrf.mxu1 }
 0x3e8   :  { %v2707_v38 = vrot.slane %v2706_v9, 2  ;;  %v2762_v37 = vadd.f32 %v2761_v29, %v2743_v25  ;;  %v2712_v40 = vadd.f32 %v2711_v30, %v4932_v15  ;;  %v2767_v39 = vrot.slane %v2744_v31, 4 }
 0x3ea   :  { %v2708_v41 = vadd.f32 %v2707_v38, %v2706_v9  ;;  %v2763_v42 = vrot.slane %v2762_v37, 2  ;;  %v2713_v43 = vrot.slane %v2712_v40, 2  ;;  %v2768_v44 = vadd.f32 %v2767_v39, %v2744_v31 }
 0x3ec   :  { %v2709_v45 = vrot.slane %v2708_v41, 1  ;;  %v2764_v46 = vadd.f32 %v2763_v42, %v2762_v37  ;;  %v2714_v47 = vadd.f32 %v2713_v43, %v2712_v40  ;;  %v2769_v49 = vrot.slane %v2768_v44, 2 }
 0x3ee   :  { %v2710_v53 = vadd.f32 %v2709_v45, %v2708_v41  ;;  %v2765_v54 = vrot.slane %v2764_v46, 1  ;;  %v2715_v55 = vrot.slane %v2714_v47, 1  ;;  %v2770_v56 = vadd.f32 %v2769_v49, %v2768_v44 }
 0x3f0   :  { %v2766_v0 = vadd.f32 %v2765_v54, %v2764_v46  ;;  %v4939_v1 = vmul.f32 0.125, %v2710_v53  ;;  %v2716_v2 = vadd.f32 %v2715_v55, %v2714_v47  ;;  %v2771_v4 = vrot.slane %v2770_v56, 1 }
 0x3f2   :  { %v2807_v5 = vmul.f32 0.125, %v2766_v0  ;;  %v2815_v6 = vmul.f32 %v4939_v1, %v4939_v1  ;;  %v2772_v57 = vadd.f32 %v2771_v4, %v2770_v56  ;;  %v4943_v51 = vmul.f32 0.125, %v2716_v2 }
 0x3f4   :  { %v2823_v58 = vsub.f32 %v2807_v5, %v2815_v6  ;;  %v2808_v59 = vmul.f32 0.125, %v2772_v57  ;;  %v2816_v60 = vmul.f32 %v4943_v51, %v4943_v51 }
 0x3f6   :  { %v2831_v62 = vadd.f32 0.8, %v2823_v58  ;;  %v2824_v3 = vsub.f32 %v2808_v59, %v2816_v60 }
 0x3f8   :  { %v2832_v10 = vadd.f32 0.8, %v2824_v3  ;;  %3410 = vrsqrt.f32 %v2831_v62 }
 0x3fa   :  { %3412 = vrsqrt.f32 %v2832_v10 }
 0x405   :  { %v3411_v11 = vpop.eup %3410 }
 0x407   :  { %v3413_v12 = vpop.eup %3412 }
 0x408   :  { %v2854_v13 = vcombine.low %v3411_v11, %v3413_v12 }
 0x40a   :  { %v4951_v61 = vrot.slane %v2854_v13, %v4015_v28 }
 0x40c   :  { %v2885_v63 = vcombine.low %v4948_v16, %v4951_v61 }
 0x421   :  { %v2561_v17 = vpop.f32.mrf.mxu0 }
 0x422   :  { %v2602_v19 = vpop.f32.mrf.mxu1 }
 0x423   :  { %v4955_v20 = vadd.f32 %v2602_v19, %v2561_v17  ;;  %v2563_v22 = vpop.f32.mrf.mxu0 }
 0x424   :  { %v2604_v23 = vpop.f32.mrf.mxu1 }
 0x425   :  { %v2717_v24 = vrot.slane %v4955_v20, 4  ;;  %v2745_v25 = vmul.f32 %v4955_v20, %v4955_v20  ;;  %v4960_v14 = vadd.f32 %v2604_v23, %v2563_v22  ;;  %v2565_v18 = vpop.f32.mrf.mxu0 }
 0x426   :  { %v2606_v8 = vpop.f32.mrf.mxu1 }
 0x427   :  { %v2718_v9 = vadd.f32 %v2717_v24, %v4955_v20  ;;  %v2773_v29 = vrot.slane %v2745_v25, 4  ;;  %v2723_v30 = vrot.slane %v4960_v14, 4  ;;  %v2746_v31 = vmul.f32 %v4960_v14, %v4960_v14  ;;  %v2566_v32 = vpop.f32.mrf.mxu0 }
 0x428   :  { %v2607_v36 = vpop.f32.mrf.mxu1 }
 0x429   :  { %v2719_v38 = vrot.slane %v2718_v9, 2  ;;  %v2774_v37 = vadd.f32 %v2773_v29, %v2745_v25  ;;  %v2724_v40 = vadd.f32 %v2723_v30, %v4960_v14  ;;  %v2779_v39 = vrot.slane %v2746_v31, 4 }
 0x42b   :  { %v2720_v41 = vadd.f32 %v2719_v38, %v2718_v9  ;;  %v2775_v42 = vrot.slane %v2774_v37, 2  ;;  %v2725_v43 = vrot.slane %v2724_v40, 2  ;;  %v2780_v44 = vadd.f32 %v2779_v39, %v2746_v31 }
 0x42d   :  { %v2721_v45 = vrot.slane %v2720_v41, 1  ;;  %v2776_v46 = vadd.f32 %v2775_v42, %v2774_v37  ;;  %v2726_v47 = vadd.f32 %v2725_v43, %v2724_v40  ;;  %v2781_v49 = vrot.slane %v2780_v44, 2 }
 0x42f   :  { %v2722_v53 = vadd.f32 %v2721_v45, %v2720_v41  ;;  %v2777_v54 = vrot.slane %v2776_v46, 1  ;;  %v2727_v55 = vrot.slane %v2726_v47, 1  ;;  %v2782_v56 = vadd.f32 %v2781_v49, %v2780_v44 }
 0x431   :  { %v2778_v0 = vadd.f32 %v2777_v54, %v2776_v46  ;;  %v4967_v2 = vmul.f32 0.125, %v2722_v53  ;;  %v2728_v4 = vadd.f32 %v2727_v55, %v2726_v47  ;;  %v2783_v5 = vrot.slane %v2782_v56, 1 }
 0x433   :  { %v2809_v6 = vmul.f32 0.125, %v2778_v0  ;;  %v2817_v57 = vmul.f32 %v4967_v2, %v4967_v2  ;;  %v2784_v58 = vadd.f32 %v2783_v5, %v2782_v56  ;;  %v4971_v59 = vmul.f32 0.125, %v2728_v4 }
 0x435   :  { %v2825_v60 = vsub.f32 %v2809_v6, %v2817_v57  ;;  %v2810_v62 = vmul.f32 0.125, %v2784_v58  ;;  %v2818_v3 = vmul.f32 %v4971_v59, %v4971_v59 }
 0x437   :  { %v2833_v10 = vadd.f32 0.8, %v2825_v60  ;;  %v2826_v11 = vsub.f32 %v2810_v62, %v2818_v3 }
 0x439   :  { %v2834_v12 = vadd.f32 0.8, %v2826_v11  ;;  %3414 = vrsqrt.f32 %v2833_v10 }
 0x43b   :  { %3416 = vrsqrt.f32 %v2834_v12 }
 0x446   :  { %v3415_v13 = vpop.eup %3414 }
 0x448   :  { %v3417_v17 = vpop.eup %3416 }
 0x449   :  { %v2855_v19 = vcombine.low %v3415_v13, %v3417_v17 }
 0x461   :  { %v2643_v22 = vpop.f32.mrf.mxu0 }
 0x462   :  { %v2684_v23 = vpop.f32.mrf.mxu1 }
 0x463   :  { %v4975_v24 = vadd.f32 %v2684_v23, %v2643_v22  ;;  %v2645_v25 = vpop.f32.mrf.mxu0 }
 0x464   :  { %v2686_v18 = vpop.f32.mrf.mxu1 }
 0x465   :  { %v2729_v8 = vrot.slane %v4975_v24, 4  ;;  %v2747_v9 = vmul.f32 %v4975_v24, %v4975_v24  ;;  %v4980_v29 = vadd.f32 %v2686_v18, %v2645_v25  ;;  %v2647_v30 = vpop.f32.mrf.mxu0 }
 0x466   :  { %v2688_v31 = vpop.f32.mrf.mxu1 }
 0x467   :  { %v2730_v32 = vadd.f32 %v2729_v8, %v4975_v24  ;;  %v2785_v36 = vrot.slane %v2747_v9, 4  ;;  %v2735_v38 = vrot.slane %v4980_v29, 4  ;;  %v2748_v37 = vmul.f32 %v4980_v29, %v4980_v29  ;;  %v2648_v40 = vpop.f32.mrf.mxu0 }
 0x468   :  { %v2689_v39 = vpop.f32.mrf.mxu1  ;;  %v2877_v31 = vrot.slane %v2855_v19, %v4015_v28  ;;  %v2691_v40 = vld [vmem:[%s5074_s10] sm:$0xff]  ;;  %v2931_v19 = vsub.s32 6, %v4012_v26 }
 0x469   :  { %v2731_v41 = vrot.slane %v2730_v32, 2  ;;  %v2786_v42 = vadd.f32 %v2785_v36, %v2747_v9  ;;  %v2736_v43 = vadd.f32 %v2735_v38, %v4980_v29  ;;  %v2791_v44 = vrot.slane %v2748_v37, 4 }
 0x46a   :  { %v2893_v38 = vrot.slane %v2885_v63, %v4015_v28 }
 0x46b   :  { %v2732_v45 = vadd.f32 %v2731_v41, %v2730_v32  ;;  %v2787_v46 = vrot.slane %v2786_v42, 2  ;;  %v2737_v47 = vrot.slane %v2736_v43, 2  ;;  %v2792_v49 = vadd.f32 %v2791_v44, %v2748_v37 }
 0x46c   :  { %v2923_v41 = vsub.s32 4, %v4012_v26 }
 0x46d   :  { %v2733_v53 = vrot.slane %v2732_v45, 1  ;;  %v2788_v54 = vadd.f32 %v2787_v46, %v2786_v42  ;;  %v2738_v55 = vadd.f32 %v2737_v47, %v2736_v43  ;;  %v2793_v56 = vrot.slane %v2792_v49, 2 }
 0x46e   :  { %v2927_v42 = vsub.s32 5, %v4012_v26  ;;  %v2935_v43 = vsub.s32 7, %v4012_v26 }
 0x46f   :  { %v2734_v0 = vadd.f32 %v2733_v53, %v2732_v45  ;;  %v2789_v4 = vrot.slane %v2788_v54, 1  ;;  %v2739_v5 = vrot.slane %v2738_v55, 1  ;;  %v2794_v6 = vadd.f32 %v2793_v56, %v2792_v49 }
 0x471   :  { %v2790_v57 = vadd.f32 %v2789_v4, %v2788_v54  ;;  %v2803_v58 = vmul.f32 0.125, %v2734_v0  ;;  %v2740_v60 = vadd.f32 %v2739_v5, %v2738_v55  ;;  %v2795_v62 = vrot.slane %v2794_v6, 1 }
 0x473   :  { %v2811_v3 = vmul.f32 0.125, %v2790_v57  ;;  %v2819_v10 = vmul.f32 %v2803_v58, %v2803_v58  ;;  %v2796_v11 = vadd.f32 %v2795_v62, %v2794_v6  ;;  %v2804_v12 = vmul.f32 0.125, %v2740_v60 }
 0x475   :  { %v2827_v13 = vsub.f32 %v2811_v3, %v2819_v10  ;;  %v2812_v17 = vmul.f32 0.125, %v2796_v11  ;;  %v2820_v22 = vmul.f32 %v2804_v12, %v2804_v12 }
 0x477   :  { %v2835_v23 = vadd.f32 0.8, %v2827_v13  ;;  %v2828_v25 = vsub.f32 %v2812_v17, %v2820_v22 }
 0x479   :  { %v2836_v18 = vadd.f32 0.8, %v2828_v25  ;;  %3418 = vrsqrt.f32 %v2835_v23 }
 0x47b   :  { %3420 = vrsqrt.f32 %v2836_v18 }
 0x486   :  { %v3419_v8 = vpop.eup %3418 }
 0x488   :  { %v3421_v9 = vpop.eup %3420 }
 0x489   :  { %v2856_v30 = vcombine.low %v3419_v8, %v3421_v9 }
 0x48b   :  { %v2884_v32 = vrot.slane %v2856_v30, %v4015_v28 }
 0x48d   :  { %v2886_v36 = vcombine.low %v2877_v31, %v2884_v32 }
 0x48f   :  { %v2900_v37 = vrot.slane %v2886_v36, %v4015_v28 }
 0x491   :  { %v2901_v39 = vcombine.low %v2893_v38, %v2900_v37 }
 0x493   :  { %v2903_v44 = vmul.f32 %v2901_v39, %v2691_v40 }
 0x495   :  { %v2908_v45 = vrot.slane %v2903_v44, %v4023_v34  ;;  %v2912_v16 = vrot.slane %v2903_v44, %v4026_v35  ;;  %v2916_v61 = vrot.slane %v2903_v44, %v4290_v50  ;;  %v2920_v63 = vrot.slane %v2903_v44, %v4293_v52 }
 0x496   :  { %v2924_v46 = vrot.slane %v2903_v44, %v2923_v41  ;;  %v2928_v47 = vrot.slane %v2903_v44, %v2927_v42  ;;  %v2932_v49 = vrot.slane %v2903_v44, %v2931_v19  ;;  %v2936_v53 = vrot.slane %v2903_v44, %v2935_v43 }
 0x497   :  { %v2945_v54 = vmul.f32 %v2908_v45, %v4919_v48  ;;  %v2946_v55 = vmul.f32 %v2912_v16, %v4923_v7  ;;  %v2947_v56 = vmul.f32 %v2916_v61, %v4939_v1  ;;  %v2948_v26 = vmul.f32 %v2920_v63, %v4943_v51 }
 0x498   :  { %v2949_v0 = vmul.f32 %v2924_v46, %v4967_v2  ;;  %v2950_v4 = vmul.f32 %v2928_v47, %v4971_v59  ;;  %v2951_v5 = vmul.f32 %v2932_v49, %v2803_v58  ;;  %v2952_v6 = vmul.f32 %v2936_v53, %v2804_v12 }
 0x499   :  { %v2961_v57 = vcombine.low %v2945_v54, %v2946_v55  ;;  %v2962_v60 = vcombine.low %v2947_v56, %v2948_v26  ;;  %v3012_v62 = vmul.f32 %v2908_v45, %v4907_v27  ;;  %v3013_v3 = vmul.f32 %v2912_v16, %v4912_v33 }
 0x49a   :  { %v2963_v10 = vcombine.low %v2949_v0, %v2950_v4  ;;  %v2964_v48 = vcombine.low %v2951_v5, %v2952_v6  ;;  %v3014_v7 = vmul.f32 %v2916_v61, %v4927_v21  ;;  %v3015_v1 = vmul.f32 %v2920_v63, %v4932_v15 }
 0x49b   :  { %v2971_v51 = vrot.slane %v2961_v57, %v4015_v28  ;;  %v2978_v2 = vrot.slane %v2962_v60, %v4015_v28  ;;  %v3016_v59 = vmul.f32 %v2924_v46, %v4955_v20  ;;  %v3017_v58 = vmul.f32 %v2928_v47, %v4960_v14  ;;  %v2692_v20 = vld [vmem:[%s5075_s11] sm:$0xff] }
 0x49c   :  { %v2985_v11 = vrot.slane %v2963_v10, %v4015_v28  ;;  %v2992_v27 = vrot.slane %v2964_v48, %v4015_v28  ;;  %v3018_v33 = vmul.f32 %v2932_v49, %v4975_v24  ;;  %v3019_v12 = vmul.f32 %v2936_v53, %v4980_v29 }
 0x49d   :  { %v2993_v13 = vcombine.low %v2971_v51, %v2978_v2 }
 0x49e   :  { %v2994_v21 = vcombine.low %v2985_v11, %v2992_v27 }
 0x49f   :  { %v3001_v15 = vrot.slane %v2993_v13, %v4015_v28 }
 0x4a0   :  { %v3008_v17 = vrot.slane %v2994_v21, %v4015_v28 }
 0x4a2   :  { %v3009_v22 = vcombine.low %v3001_v15, %v3008_v17 }
 0x4a4   :  { %v3011_v14 = vsub.f32 %v2692_v20, %v3009_v22 }
 0x4a6   :  { %v3024_v23 = vrot.slane %v3011_v14, %v4023_v34  ;;  %v3028_v25 = vrot.slane %v3011_v14, %v4026_v35  ;;  %v3032_v24 = vrot.slane %v3011_v14, %v4290_v50  ;;  %v3036_v29 = vrot.slane %v3011_v14, %v4293_v52 }
 0x4a7   :  { %v3040_v18 = vrot.slane %v3011_v14, %v2923_v41  ;;  %v3044_v8 = vrot.slane %v3011_v14, %v2927_v42  ;;  %v3048_v9 = vrot.slane %v3011_v14, %v2931_v19  ;;  %v3052_v30 = vrot.slane %v3011_v14, %v2935_v43 }
 0x4a8   :  { %v3061_v31 = vadd.f32 %v3024_v23, %v3012_v62  ;;  %v3062_v28 = vadd.f32 %v3028_v25, %v3013_v3  ;;  %v3063_v32 = vadd.f32 %v3032_v24, %v3014_v7  ;;  %v3064_v36 = vadd.f32 %v3036_v29, %v3015_v1 }
 0x4a9   :  { %v3065_v38 = vadd.f32 %v3040_v18, %v3016_v59  ;;  %v3066_v37 = vadd.f32 %v3044_v8, %v3017_v58  ;;  %v3067_v40 = vadd.f32 %v3048_v9, %v3018_v33  ;;  %v3068_v39 = vadd.f32 %v3052_v30, %v3019_v12 }
 0x4aa   :  { %vm3069_vm9 = vcmp.ge.f32.partialorder %v3061_v31, 0.0  ;;  %vm3070_vm10 = vcmp.ge.f32.partialorder %v3062_v28, 0.0  ;;  %vm3071_vm11 = vcmp.ge.f32.partialorder %v3063_v32, 0.0  ;;  %vm3072_vm12 = vcmp.ge.f32.partialorder %v3064_v36, 0.0 }
 0x4ab   :  { %vm3073_vm13 = vcmp.ge.f32.partialorder %v3065_v38, 0.0  ;;  %vm3074_vm14 = vcmp.ge.f32.partialorder %v3066_v37, 0.0  ;;  %vm3075_vm15 = vcmp.ge.f32.partialorder %v3067_v40, 0.0  ;;  %vm3076_vm0 = vcmp.ge.f32.partialorder %v3068_v39, 0.0 }
 0x4ac   :  { %v3077_v34 = vmul.f32 0.2, %v3061_v31  ;;  %v3078_v35 = vmul.f32 0.2, %v3062_v28  ;;  %v3079_v50 = vmul.f32 0.2, %v3063_v32 }
 0x4ad   :  { %v3080_v52 = vmul.f32 0.2, %v3064_v36  ;;  %v3081_v41 = vmul.f32 0.2, %v3065_v38  ;;  %v3082_v42 = vmul.f32 0.2, %v3066_v37 }
 0x4ae   :  { %v3083_v19 = vmul.f32 0.2, %v3067_v40  ;;  %v3084_v43 = vmul.f32 0.2, %v3068_v39  ;;  %v3085_v44 = vsel %vm3069_vm9, %v3061_v31, %v3077_v34  ;;  %v3086_v45 = vsel %vm3070_vm10, %v3062_v28, %v3078_v35 }
 0x4af   :  { %v3087_v16 = vsel %vm3071_vm11, %v3063_v32, %v3079_v50  ;;  %v3088_v61 = vsel %vm3072_vm12, %v3064_v36, %v3080_v52  ;;  %v3089_v63 = vsel %vm3073_vm13, %v3065_v38, %v3081_v41  ;;  %v3090_v46 = vsel %vm3074_vm14, %v3066_v37, %v3082_v42  ;;  %3093 = vst [vmem:[%s5076_s12] sm:$0xff] %v3085_v44 }
 0x4b0   :  { %3094 = vst [vmem:[%s5076_s12 + $0x8] sm:$0xff] %v3086_v45  ;;  %v3091_v47 = vsel %vm3075_vm15, %v3067_v40, %v3083_v19  ;;  %v3092_v49 = vsel %vm3076_vm0, %v3068_v39, %v3084_v43  ;;  %3095 = vst [vmem:[%s5076_s12 + $0x10] sm:$0xff] %v3087_v16 }
 0x4b1   :  { %3096 = vst [vmem:[%s5076_s12 + $0x18] sm:$0xff] %v3088_v61  ;;  %3097 = vst [vmem:[%s5076_s12 + $0x20] sm:$0xff] %v3089_v63 }
 0x4b2   :  { %3098 = vst [vmem:[%s5076_s12 + $0x28] sm:$0xff] %v3090_v46  ;;  %3099 = vst [vmem:[%s5076_s12 + $0x30] sm:$0xff] %v3091_v47 }
 0x4b3   :  { %3100 = vst [vmem:[%s5076_s12 + $0x38] sm:$0xff] %v3092_v49 }

</bundles_post_ra>
